<compile_context>
chip_gen: v7x
topology: tpu7x:2x2x1
jax: 0.10.0
libtpu: 0.0.40
codegen_flags: <defaults>
</compile_context>

<pallas_src>
import functools

import jax
import jax.numpy as jnp
import numpy as np
from jax import lax
from jax.experimental import pallas as pl
from jax.experimental.pallas import tpu as pltpu


def get_group_size(channels):
    # TODO(synk): getGroupSize() is not defined in the provided spec; use the common
    # "largest divisor <= 8" heuristic (8 groups for 64 / 128 channels).
    for g in range(min(8, channels), 0, -1):
        if channels % g == 0:
            return g
    return 1


def _char_extractor_kernel(
    x_ref,
    w1a_ref, b1a_ref, g1_ref, be1_ref, a1_ref,
    w1b_ref, b1b_ref,
    w2_ref, b2_ref, g2_ref, be2_ref, a2_ref,
    fc1w_ref, fc1b_ref, fc2w_ref, fc2b_ref,
    out_ref,
    *, B, L, Lo, cnt1, cnt2):
    f32 = jnp.float32
    R = B * L
    x = x_ref[...].astype(f32)                               # (B*L, C_in), batch folded into rows

    row = lax.broadcasted_iota(jnp.int32, (R, 1), 0)         # global row index
    pos = row % L                                            # position inside each sample
    at_first = pos == 0
    at_last = pos == L - 1

    def shift_dn(v):   # v[l-1] within each sample, zero row at l == 0 (conv zero pad)
        return jnp.where(at_first, 0.0, pltpu.roll(v, 1, axis=0))

    def shift_up(v):   # v[l+1] within each sample, zero row at l == L-1
        return jnp.where(at_last, 0.0, pltpu.roll(v, R - 1, axis=0))

    def stack_rows(rows):
        # Stack a short list of (1, C) rows into (len(rows), C) with VPU selects only.
        n = len(rows)
        idx = lax.broadcasted_iota(jnp.int32, (n, 1), 0)
        out = rows[-1]
        for k in range(n - 2, -1, -1):
            out = jnp.where(idx == k, rows[k], out)
        return out

    def group_norm(v, a_mat, gamma, beta, count, valid_f=None, eps=1e-5):
        # Per-sample GroupNorm over batch-folded rows.  v: (B*L, C).
        # valid_f: optional (B*L, 1) 0/1 mask of rows that contribute to the statistics.
        vm = v if valid_f is None else v * valid_f
        stats = []
        for b in range(B):
            sl = slice(b * L, (b + 1) * L)
            stats.append(jnp.sum(vm[sl], axis=0, keepdims=True))           # s1_b
            stats.append(jnp.sum(vm[sl] * v[sl], axis=0, keepdims=True))   # s2_b
        st = stack_rows(stats)                                             # (2B, C)
        # one fused stats matmul: per-channel group mean / E[x^2] for every sample
        g = jnp.dot(st, a_mat, preferred_element_type=f32) * (1.0 / count)
        scales, shifts = [], []
        for b in range(B):
            mean_b = g[2 * b:2 * b + 1]
            msq_b = g[2 * b + 1:2 * b + 2]
            # TODO(synk): single-pass E[x^2]-E[x]^2 in f32; switch to two-pass stats if
            # tighter than ~1e-3 numerics are ever needed.
            var_b = jnp.maximum(msq_b - mean_b * mean_b, 0.0)
            scale_b = lax.rsqrt(var_b + eps) * gamma
            scales.append(scale_b)
            shifts.append(beta - mean_b * scale_b)
        scale_full, shift_full = scales[-1], shifts[-1]
        for b in range(B - 2, -1, -1):                        # broadcast per-sample affine
            in_b = row < (b + 1) * L
            scale_full = jnp.where(in_b, scales[b], scale_full)
            shift_full = jnp.where(in_b, shifts[b], shift_full)
        return v * scale_full + shift_full

    # ---- conv1: ReLU -> Conv1d(C_in->dim, 3, pad=1) -> GroupNorm -> ReLU ----
    h = jnp.maximum(x, 0.0)                                   # relu(pad(x)) == pad(relu(x))
    h3 = jnp.concatenate([shift_dn(h), h, shift_up(h)], axis=1)          # (R, 3*C_in)
    a = jnp.dot(h3, w1a_ref[...], preferred_element_type=f32) + b1a_ref[...]
    a = jnp.maximum(group_norm(a, a1_ref[...], g1_ref[...], be1_ref[...], cnt1), 0.0)

    # ---- Conv1d(dim->C_in, 3, pad=1) + residual ----
    a3 = jnp.concatenate([shift_dn(a), a, shift_up(a)], axis=1)          # (R, 3*dim)
    c1 = jnp.dot(a3, w1b_ref[...], preferred_element_type=f32) + b1b_ref[...]
    r = jnp.maximum(c1 + x, 0.0)                              # conv2's leading ReLU

    # ---- conv2: MaxPool1d(2) -> Conv1d(C_in->2*dim, 3, valid) -> GroupNorm -> ReLU ----
    # MaxPool + the valid-conv row selection are expressed with rolls + a validity mask:
    # mx[b*L + 2j] == pooled m[j]; row (b*L + 2j) of c2 is the conv2 output at position j
    # and only rows with even pos < 2*Lo are real; every later sum masks with validf.
    mx = jnp.maximum(r, pltpu.roll(r, R - 1, axis=0))
    m3 = jnp.concatenate(
        [mx, pltpu.roll(mx, R - 2, axis=0), pltpu.roll(mx, R - 4, axis=0)], axis=1)
    c2 = jnp.dot(m3, w2_ref[...], preferred_element_type=f32) + b2_ref[...]   # (R, 2*dim)
    validf = jnp.logical_and(pos % 2 == 0, pos < 2 * Lo).astype(f32)          # (R, 1)
    c2 = group_norm(c2, a2_ref[...], g2_ref[...], be2_ref[...], cnt2, valid_f=validf)
    c2 = jnp.maximum(c2, 0.0)

    # ---- adaptive_avg_pool1d(., 1) over the Lo valid rows of each sample ----
    cm = c2 * validf
    pooled = stack_rows(
        [jnp.sum(cm[b * L:(b + 1) * L], axis=0, keepdims=True) for b in range(B)]
    ) * (1.0 / Lo)                                                            # (B, 2*dim)

    # ---- fc: Linear -> ReLU -> Linear ----
    hid = jnp.maximum(
        jnp.dot(pooled, fc1w_ref[...], preferred_element_type=f32) + fc1b_ref[...], 0.0)
    out = jnp.dot(hid, fc2w_ref[...], preferred_element_type=f32) + fc2b_ref[...]
    out_ref[...] = out.astype(out_ref.dtype)


def prepare_params(params):
    """One-time host-side prep: fused conv weights, row vectors, group-indicator mats."""
    f32 = jnp.float32
    dim = params["conv1a_w"].shape[0]
    dim2 = params["conv2_w"].shape[0]
    style_dim = params["fc2_w"].shape[0]
    G1, G2 = get_group_size(dim), get_group_size(dim2)

    def fuse(w):   # (C_out, C_in, K) -> (K*C_in, C_out): taps concatenated along input
        co, ci, k = w.shape
        return jnp.transpose(w, (2, 1, 0)).reshape(k * ci, co).astype(f32)

    row = lambda v: jnp.asarray(v).reshape(1, -1).astype(f32)
    a1 = jnp.asarray(np.kron(np.eye(G1), np.ones((dim // G1, dim // G1))), dtype=f32)
    a2 = jnp.asarray(np.kron(np.eye(G2), np.ones((dim2 // G2, dim2 // G2))), dtype=f32)

    return dict(
        w1a=fuse(params["conv1a_w"]), b1a=row(params["conv1a_b"]),
        g1=row(params["gn1_g"]), be1=row(params["gn1_b"]), a1=a1,
        w1b=fuse(params["conv1b_w"]), b1b=row(params["conv1b_b"]),
        w2=fuse(params["conv2_w"]), b2=row(params["conv2_b"]),
        g2=row(params["gn2_g"]), be2=row(params["gn2_b"]), a2=a2,
        fc1w=jnp.transpose(params["fc1_w"]).astype(f32), fc1b=row(params["fc1_b"]),
        fc2w=jnp.transpose(params["fc2_w"]).astype(f32), fc2b=row(params["fc2_b"]),
        dim=dim, dim2=dim2, style_dim=style_dim, G1=G1, G2=G2)


def char_extractor_forward(x, pp):
    """x: (B, input_dim, L) in PyTorch NCW layout.  pp: prepare_params(...).  -> (B, style_dim)."""
    B, C_in, L = x.shape
    if L % 2 != 0 or L // 2 <= 2:
        # TODO(synk): odd / very short sequences need PyTorch's MaxPool1d truncation rules.
        raise ValueError("char_extractor_forward assumes even L with L//2 > 2")
    dim, dim2, style_dim = pp["dim"], pp["dim2"], pp["style_dim"]
    Lo = L // 2 - 2
    f32 = jnp.float32

    # Only per-call host glue: channels-last + fold batch into the row (sublane) axis.
    x2 = jnp.transpose(x, (0, 2, 1)).reshape(B * L, C_in).astype(f32)

    kernel = functools.partial(
        _char_extractor_kernel, B=B, L=L, Lo=Lo,
        cnt1=float(L * (dim // pp["G1"])), cnt2=float(Lo * (dim2 // pp["G2"])))

    operands = (x2, pp["w1a"], pp["b1a"], pp["g1"], pp["be1"], pp["a1"],
                pp["w1b"], pp["b1b"],
                pp["w2"], pp["b2"], pp["g2"], pp["be2"], pp["a2"],
                pp["fc1w"], pp["fc1b"], pp["fc2w"], pp["fc2b"])
    # Whole arrays as single VMEM-resident blocks (total footprint << 1 MiB).
    in_specs = [pl.BlockSpec(op.shape, lambda i: (0, 0)) for op in operands]

    out = pl.pallas_call(
        kernel,
        out_shape=jax.ShapeDtypeStruct((B, style_dim), f32),
        grid_spec=pltpu.PrefetchScalarGridSpec(
            num_scalar_prefetch=0,
            grid=(1,),                                 # whole batch in one step (single-TC win)
            in_specs=in_specs,
            out_specs=pl.BlockSpec((B, style_dim), lambda i: (0, 0)),
        ),
        compiler_params=pltpu.CompilerParams(dimension_semantics=("arbitrary",)),
    )(*operands)
    return out


# ------------------------- pure-JAX reference (for the check) -------------------------
def _conv1d_ref(x, w, b, padding):
    out = lax.conv_general_dilated(
        x, w, window_strides=(1,), padding=((padding, padding),),
        dimension_numbers=("NCH", "OIH", "NCH"), precision=lax.Precision.HIGHEST)
    return out + b[None, :, None]


def _group_norm_ref(x, num_groups, gamma, beta, eps=1e-5):
    B, C, L = x.shape
    xg = x.reshape(B, num_groups, (C // num_groups) * L)
    mean = xg.mean(axis=-1, keepdims=True)
    var = ((xg - mean) ** 2).mean(axis=-1, keepdims=True)
    xn = ((xg - mean) / jnp.sqrt(var + eps)).reshape(B, C, L)
    return xn * gamma[None, :, None] + beta[None, :, None]


def char_extractor_ref(x, params):
    B, C_in, L = x.shape
    dim = params["conv1a_w"].shape[0]
    dim2 = params["conv2_w"].shape[0]
    G1, G2 = get_group_size(dim), get_group_size(dim2)

    h = jnp.maximum(x, 0.0)
    h = _conv1d_ref(h, params["conv1a_w"], params["conv1a_b"], 1)
    h = _group_norm_ref(h, G1, params["gn1_g"], params["gn1_b"])
    h = jnp.maximum(h, 0.0)
    h = _conv1d_ref(h, params["conv1b_w"], params["conv1b_b"], 1)
    y = h + x

    r = jnp.maximum(y, 0.0)
    r = r.reshape(B, C_in, L // 2, 2).max(axis=-1)            # MaxPool1d(2)
    r = _conv1d_ref(r, params["conv2_w"], params["conv2_b"], 0)
    r = _group_norm_ref(r, G2, params["gn2_g"], params["gn2_b"])
    r = jnp.maximum(r, 0.0)

    pooled = r.mean(axis=-1)                                  # adaptive_avg_pool1d(., 1)
    hid = jnp.maximum(
        jnp.dot(pooled, params["fc1_w"].T, precision=lax.Precision.HIGHEST)
        + params["fc1_b"], 0.0)
    return (jnp.dot(hid, params["fc2_w"].T, precision=lax.Precision.HIGHEST)
            + params["fc2_b"])


if __name__ == "__main__":
    jax.config.update("jax_default_matmul_precision", "highest")

    # CharExtractor(input_dim=8, dim=64, style_dim=32), x: (batch=2, input_dim=8, seq=16)
    B, C_in, L = 2, 8, 16
    dim, style_dim = 64, 32
    dim2 = 2 * dim

    key = jax.random.PRNGKey(0)
    keys = jax.random.split(key, 16)

    def uinit(k, shape, fan_in):
        bound = 1.0 / float(np.sqrt(fan_in))
        return jax.random.uniform(k, shape, minval=-bound, maxval=bound, dtype=jnp.float32)

    x = jax.random.normal(keys[0], (B, C_in, L), dtype=jnp.float32)

    params = {
        "conv1a_w": uinit(keys[1], (dim, C_in, 3), C_in * 3),
        "conv1a_b": uinit(keys[2], (dim,), C_in * 3),
        "gn1_g": 1.0 + 0.1 * jax.random.normal(keys[3], (dim,), dtype=jnp.float32),
        "gn1_b": 0.1 * jax.random.normal(keys[4], (dim,), dtype=jnp.float32),
        "conv1b_w": uinit(keys[5], (C_in, dim, 3), dim * 3),
        "conv1b_b": uinit(keys[6], (C_in,), dim * 3),
        "conv2_w": uinit(keys[7], (dim2, C_in, 3), C_in * 3),
        "conv2_b": uinit(keys[8], (dim2,), C_in * 3),
        "gn2_g": 1.0 + 0.1 * jax.random.normal(keys[9], (dim2,), dtype=jnp.float32),
        "gn2_b": 0.1 * jax.random.normal(keys[10], (dim2,), dtype=jnp.float32),
        "fc1_w": uinit(keys[11], (dim2, dim2), dim2),
        "fc1_b": uinit(keys[12], (dim2,), dim2),
        "fc2_w": uinit(keys[13], (style_dim, dim2), dim2),
        "fc2_b": uinit(keys[14], (style_dim,), dim2),
    }

    pp = prepare_params(params)          # one-time host prep (hoisted out of the call path)
    y = char_extractor_forward(x, pp)
    y = jax.block_until_ready(y)

    ref = char_extractor_ref(x, params)
    assert y.shape == (B, style_dim)
    max_err = float(jnp.max(jnp.abs(y - ref)))
    assert jnp.allclose(y, ref, atol=5e-3, rtol=5e-3), max_err

    print("KERNEL_OK")
</pallas_src>

<mosaic_0001>
module attributes {stable_mosaic.version = 11 : i64} {
  func.func @_char_extractor_kernel(%arg0: i32, %arg1: memref<32x8xf32, #tpu.memory_space<vmem>>, %arg2: memref<24x64xf32, #tpu.memory_space<vmem>>, %arg3: memref<1x64xf32, #tpu.memory_space<vmem>>, %arg4: memref<1x64xf32, #tpu.memory_space<vmem>>, %arg5: memref<1x64xf32, #tpu.memory_space<vmem>>, %arg6: memref<64x64xf32, #tpu.memory_space<vmem>>, %arg7: memref<192x8xf32, #tpu.memory_space<vmem>>, %arg8: memref<1x8xf32, #tpu.memory_space<vmem>>, %arg9: memref<24x128xf32, #tpu.memory_space<vmem>>, %arg10: memref<1x128xf32, #tpu.memory_space<vmem>>, %arg11: memref<1x128xf32, #tpu.memory_space<vmem>>, %arg12: memref<1x128xf32, #tpu.memory_space<vmem>>, %arg13: memref<128x128xf32, #tpu.memory_space<vmem>>, %arg14: memref<128x128xf32, #tpu.memory_space<vmem>>, %arg15: memref<1x128xf32, #tpu.memory_space<vmem>>, %arg16: memref<128x32xf32, #tpu.memory_space<vmem>>, %arg17: memref<1x32xf32, #tpu.memory_space<vmem>>, %arg18: memref<2x32xf32, #tpu.memory_space<vmem>>) attributes {dimension_semantics = [#tpu.dimension_semantics<arbitrary>], iteration_bounds = array<i64: 1>, scalar_prefetch = 0 : i64, scratch_operands = 0 : i64, tpu.core_type = #tpu.core_type<tc>, window_params = [{pipeline_mode = #tpu.pipeline_mode<synchronous>, transform_indices = @transform_0, window_bounds = array<i64: 32, 8>}, {pipeline_mode = #tpu.pipeline_mode<synchronous>, transform_indices = @transform_1, window_bounds = array<i64: 24, 64>}, {pipeline_mode = #tpu.pipeline_mode<synchronous>, transform_indices = @transform_2, window_bounds = array<i64: 1, 64>}, {pipeline_mode = #tpu.pipeline_mode<synchronous>, transform_indices = @transform_3, window_bounds = array<i64: 1, 64>}, {pipeline_mode = #tpu.pipeline_mode<synchronous>, transform_indices = @transform_4, window_bounds = array<i64: 1, 64>}, {pipeline_mode = #tpu.pipeline_mode<synchronous>, transform_indices = @transform_5, window_bounds = array<i64: 64, 64>}, {pipeline_mode = #tpu.pipeline_mode<synchronous>, transform_indices = @transform_6, window_bounds = array<i64: 192, 8>}, {pipeline_mode = #tpu.pipeline_mode<synchronous>, transform_indices = @transform_7, window_bounds = array<i64: 1, 8>}, {pipeline_mode = #tpu.pipeline_mode<synchronous>, transform_indices = @transform_8, window_bounds = array<i64: 24, 128>}, {pipeline_mode = #tpu.pipeline_mode<synchronous>, transform_indices = @transform_9, window_bounds = array<i64: 1, 128>}, {pipeline_mode = #tpu.pipeline_mode<synchronous>, transform_indices = @transform_10, window_bounds = array<i64: 1, 128>}, {pipeline_mode = #tpu.pipeline_mode<synchronous>, transform_indices = @transform_11, window_bounds = array<i64: 1, 128>}, {pipeline_mode = #tpu.pipeline_mode<synchronous>, transform_indices = @transform_12, window_bounds = array<i64: 128, 128>}, {pipeline_mode = #tpu.pipeline_mode<synchronous>, transform_indices = @transform_13, window_bounds = array<i64: 128, 128>}, {pipeline_mode = #tpu.pipeline_mode<synchronous>, transform_indices = @transform_14, window_bounds = array<i64: 1, 128>}, {pipeline_mode = #tpu.pipeline_mode<synchronous>, transform_indices = @transform_15, window_bounds = array<i64: 128, 32>}, {pipeline_mode = #tpu.pipeline_mode<synchronous>, transform_indices = @transform_16, window_bounds = array<i64: 1, 32>}, {pipeline_mode = #tpu.pipeline_mode<synchronous>, transform_indices = @transform_17, window_bounds = array<i64: 2, 32>}]} {
    %c0 = arith.constant 0 : index
    %c0_0 = arith.constant 0 : index
    %0 = vector.load %arg1[%c0, %c0_0] : memref<32x8xf32, #tpu.memory_space<vmem>>, vector<32x8xf32>
    %1 = tpu.iota {dimensions = array<i32: 0>} : vector<32x1xi32>
    %c16_i32 = arith.constant 16 : i32
    %c0_i32 = arith.constant 0 : i32
    %2 = arith.cmpi eq, %c16_i32, %c0_i32 : i32
    %c1_i32 = arith.constant 1 : i32
    %3 = arith.select %2, %c1_i32, %c16_i32 : i32
    %4 = vector.broadcast %3 : i32 to vector<32x1xi32>
    %5 = arith.remsi %1, %4 : vector<32x1xi32>
    %c0_i32_1 = arith.constant 0 : i32
    %6 = vector.broadcast %c0_i32_1 : i32 to vector<32x1xi32>
    %7 = arith.cmpi ne, %5, %6 : vector<32x1xi32>
    %c0_i32_2 = arith.constant 0 : i32
    %8 = vector.broadcast %c0_i32_2 : i32 to vector<32x1xi32>
    %9 = arith.cmpi slt, %5, %8 : vector<32x1xi32>
    %c0_i32_3 = arith.constant 0 : i32
    %10 = arith.cmpi slt, %3, %c0_i32_3 : i32
    %11 = vector.broadcast %10 : i1 to vector<32x1xi1>
    %12 = vector.broadcast %11 : vector<32x1xi1> to vector<32x1xi1>
    %13 = arith.xori %9, %12 : vector<32x1xi1>
    %14 = arith.andi %13, %7 : vector<32x1xi1>
    %15 = vector.broadcast %3 : i32 to vector<32x1xi32>
    %16 = arith.addi %5, %15 : vector<32x1xi32>
    %17 = arith.select %14, %16, %5 : vector<32x1xi1>, vector<32x1xi32>
    %c0_i32_4 = arith.constant 0 : i32
    %18 = vector.broadcast %c0_i32_4 : i32 to vector<32x1xi32>
    %19 = arith.cmpi eq, %17, %18 : vector<32x1xi32>
    %c15_i32 = arith.constant 15 : i32
    %20 = vector.broadcast %c15_i32 : i32 to vector<32x1xi32>
    %21 = arith.cmpi eq, %17, %20 : vector<32x1xi32>
    %cst = arith.constant 0.000000e+00 : f32
    %22 = vector.broadcast %cst : f32 to vector<32x8xf32>
    %23 = arith.maximumf %0, %22 : vector<32x8xf32>
    %c1_i32_5 = arith.constant 1 : i32
    %24 = tpu.dynamic_rotate %23 by %c1_i32_5 dim 0 : vector<32x8xf32>, i32 -> vector<32x8xf32>
    %cst_6 = arith.constant 0.000000e+00 : f32
    %25 = vector.shape_cast %19 : vector<32x1xi1> to vector<32x1xi1>
    %26 = vector.broadcast %25 : vector<32x1xi1> to vector<32x8xi1>
    %27 = vector.broadcast %cst_6 : f32 to vector<32x8xf32>
    %28 = arith.select %26, %27, %24 : vector<32x8xi1>, vector<32x8xf32>
    %c31_i32 = arith.constant 31 : i32
    %29 = tpu.dynamic_rotate %23 by %c31_i32 dim 0 : vector<32x8xf32>, i32 -> vector<32x8xf32>
    %cst_7 = arith.constant 0.000000e+00 : f32
    %30 = vector.shape_cast %21 : vector<32x1xi1> to vector<32x1xi1>
    %31 = vector.broadcast %30 : vector<32x1xi1> to vector<32x8xi1>
    %32 = vector.broadcast %cst_7 : f32 to vector<32x8xf32>
    %33 = arith.select %31, %32, %29 : vector<32x8xi1>, vector<32x8xf32>
    %34 = tpu.concatenate %28, %23, %33 in 1 : vector<32x8xf32>, vector<32x8xf32>, vector<32x8xf32> -> vector<32x24xf32>
    %c0_8 = arith.constant 0 : index
    %c0_9 = arith.constant 0 : index
    %35 = vector.load %arg2[%c0_8, %c0_9] : memref<24x64xf32, #tpu.memory_space<vmem>>, vector<24x64xf32>
    %cst_10 = arith.constant dense<0.000000e+00> : vector<32x64xf32>
    %36 = tpu.matmul %34, %35, %cst_10 {dimension_numbers = #tpu.dot_dimension_numbers<[1], [0], [0], [1], [0, 0, 1, 1], [], []>, precision = #tpu.contract_precision<fp32>} : vector<32x24xf32>, vector<24x64xf32>, vector<32x64xf32> -> vector<32x64xf32>
    %c0_11 = arith.constant 0 : index
    %c0_12 = arith.constant 0 : index
    %37 = vector.load %arg3[%c0_11, %c0_12] : memref<1x64xf32, #tpu.memory_space<vmem>>, vector<1x64xf32>
    %38 = vector.broadcast %37 : vector<1x64xf32> to vector<32x64xf32>
    %39 = arith.addf %36, %38 : vector<32x64xf32>
    %c0_13 = arith.constant 0 : index
    %c0_14 = arith.constant 0 : index
    %40 = vector.load %arg6[%c0_13, %c0_14] : memref<64x64xf32, #tpu.memory_space<vmem>>, vector<64x64xf32>
    %c0_15 = arith.constant 0 : index
    %c0_16 = arith.constant 0 : index
    %41 = vector.load %arg4[%c0_15, %c0_16] : memref<1x64xf32, #tpu.memory_space<vmem>>, vector<1x64xf32>
    %c0_17 = arith.constant 0 : index
    %c0_18 = arith.constant 0 : index
    %42 = vector.load %arg5[%c0_17, %c0_18] : memref<1x64xf32, #tpu.memory_space<vmem>>, vector<1x64xf32>
    %43 = vector.extract_strided_slice %39 {offsets = [0, 0], sizes = [16, 64], strides = [1, 1]} : vector<32x64xf32> to vector<16x64xf32>
    %cst_19 = arith.constant dense<0.000000e+00> : vector<64xf32>
    %44 = vector.multi_reduction <add>, %43, %cst_19 [0] : vector<16x64xf32> to vector<64xf32>
    %45 = vector.shape_cast %44 : vector<64xf32> to vector<1x64xf32>
    %46 = vector.extract_strided_slice %39 {offsets = [0, 0], sizes = [16, 64], strides = [1, 1]} : vector<32x64xf32> to vector<16x64xf32>
    %47 = vector.extract_strided_slice %39 {offsets = [0, 0], sizes = [16, 64], strides = [1, 1]} : vector<32x64xf32> to vector<16x64xf32>
    %48 = arith.mulf %46, %47 : vector<16x64xf32>
    %cst_20 = arith.constant dense<0.000000e+00> : vector<64xf32>
    %49 = vector.multi_reduction <add>, %48, %cst_20 [0] : vector<16x64xf32> to vector<64xf32>
    %50 = vector.shape_cast %49 : vector<64xf32> to vector<1x64xf32>
    %51 = vector.extract_strided_slice %39 {offsets = [16, 0], sizes = [16, 64], strides = [1, 1]} : vector<32x64xf32> to vector<16x64xf32>
    %cst_21 = arith.constant dense<0.000000e+00> : vector<64xf32>
    %52 = vector.multi_reduction <add>, %51, %cst_21 [0] : vector<16x64xf32> to vector<64xf32>
    %53 = vector.shape_cast %52 : vector<64xf32> to vector<1x64xf32>
    %54 = vector.extract_strided_slice %39 {offsets = [16, 0], sizes = [16, 64], strides = [1, 1]} : vector<32x64xf32> to vector<16x64xf32>
    %55 = vector.extract_strided_slice %39 {offsets = [16, 0], sizes = [16, 64], strides = [1, 1]} : vector<32x64xf32> to vector<16x64xf32>
    %56 = arith.mulf %54, %55 : vector<16x64xf32>
    %cst_22 = arith.constant dense<0.000000e+00> : vector<64xf32>
    %57 = vector.multi_reduction <add>, %56, %cst_22 [0] : vector<16x64xf32> to vector<64xf32>
    %58 = vector.shape_cast %57 : vector<64xf32> to vector<1x64xf32>
    %59 = tpu.iota {dimensions = array<i32: 0>} : vector<4x1xi32>
    %c2_i32 = arith.constant 2 : i32
    %60 = vector.broadcast %c2_i32 : i32 to vector<4x1xi32>
    %61 = arith.cmpi eq, %59, %60 : vector<4x1xi32>
    %62 = vector.shape_cast %61 : vector<4x1xi1> to vector<4x1xi1>
    %63 = vector.broadcast %62 : vector<4x1xi1> to vector<4x64xi1>
    %64 = vector.shape_cast %53 : vector<1x64xf32> to vector<1x64xf32>
    %65 = vector.broadcast %64 : vector<1x64xf32> to vector<4x64xf32>
    %66 = vector.shape_cast %58 : vector<1x64xf32> to vector<1x64xf32>
    %67 = vector.broadcast %66 : vector<1x64xf32> to vector<4x64xf32>
    %68 = arith.select %63, %65, %67 : vector<4x64xi1>, vector<4x64xf32>
    %c1_i32_23 = arith.constant 1 : i32
    %69 = vector.broadcast %c1_i32_23 : i32 to vector<4x1xi32>
    %70 = arith.cmpi eq, %59, %69 : vector<4x1xi32>
    %71 = vector.shape_cast %70 : vector<4x1xi1> to vector<4x1xi1>
    %72 = vector.broadcast %71 : vector<4x1xi1> to vector<4x64xi1>
    %73 = vector.shape_cast %50 : vector<1x64xf32> to vector<1x64xf32>
    %74 = vector.broadcast %73 : vector<1x64xf32> to vector<4x64xf32>
    %75 = arith.select %72, %74, %68 : vector<4x64xi1>, vector<4x64xf32>
    %c0_i32_24 = arith.constant 0 : i32
    %76 = vector.broadcast %c0_i32_24 : i32 to vector<4x1xi32>
    %77 = arith.cmpi eq, %59, %76 : vector<4x1xi32>
    %78 = vector.shape_cast %77 : vector<4x1xi1> to vector<4x1xi1>
    %79 = vector.broadcast %78 : vector<4x1xi1> to vector<4x64xi1>
    %80 = vector.shape_cast %45 : vector<1x64xf32> to vector<1x64xf32>
    %81 = vector.broadcast %80 : vector<1x64xf32> to vector<4x64xf32>
    %82 = arith.select %79, %81, %75 : vector<4x64xi1>, vector<4x64xf32>
    %cst_25 = arith.constant dense<0.000000e+00> : vector<4x64xf32>
    %83 = tpu.matmul %82, %40, %cst_25 {dimension_numbers = #tpu.dot_dimension_numbers<[1], [0], [0], [1], [0, 0, 1, 1], [], []>, precision = #tpu.contract_precision<fp32>} : vector<4x64xf32>, vector<64x64xf32>, vector<4x64xf32> -> vector<4x64xf32>
    %cst_26 = arith.constant 7.812500e-03 : f32
    %84 = vector.broadcast %cst_26 : f32 to vector<4x64xf32>
    %85 = arith.mulf %83, %84 : vector<4x64xf32>
    %86 = vector.extract_strided_slice %85 {offsets = [0, 0], sizes = [1, 64], strides = [1, 1]} : vector<4x64xf32> to vector<1x64xf32>
    %87 = vector.extract_strided_slice %85 {offsets = [1, 0], sizes = [1, 64], strides = [1, 1]} : vector<4x64xf32> to vector<1x64xf32>
    %88 = arith.mulf %86, %86 : vector<1x64xf32>
    %89 = arith.subf %87, %88 : vector<1x64xf32>
    %cst_27 = arith.constant 0.000000e+00 : f32
    %90 = vector.broadcast %cst_27 : f32 to vector<1x64xf32>
    %91 = arith.maximumf %89, %90 : vector<1x64xf32>
    %cst_28 = arith.constant 9.99999974E-6 : f32
    %92 = vector.broadcast %cst_28 : f32 to vector<1x64xf32>
    %93 = arith.addf %91, %92 : vector<1x64xf32>
    %94 = math.rsqrt %93 : vector<1x64xf32>
    %95 = arith.mulf %94, %41 : vector<1x64xf32>
    %96 = arith.mulf %86, %95 : vector<1x64xf32>
    %97 = arith.subf %42, %96 : vector<1x64xf32>
    %98 = vector.extract_strided_slice %85 {offsets = [2, 0], sizes = [1, 64], strides = [1, 1]} : vector<4x64xf32> to vector<1x64xf32>
    %99 = vector.extract_strided_slice %85 {offsets = [3, 0], sizes = [1, 64], strides = [1, 1]} : vector<4x64xf32> to vector<1x64xf32>
    %100 = arith.mulf %98, %98 : vector<1x64xf32>
    %101 = arith.subf %99, %100 : vector<1x64xf32>
    %cst_29 = arith.constant 0.000000e+00 : f32
    %102 = vector.broadcast %cst_29 : f32 to vector<1x64xf32>
    %103 = arith.maximumf %101, %102 : vector<1x64xf32>
    %cst_30 = arith.constant 9.99999974E-6 : f32
    %104 = vector.broadcast %cst_30 : f32 to vector<1x64xf32>
    %105 = arith.addf %103, %104 : vector<1x64xf32>
    %106 = math.rsqrt %105 : vector<1x64xf32>
    %107 = arith.mulf %106, %41 : vector<1x64xf32>
    %108 = arith.mulf %98, %107 : vector<1x64xf32>
    %109 = arith.subf %42, %108 : vector<1x64xf32>
    %c16_i32_31 = arith.constant 16 : i32
    %110 = vector.broadcast %c16_i32_31 : i32 to vector<32x1xi32>
    %111 = arith.cmpi slt, %1, %110 : vector<32x1xi32>
    %112 = vector.shape_cast %111 : vector<32x1xi1> to vector<32x1xi1>
    %113 = vector.broadcast %112 : vector<32x1xi1> to vector<32x64xi1>
    %114 = vector.shape_cast %95 : vector<1x64xf32> to vector<1x64xf32>
    %115 = vector.broadcast %114 : vector<1x64xf32> to vector<32x64xf32>
    %116 = vector.shape_cast %107 : vector<1x64xf32> to vector<1x64xf32>
    %117 = vector.broadcast %116 : vector<1x64xf32> to vector<32x64xf32>
    %118 = arith.select %113, %115, %117 : vector<32x64xi1>, vector<32x64xf32>
    %119 = vector.shape_cast %111 : vector<32x1xi1> to vector<32x1xi1>
    %120 = vector.broadcast %119 : vector<32x1xi1> to vector<32x64xi1>
    %121 = vector.shape_cast %97 : vector<1x64xf32> to vector<1x64xf32>
    %122 = vector.broadcast %121 : vector<1x64xf32> to vector<32x64xf32>
    %123 = vector.shape_cast %109 : vector<1x64xf32> to vector<1x64xf32>
    %124 = vector.broadcast %123 : vector<1x64xf32> to vector<32x64xf32>
    %125 = arith.select %120, %122, %124 : vector<32x64xi1>, vector<32x64xf32>
    %126 = arith.mulf %39, %118 : vector<32x64xf32>
    %127 = arith.addf %126, %125 : vector<32x64xf32>
    %cst_32 = arith.constant 0.000000e+00 : f32
    %128 = vector.broadcast %cst_32 : f32 to vector<32x64xf32>
    %129 = arith.maximumf %127, %128 : vector<32x64xf32>
    %c1_i32_33 = arith.constant 1 : i32
    %130 = tpu.dynamic_rotate %129 by %c1_i32_33 dim 0 : vector<32x64xf32>, i32 -> vector<32x64xf32>
    %cst_34 = arith.constant 0.000000e+00 : f32
    %131 = vector.shape_cast %19 : vector<32x1xi1> to vector<32x1xi1>
    %132 = vector.broadcast %131 : vector<32x1xi1> to vector<32x64xi1>
    %133 = vector.broadcast %cst_34 : f32 to vector<32x64xf32>
    %134 = arith.select %132, %133, %130 : vector<32x64xi1>, vector<32x64xf32>
    %c31_i32_35 = arith.constant 31 : i32
    %135 = tpu.dynamic_rotate %129 by %c31_i32_35 dim 0 : vector<32x64xf32>, i32 -> vector<32x64xf32>
    %cst_36 = arith.constant 0.000000e+00 : f32
    %136 = vector.shape_cast %21 : vector<32x1xi1> to vector<32x1xi1>
    %137 = vector.broadcast %136 : vector<32x1xi1> to vector<32x64xi1>
    %138 = vector.broadcast %cst_36 : f32 to vector<32x64xf32>
    %139 = arith.select %137, %138, %135 : vector<32x64xi1>, vector<32x64xf32>
    %140 = tpu.concatenate %134, %129, %139 in 1 : vector<32x64xf32>, vector<32x64xf32>, vector<32x64xf32> -> vector<32x192xf32>
    %c0_37 = arith.constant 0 : index
    %c0_38 = arith.constant 0 : index
    %141 = vector.load %arg7[%c0_37, %c0_38] : memref<192x8xf32, #tpu.memory_space<vmem>>, vector<192x8xf32>
    %cst_39 = arith.constant dense<0.000000e+00> : vector<32x8xf32>
    %142 = tpu.matmul %140, %141, %cst_39 {dimension_numbers = #tpu.dot_dimension_numbers<[1], [0], [0], [1], [0, 0, 1, 1], [], []>, precision = #tpu.contract_precision<fp32>} : vector<32x192xf32>, vector<192x8xf32>, vector<32x8xf32> -> vector<32x8xf32>
    %c0_40 = arith.constant 0 : index
    %c0_41 = arith.constant 0 : index
    %143 = vector.load %arg8[%c0_40, %c0_41] : memref<1x8xf32, #tpu.memory_space<vmem>>, vector<1x8xf32>
    %144 = vector.broadcast %143 : vector<1x8xf32> to vector<32x8xf32>
    %145 = arith.addf %142, %144 : vector<32x8xf32>
    %146 = arith.addf %145, %0 : vector<32x8xf32>
    %cst_42 = arith.constant 0.000000e+00 : f32
    %147 = vector.broadcast %cst_42 : f32 to vector<32x8xf32>
    %148 = arith.maximumf %146, %147 : vector<32x8xf32>
    %c31_i32_43 = arith.constant 31 : i32
    %149 = tpu.dynamic_rotate %148 by %c31_i32_43 dim 0 : vector<32x8xf32>, i32 -> vector<32x8xf32>
    %150 = arith.maximumf %148, %149 : vector<32x8xf32>
    %c30_i32 = arith.constant 30 : i32
    %151 = tpu.dynamic_rotate %150 by %c30_i32 dim 0 : vector<32x8xf32>, i32 -> vector<32x8xf32>
    %c28_i32 = arith.constant 28 : i32
    %152 = tpu.dynamic_rotate %150 by %c28_i32 dim 0 : vector<32x8xf32>, i32 -> vector<32x8xf32>
    %153 = tpu.concatenate %150, %151, %152 in 1 : vector<32x8xf32>, vector<32x8xf32>, vector<32x8xf32> -> vector<32x24xf32>
    %c0_44 = arith.constant 0 : index
    %c0_45 = arith.constant 0 : index
    %154 = vector.load %arg9[%c0_44, %c0_45] : memref<24x128xf32, #tpu.memory_space<vmem>>, vector<24x128xf32>
    %cst_46 = arith.constant dense<0.000000e+00> : vector<32x128xf32>
    %155 = tpu.matmul %153, %154, %cst_46 {dimension_numbers = #tpu.dot_dimension_numbers<[1], [0], [0], [1], [0, 0, 1, 1], [], []>, precision = #tpu.contract_precision<fp32>} : vector<32x24xf32>, vector<24x128xf32>, vector<32x128xf32> -> vector<32x128xf32>
    %c0_47 = arith.constant 0 : index
    %c0_48 = arith.constant 0 : index
    %156 = vector.load %arg10[%c0_47, %c0_48] : memref<1x128xf32, #tpu.memory_space<vmem>>, vector<1x128xf32>
    %157 = vector.broadcast %156 : vector<1x128xf32> to vector<32x128xf32>
    %158 = arith.addf %155, %157 : vector<32x128xf32>
    %c2_i32_49 = arith.constant 2 : i32
    %c0_i32_50 = arith.constant 0 : i32
    %159 = arith.cmpi eq, %c2_i32_49, %c0_i32_50 : i32
    %c1_i32_51 = arith.constant 1 : i32
    %160 = arith.select %159, %c1_i32_51, %c2_i32_49 : i32
    %161 = vector.broadcast %160 : i32 to vector<32x1xi32>
    %162 = arith.remsi %17, %161 : vector<32x1xi32>
    %c0_i32_52 = arith.constant 0 : i32
    %163 = vector.broadcast %c0_i32_52 : i32 to vector<32x1xi32>
    %164 = arith.cmpi ne, %162, %163 : vector<32x1xi32>
    %c0_i32_53 = arith.constant 0 : i32
    %165 = vector.broadcast %c0_i32_53 : i32 to vector<32x1xi32>
    %166 = arith.cmpi slt, %162, %165 : vector<32x1xi32>
    %c0_i32_54 = arith.constant 0 : i32
    %167 = arith.cmpi slt, %160, %c0_i32_54 : i32
    %168 = vector.broadcast %167 : i1 to vector<32x1xi1>
    %169 = vector.broadcast %168 : vector<32x1xi1> to vector<32x1xi1>
    %170 = arith.xori %166, %169 : vector<32x1xi1>
    %171 = arith.andi %170, %164 : vector<32x1xi1>
    %172 = vector.broadcast %160 : i32 to vector<32x1xi32>
    %173 = arith.addi %162, %172 : vector<32x1xi32>
    %174 = arith.select %171, %173, %162 : vector<32x1xi1>, vector<32x1xi32>
    %c0_i32_55 = arith.constant 0 : i32
    %175 = vector.broadcast %c0_i32_55 : i32 to vector<32x1xi32>
    %176 = arith.cmpi eq, %174, %175 : vector<32x1xi32>
    %c12_i32 = arith.constant 12 : i32
    %177 = vector.broadcast %c12_i32 : i32 to vector<32x1xi32>
    %178 = arith.cmpi slt, %17, %177 : vector<32x1xi32>
    %179 = arith.andi %176, %178 : vector<32x1xi1>
    %180 = arith.extui %179 : vector<32x1xi1> to vector<32x1xi32>
    %181 = arith.sitofp %180 : vector<32x1xi32> to vector<32x1xf32>
    %c0_56 = arith.constant 0 : index
    %c0_57 = arith.constant 0 : index
    %182 = vector.load %arg13[%c0_56, %c0_57] : memref<128x128xf32, #tpu.memory_space<vmem>>, vector<128x128xf32>
    %c0_58 = arith.constant 0 : index
    %c0_59 = arith.constant 0 : index
    %183 = vector.load %arg11[%c0_58, %c0_59] : memref<1x128xf32, #tpu.memory_space<vmem>>, vector<1x128xf32>
    %c0_60 = arith.constant 0 : index
    %c0_61 = arith.constant 0 : index
    %184 = vector.load %arg12[%c0_60, %c0_61] : memref<1x128xf32, #tpu.memory_space<vmem>>, vector<1x128xf32>
    %185 = vector.broadcast %181 : vector<32x1xf32> to vector<32x128xf32>
    %186 = arith.mulf %158, %185 : vector<32x128xf32>
    %187 = vector.extract_strided_slice %186 {offsets = [0, 0], sizes = [16, 128], strides = [1, 1]} : vector<32x128xf32> to vector<16x128xf32>
    %cst_62 = arith.constant dense<0.000000e+00> : vector<128xf32>
    %188 = vector.multi_reduction <add>, %187, %cst_62 [0] : vector<16x128xf32> to vector<128xf32>
    %189 = vector.shape_cast %188 : vector<128xf32> to vector<1x128xf32>
    %190 = vector.extract_strided_slice %186 {offsets = [0, 0], sizes = [16, 128], strides = [1, 1]} : vector<32x128xf32> to vector<16x128xf32>
    %191 = vector.extract_strided_slice %158 {offsets = [0, 0], sizes = [16, 128], strides = [1, 1]} : vector<32x128xf32> to vector<16x128xf32>
    %192 = arith.mulf %190, %191 : vector<16x128xf32>
    %cst_63 = arith.constant dense<0.000000e+00> : vector<128xf32>
    %193 = vector.multi_reduction <add>, %192, %cst_63 [0] : vector<16x128xf32> to vector<128xf32>
    %194 = vector.shape_cast %193 : vector<128xf32> to vector<1x128xf32>
    %195 = vector.extract_strided_slice %186 {offsets = [16, 0], sizes = [16, 128], strides = [1, 1]} : vector<32x128xf32> to vector<16x128xf32>
    %cst_64 = arith.constant dense<0.000000e+00> : vector<128xf32>
    %196 = vector.multi_reduction <add>, %195, %cst_64 [0] : vector<16x128xf32> to vector<128xf32>
    %197 = vector.shape_cast %196 : vector<128xf32> to vector<1x128xf32>
    %198 = vector.extract_strided_slice %186 {offsets = [16, 0], sizes = [16, 128], strides = [1, 1]} : vector<32x128xf32> to vector<16x128xf32>
    %199 = vector.extract_strided_slice %158 {offsets = [16, 0], sizes = [16, 128], strides = [1, 1]} : vector<32x128xf32> to vector<16x128xf32>
    %200 = arith.mulf %198, %199 : vector<16x128xf32>
    %cst_65 = arith.constant dense<0.000000e+00> : vector<128xf32>
    %201 = vector.multi_reduction <add>, %200, %cst_65 [0] : vector<16x128xf32> to vector<128xf32>
    %202 = vector.shape_cast %201 : vector<128xf32> to vector<1x128xf32>
    %203 = tpu.iota {dimensions = array<i32: 0>} : vector<4x1xi32>
    %c2_i32_66 = arith.constant 2 : i32
    %204 = vector.broadcast %c2_i32_66 : i32 to vector<4x1xi32>
    %205 = arith.cmpi eq, %203, %204 : vector<4x1xi32>
    %206 = vector.shape_cast %205 : vector<4x1xi1> to vector<4x1xi1>
    %207 = vector.broadcast %206 : vector<4x1xi1> to vector<4x128xi1>
    %208 = vector.shape_cast %197 : vector<1x128xf32> to vector<1x128xf32>
    %209 = vector.broadcast %208 : vector<1x128xf32> to vector<4x128xf32>
    %210 = vector.shape_cast %202 : vector<1x128xf32> to vector<1x128xf32>
    %211 = vector.broadcast %210 : vector<1x128xf32> to vector<4x128xf32>
    %212 = arith.select %207, %209, %211 : vector<4x128xi1>, vector<4x128xf32>
    %c1_i32_67 = arith.constant 1 : i32
    %213 = vector.broadcast %c1_i32_67 : i32 to vector<4x1xi32>
    %214 = arith.cmpi eq, %203, %213 : vector<4x1xi32>
    %215 = vector.shape_cast %214 : vector<4x1xi1> to vector<4x1xi1>
    %216 = vector.broadcast %215 : vector<4x1xi1> to vector<4x128xi1>
    %217 = vector.shape_cast %194 : vector<1x128xf32> to vector<1x128xf32>
    %218 = vector.broadcast %217 : vector<1x128xf32> to vector<4x128xf32>
    %219 = arith.select %216, %218, %212 : vector<4x128xi1>, vector<4x128xf32>
    %c0_i32_68 = arith.constant 0 : i32
    %220 = vector.broadcast %c0_i32_68 : i32 to vector<4x1xi32>
    %221 = arith.cmpi eq, %203, %220 : vector<4x1xi32>
    %222 = vector.shape_cast %221 : vector<4x1xi1> to vector<4x1xi1>
    %223 = vector.broadcast %222 : vector<4x1xi1> to vector<4x128xi1>
    %224 = vector.shape_cast %189 : vector<1x128xf32> to vector<1x128xf32>
    %225 = vector.broadcast %224 : vector<1x128xf32> to vector<4x128xf32>
    %226 = arith.select %223, %225, %219 : vector<4x128xi1>, vector<4x128xf32>
    %cst_69 = arith.constant dense<0.000000e+00> : vector<4x128xf32>
    %227 = tpu.matmul %226, %182, %cst_69 {dimension_numbers = #tpu.dot_dimension_numbers<[1], [0], [0], [1], [0, 0, 1, 1], [], []>, precision = #tpu.contract_precision<fp32>} : vector<4x128xf32>, vector<128x128xf32>, vector<4x128xf32> -> vector<4x128xf32>
    %cst_70 = arith.constant 0.010416667 : f32
    %228 = vector.broadcast %cst_70 : f32 to vector<4x128xf32>
    %229 = arith.mulf %227, %228 : vector<4x128xf32>
    %230 = vector.extract_strided_slice %229 {offsets = [0, 0], sizes = [1, 128], strides = [1, 1]} : vector<4x128xf32> to vector<1x128xf32>
    %231 = vector.extract_strided_slice %229 {offsets = [1, 0], sizes = [1, 128], strides = [1, 1]} : vector<4x128xf32> to vector<1x128xf32>
    %232 = arith.mulf %230, %230 : vector<1x128xf32>
    %233 = arith.subf %231, %232 : vector<1x128xf32>
    %cst_71 = arith.constant 0.000000e+00 : f32
    %234 = vector.broadcast %cst_71 : f32 to vector<1x128xf32>
    %235 = arith.maximumf %233, %234 : vector<1x128xf32>
    %cst_72 = arith.constant 9.99999974E-6 : f32
    %236 = vector.broadcast %cst_72 : f32 to vector<1x128xf32>
    %237 = arith.addf %235, %236 : vector<1x128xf32>
    %238 = math.rsqrt %237 : vector<1x128xf32>
    %239 = arith.mulf %238, %183 : vector<1x128xf32>
    %240 = arith.mulf %230, %239 : vector<1x128xf32>
    %241 = arith.subf %184, %240 : vector<1x128xf32>
    %242 = vector.extract_strided_slice %229 {offsets = [2, 0], sizes = [1, 128], strides = [1, 1]} : vector<4x128xf32> to vector<1x128xf32>
    %243 = vector.extract_strided_slice %229 {offsets = [3, 0], sizes = [1, 128], strides = [1, 1]} : vector<4x128xf32> to vector<1x128xf32>
    %244 = arith.mulf %242, %242 : vector<1x128xf32>
    %245 = arith.subf %243, %244 : vector<1x128xf32>
    %cst_73 = arith.constant 0.000000e+00 : f32
    %246 = vector.broadcast %cst_73 : f32 to vector<1x128xf32>
    %247 = arith.maximumf %245, %246 : vector<1x128xf32>
    %cst_74 = arith.constant 9.99999974E-6 : f32
    %248 = vector.broadcast %cst_74 : f32 to vector<1x128xf32>
    %249 = arith.addf %247, %248 : vector<1x128xf32>
    %250 = math.rsqrt %249 : vector<1x128xf32>
    %251 = arith.mulf %250, %183 : vector<1x128xf32>
    %252 = arith.mulf %242, %251 : vector<1x128xf32>
    %253 = arith.subf %184, %252 : vector<1x128xf32>
    %c16_i32_75 = arith.constant 16 : i32
    %254 = vector.broadcast %c16_i32_75 : i32 to vector<32x1xi32>
    %255 = arith.cmpi slt, %1, %254 : vector<32x1xi32>
    %256 = vector.shape_cast %255 : vector<32x1xi1> to vector<32x1xi1>
    %257 = vector.broadcast %256 : vector<32x1xi1> to vector<32x128xi1>
    %258 = vector.shape_cast %239 : vector<1x128xf32> to vector<1x128xf32>
    %259 = vector.broadcast %258 : vector<1x128xf32> to vector<32x128xf32>
    %260 = vector.shape_cast %251 : vector<1x128xf32> to vector<1x128xf32>
    %261 = vector.broadcast %260 : vector<1x128xf32> to vector<32x128xf32>
    %262 = arith.select %257, %259, %261 : vector<32x128xi1>, vector<32x128xf32>
    %263 = vector.shape_cast %255 : vector<32x1xi1> to vector<32x1xi1>
    %264 = vector.broadcast %263 : vector<32x1xi1> to vector<32x128xi1>
    %265 = vector.shape_cast %241 : vector<1x128xf32> to vector<1x128xf32>
    %266 = vector.broadcast %265 : vector<1x128xf32> to vector<32x128xf32>
    %267 = vector.shape_cast %253 : vector<1x128xf32> to vector<1x128xf32>
    %268 = vector.broadcast %267 : vector<1x128xf32> to vector<32x128xf32>
    %269 = arith.select %264, %266, %268 : vector<32x128xi1>, vector<32x128xf32>
    %270 = arith.mulf %158, %262 : vector<32x128xf32>
    %271 = arith.addf %270, %269 : vector<32x128xf32>
    %cst_76 = arith.constant 0.000000e+00 : f32
    %272 = vector.broadcast %cst_76 : f32 to vector<32x128xf32>
    %273 = arith.maximumf %271, %272 : vector<32x128xf32>
    %274 = vector.broadcast %181 : vector<32x1xf32> to vector<32x128xf32>
    %275 = arith.mulf %273, %274 : vector<32x128xf32>
    %276 = vector.extract_strided_slice %275 {offsets = [0, 0], sizes = [16, 128], strides = [1, 1]} : vector<32x128xf32> to vector<16x128xf32>
    %cst_77 = arith.constant dense<0.000000e+00> : vector<128xf32>
    %277 = vector.multi_reduction <add>, %276, %cst_77 [0] : vector<16x128xf32> to vector<128xf32>
    %278 = vector.shape_cast %277 : vector<128xf32> to vector<1x128xf32>
    %279 = vector.extract_strided_slice %275 {offsets = [16, 0], sizes = [16, 128], strides = [1, 1]} : vector<32x128xf32> to vector<16x128xf32>
    %cst_78 = arith.constant dense<0.000000e+00> : vector<128xf32>
    %280 = vector.multi_reduction <add>, %279, %cst_78 [0] : vector<16x128xf32> to vector<128xf32>
    %281 = vector.shape_cast %280 : vector<128xf32> to vector<1x128xf32>
    %282 = tpu.iota {dimensions = array<i32: 0>} : vector<2x1xi32>
    %c0_i32_79 = arith.constant 0 : i32
    %283 = vector.broadcast %c0_i32_79 : i32 to vector<2x1xi32>
    %284 = arith.cmpi eq, %282, %283 : vector<2x1xi32>
    %285 = vector.shape_cast %284 : vector<2x1xi1> to vector<2x1xi1>
    %286 = vector.broadcast %285 : vector<2x1xi1> to vector<2x128xi1>
    %287 = vector.shape_cast %278 : vector<1x128xf32> to vector<1x128xf32>
    %288 = vector.broadcast %287 : vector<1x128xf32> to vector<2x128xf32>
    %289 = vector.shape_cast %281 : vector<1x128xf32> to vector<1x128xf32>
    %290 = vector.broadcast %289 : vector<1x128xf32> to vector<2x128xf32>
    %291 = arith.select %286, %288, %290 : vector<2x128xi1>, vector<2x128xf32>
    %cst_80 = arith.constant 0.166666672 : f32
    %292 = vector.broadcast %cst_80 : f32 to vector<2x128xf32>
    %293 = arith.mulf %291, %292 : vector<2x128xf32>
    %c0_81 = arith.constant 0 : index
    %c0_82 = arith.constant 0 : index
    %294 = vector.load %arg14[%c0_81, %c0_82] : memref<128x128xf32, #tpu.memory_space<vmem>>, vector<128x128xf32>
    %cst_83 = arith.constant dense<0.000000e+00> : vector<2x128xf32>
    %295 = tpu.matmul %293, %294, %cst_83 {dimension_numbers = #tpu.dot_dimension_numbers<[1], [0], [0], [1], [0, 0, 1, 1], [], []>, precision = #tpu.contract_precision<fp32>} : vector<2x128xf32>, vector<128x128xf32>, vector<2x128xf32> -> vector<2x128xf32>
    %c0_84 = arith.constant 0 : index
    %c0_85 = arith.constant 0 : index
    %296 = vector.load %arg15[%c0_84, %c0_85] : memref<1x128xf32, #tpu.memory_space<vmem>>, vector<1x128xf32>
    %297 = vector.broadcast %296 : vector<1x128xf32> to vector<2x128xf32>
    %298 = arith.addf %295, %297 : vector<2x128xf32>
    %cst_86 = arith.constant 0.000000e+00 : f32
    %299 = vector.broadcast %cst_86 : f32 to vector<2x128xf32>
    %300 = arith.maximumf %298, %299 : vector<2x128xf32>
    %c0_87 = arith.constant 0 : index
    %c0_88 = arith.constant 0 : index
    %301 = vector.load %arg16[%c0_87, %c0_88] : memref<128x32xf32, #tpu.memory_space<vmem>>, vector<128x32xf32>
    %cst_89 = arith.constant dense<0.000000e+00> : vector<2x32xf32>
    %302 = tpu.matmul %300, %301, %cst_89 {dimension_numbers = #tpu.dot_dimension_numbers<[1], [0], [0], [1], [0, 0, 1, 1], [], []>, precision = #tpu.contract_precision<fp32>} : vector<2x128xf32>, vector<128x32xf32>, vector<2x32xf32> -> vector<2x32xf32>
    %c0_90 = arith.constant 0 : index
    %c0_91 = arith.constant 0 : index
    %303 = vector.load %arg17[%c0_90, %c0_91] : memref<1x32xf32, #tpu.memory_space<vmem>>, vector<1x32xf32>
    %304 = vector.broadcast %303 : vector<1x32xf32> to vector<2x32xf32>
    %305 = arith.addf %302, %304 : vector<2x32xf32>
    %c0_92 = arith.constant 0 : index
    %c0_93 = arith.constant 0 : index
    %306 = vector.load %arg18[%c0_92, %c0_93] : memref<2x32xf32, #tpu.memory_space<vmem>>, vector<2x32xf32>
    tpu.vector_store %arg18[%c0_92, %c0_93], %305 {strides = array<i32>} : memref<2x32xf32, #tpu.memory_space<vmem>>, vector<2x32xf32>,
    return
  }
  func.func @transform_0(%arg0: i32) -> (i32, i32) {
    %c0_i32 = arith.constant 0 : i32
    %c0_i32_0 = arith.constant 0 : i32
    %c0_i32_1 = arith.constant 0 : i32
    return %c0_i32, %c0_i32_0 : i32, i32
  }
  func.func @transform_1(%arg0: i32) -> (i32, i32) {
    %c0_i32 = arith.constant 0 : i32
    %c0_i32_0 = arith.constant 0 : i32
    %c0_i32_1 = arith.constant 0 : i32
    return %c0_i32, %c0_i32_0 : i32, i32
  }
  func.func @transform_2(%arg0: i32) -> (i32, i32) {
    %c0_i32 = arith.constant 0 : i32
    %c0_i32_0 = arith.constant 0 : i32
    %c0_i32_1 = arith.constant 0 : i32
    return %c0_i32, %c0_i32_0 : i32, i32
  }
  func.func @transform_3(%arg0: i32) -> (i32, i32) {
    %c0_i32 = arith.constant 0 : i32
    %c0_i32_0 = arith.constant 0 : i32
    %c0_i32_1 = arith.constant 0 : i32
    return %c0_i32, %c0_i32_0 : i32, i32
  }
  func.func @transform_4(%arg0: i32) -> (i32, i32) {
    %c0_i32 = arith.constant 0 : i32
    %c0_i32_0 = arith.constant 0 : i32
    %c0_i32_1 = arith.constant 0 : i32
    return %c0_i32, %c0_i32_0 : i32, i32
  }
  func.func @transform_5(%arg0: i32) -> (i32, i32) {
    %c0_i32 = arith.constant 0 : i32
    %c0_i32_0 = arith.constant 0 : i32
    %c0_i32_1 = arith.constant 0 : i32
    return %c0_i32, %c0_i32_0 : i32, i32
  }
  func.func @transform_6(%arg0: i32) -> (i32, i32) {
    %c0_i32 = arith.constant 0 : i32
    %c0_i32_0 = arith.constant 0 : i32
    %c0_i32_1 = arith.constant 0 : i32
    return %c0_i32, %c0_i32_0 : i32, i32
  }
  func.func @transform_7(%arg0: i32) -> (i32, i32) {
    %c0_i32 = arith.constant 0 : i32
    %c0_i32_0 = arith.constant 0 : i32
    %c0_i32_1 = arith.constant 0 : i32
    return %c0_i32, %c0_i32_0 : i32, i32
  }
  func.func @transform_8(%arg0: i32) -> (i32, i32) {
    %c0_i32 = arith.constant 0 : i32
    %c0_i32_0 = arith.constant 0 : i32
    %c0_i32_1 = arith.constant 0 : i32
    return %c0_i32, %c0_i32_0 : i32, i32
  }
  func.func @transform_9(%arg0: i32) -> (i32, i32) {
    %c0_i32 = arith.constant 0 : i32
    %c0_i32_0 = arith.constant 0 : i32
    %c0_i32_1 = arith.constant 0 : i32
    return %c0_i32, %c0_i32_0 : i32, i32
  }
  func.func @transform_10(%arg0: i32) -> (i32, i32) {
    %c0_i32 = arith.constant 0 : i32
    %c0_i32_0 = arith.constant 0 : i32
    %c0_i32_1 = arith.constant 0 : i32
    return %c0_i32, %c0_i32_0 : i32, i32
  }
  func.func @transform_11(%arg0: i32) -> (i32, i32) {
    %c0_i32 = arith.constant 0 : i32
    %c0_i32_0 = arith.constant 0 : i32
    %c0_i32_1 = arith.constant 0 : i32
    return %c0_i32, %c0_i32_0 : i32, i32
  }
  func.func @transform_12(%arg0: i32) -> (i32, i32) {
    %c0_i32 = arith.constant 0 : i32
    %c0_i32_0 = arith.constant 0 : i32
    %c0_i32_1 = arith.constant 0 : i32
    return %c0_i32, %c0_i32_0 : i32, i32
  }
  func.func @transform_13(%arg0: i32) -> (i32, i32) {
    %c0_i32 = arith.constant 0 : i32
    %c0_i32_0 = arith.constant 0 : i32
    %c0_i32_1 = arith.constant 0 : i32
    return %c0_i32, %c0_i32_0 : i32, i32
  }
  func.func @transform_14(%arg0: i32) -> (i32, i32) {
    %c0_i32 = arith.constant 0 : i32
    %c0_i32_0 = arith.constant 0 : i32
    %c0_i32_1 = arith.constant 0 : i32
    return %c0_i32, %c0_i32_0 : i32, i32
  }
  func.func @transform_15(%arg0: i32) -> (i32, i32) {
    %c0_i32 = arith.constant 0 : i32
    %c0_i32_0 = arith.constant 0 : i32
    %c0_i32_1 = arith.constant 0 : i32
    return %c0_i32, %c0_i32_0 : i32, i32
  }
  func.func @transform_16(%arg0: i32) -> (i32, i32) {
    %c0_i32 = arith.constant 0 : i32
    %c0_i32_0 = arith.constant 0 : i32
    %c0_i32_1 = arith.constant 0 : i32
    return %c0_i32, %c0_i32_0 : i32, i32
  }
  func.func @transform_17(%arg0: i32) -> (i32, i32) {
    %c0_i32 = arith.constant 0 : i32
    %c0_i32_0 = arith.constant 0 : i32
    %c0_i32_1 = arith.constant 0 : i32
    return %c0_i32, %c0_i32_0 : i32, i32
  }
}

</mosaic_0001>

<bundles_post_ra>
// kernel: tpu_custom_call.1
= control target key start
LH: loop header
LB: loop body
LE: loop exit
PB: predicated region body
PF: predicated region fallthrough
CT: control target
= control target key end

     0   :  { %s10009_s0 = inlined_call_operand.vmem [shape: f32[32,8], index: 0, kind: input, shape index: {}]   ;;  %s10010_s1 = inlined_call_operand.vmem [shape: f32[24,64], index: 1, kind: input, shape index: {}]   ;;  %s10011_s2 = inlined_call_operand.vmem [shape: f32[1,64], index: 2, kind: input, shape index: {}]   ;;  %s10012_s3 = inlined_call_operand.vmem [shape: f32[1,64], index: 3, kind: input, shape index: {}]   ;;  %s10013_s4 = inlined_call_operand.vmem [shape: f32[1,64], index: 4, kind: input, shape index: {}]   ;;  %s10014_s5 = inlined_call_operand.vmem [shape: f32[64,64], index: 5, kind: input, shape index: {}]   ;;  %s10015_s6 = inlined_call_operand.vmem [shape: f32[192,8], index: 6, kind: input, shape index: {}]   ;;  %s10016_s7 = inlined_call_operand.vmem [shape: f32[1,8], index: 7, kind: input, shape index: {}]   ;;  %s10017_s8 = inlined_call_operand.vmem [shape: f32[24,128], index: 8, kind: input, shape index: {}]   ;;  %s10018_s9 = inlined_call_operand.vmem [shape: f32[1,128], index: 9, kind: input, shape index: {}]   ;;  %s10019_s10 = inlined_call_operand.vmem [shape: f32[1,128], index: 10, kind: input, shape index: {}]   ;;  %s10020_s11 = inlined_call_operand.vmem [shape: f32[1,128], index: 11, kind: input, shape index: {}]   ;;  %s10021_s12 = inlined_call_operand.vmem [shape: f32[128,128], index: 12, kind: input, shape index: {}]   ;;  %s10022_s13 = inlined_call_operand.vmem [shape: f32[128,128], index: 13, kind: input, shape index: {}]   ;;  %s10023_s14 = inlined_call_operand.vmem [shape: f32[1,128], index: 14, kind: input, shape index: {}]   ;;  %s10024_s15 = inlined_call_operand.vmem [shape: f32[128,32], index: 15, kind: input, shape index: {}]   ;;  %s10025_s16 = inlined_call_operand.vmem [shape: f32[1,32], index: 16, kind: input, shape index: {}]   ;;  %s10026_s17 = inlined_call_operand.hbm [shape: f32[2,32], index: 17, kind: output, shape index: {}]  }
   0x1   :  { %10127 = sst [smem:[#allocation24_spill]] %s10009_s0 }
   0x2   :  { %10128 = sst [smem:[#allocation25_spill]] %s10010_s1 }
   0x3   :  { %s10129_s26 = sld [smem:[#allocation24_spill]]  ;;  %v61_v3 = vlaneseq  ;;  %s7693_s19 = smov 8  }
   0x5   :  { %v7803_v8 = vshrl.u32 %v61_v3, 7 }
   0x7   :  { %10130 = vst [vmem:[#allocation5_spill] sm:$0xff] %v7803_v8 }
   0x9   :  { %v60_v0 = vld [vmem:[%s10129_s26 + $0x18] sm:$0xff]  ;;  %v57_v1 = vld [vmem:[%s10129_s26] sm:$0xff]  ;;  %v58_v2 = vld [vmem:[%s10129_s26 + $0x8] sm:$0xff] }
   0xa   :  { %v125_v4 = vmax.f32 %v60_v0, 0.0  ;;  %v122_v5 = vmax.f32 %v57_v1, 0.0  ;;  %v123_v6 = vmax.f32 %v58_v2, 0.0  ;;  %v59_v7 = vld [vmem:[%s10129_s26 + $0x10] sm:$0xff] }
   0xb   :  { %v124_v9 = vmax.f32 %v59_v7, 0.0 }
   0xc   :  { %178 = vrot.lane.b32.xlu1 %v125_v4, %s7693_s19  ;;  %172 = vrot.lane.b32.xlu0 %v122_v5, %s7693_s19  ;;  %v147_v10 = vrot.slane %v122_v5, 1  ;;  %v148_v11 = vrot.slane %v123_v6, 1 }
   0xd   :  { %22 = vsyncpa [#allocation3], 0  ;;  %vm151_vm0 = vcmp.lt.s32.totalorder %v7803_v8, 7  ;;  %v63_v12 = vadd.s32 8, %v7803_v8  ;;  %v149_v13 = vrot.slane %v124_v9, 1  ;;  %v65_v14 = vadd.s32 24, %v7803_v8 }
   0xe   :  { %s10131_s21 = sld [smem:[#allocation25_spill]]  ;;  %v154_v16 = vsel %vm151_vm0, %v147_v10, %v148_v11  ;;  %v150_v17 = vrot.slane %v125_v4, 1  ;;  %v128_v18 = vrot.slane %v124_v9, 7  ;;  %v126_v20 = vrot.slane %v122_v5, 7  ;;  %s7694_s24 = smov 16  }
   0xf   :  { %v7818_v21 = vand.u32 15, %v63_v12  ;;  %v153_v22 = vsel %vm151_vm0, %v148_v11, %v149_v13  ;;  %v7822_v23 = vand.u32 15, %v65_v14  ;;  %vm130_vm1 = vcmp.lt.s32.totalorder %v7803_v8, 1  ;;  %s7700_s28 = smov [#allocation2]  }
  0x10   :  { %174 = vrot.lane.b32.xlu0 %v123_v6, %s7693_s19  ;;  %188 = vrot.lane.b32.xlu1 %v154_v16, %s7694_s24  ;;  %v129_v24 = vrot.slane %v125_v4, 7  ;;  %v127_v25 = vrot.slane %v123_v6, 7  ;;  %v155_v29 = vsel %vm151_vm0, %v150_v17, %v147_v10  ;;  %v152_v38 = vsel %vm151_vm0, %v149_v13, %v150_v17 }
  0x11   :  { %10132 = vst [vmem:[#allocation6_spill] sm:$0xff] %v7818_v21  ;;  %10133 = vst [vmem:[#allocation7_spill] sm:$0xff] %v7822_v23  ;;  %vm119_vm2 = vcmp.eq.s32.totalorder %v7818_v21, 15  ;;  %vm121_vm3 = vcmp.eq.s32.totalorder %v7822_v23, 15  ;;  %v10030_v50 = vand.u32 15, %v7803_v8  ;;  %v7872_v52 = vadd.s32 16, %v7803_v8 }
  0x12   :  { %v165_v28 = vsel %vm119_vm2, 0.0, %v153_v22  ;;  %v131_v30 = vsel %vm130_vm1, %v128_v18, %v129_v24  ;;  %v134_v32 = vsel %vm130_vm1, %v129_v24, %v126_v20  ;;  %v133_v33 = vsel %vm130_vm1, %v126_v20, %v127_v25 }
  0x13   :  { %v132_v34 = vsel %vm130_vm1, %v127_v25, %v128_v18  ;;  %v167_v39 = vsel %vm121_vm3, 0.0, %v155_v29  ;;  %vm7867_vm4 = vcmp.eq.s32.totalorder %v10030_v50, 0  ;;  %10136 = vst [vmem:[#allocation8_spill] sm:$0xff] %v7872_v52  ;;  %vm200_vm5 = vcmask 64512  }
  0x14   :  { %v210_v15 = vld [vmem:[%s10131_s21] sm:$0xff]  ;;  %v211_v19 = vld [vmem:[%s10131_s21 + $0x8] sm:$0xff]  ;;  %v212_v31 = vld [vmem:[%s10131_s21 + $0x10] sm:$0xff]  ;;  %176 = vrot.lane.b32.xlu0 %v124_v9, %s7693_s19  ;;  %v143_v55 = vsel %vm7867_vm4, 0.0, %v134_v32  ;;  %vm205_vm6 = vcmask 130048   ;;  %v10029_v56 = vand.u32 15, %v7872_v52 }
  0x15   :  { %v234_v26 = vand.u32 4294901760, %v210_v15  ;;  %v237_v27 = vand.u32 4294901760, %v211_v19  ;;  %190 = vrot.lane.b32.xlu1 %v165_v28, %s7694_s24  ;;  %v7852_v40 = vand.u32 4294901760, %v212_v31  ;;  %vm220_vm7 = vcmask 195584  }
  0x16   :  { %vm7882_vm8 = vcmp.eq.s32.totalorder %v10029_v56, 0  ;;  %vm7696_vm9 = vmmov 0   ;;  %vm844_vm10 = vcmask 523264   ;;  %vm885_vm11 = vcmp.eq.s32.totalorder %v7803_v8, 2 }
  0x17   :  { %v7846_v35 = vpack.c.bf16 %v237_v27, %v234_v26  ;;  %v343_v36 = vsub.f32 %v210_v15, %v234_v26  ;;  %v350_v37 = vsub.f32 %v211_v19, %v237_v27  ;;  %v357_v63 = vsub.f32 %v212_v31, %v7852_v40 }
  0x18   :  { %192 = vrot.lane.b32.xlu0 %v152_v38, %s7694_s24  ;;  %v145_v5 = vsel %vm7882_vm8, 0.0, %v132_v34  ;;  %vm889_vm12 = vcmp.eq.s32.totalorder %v7803_v8, 1  ;;  %vm893_vm13 = vcmp.eq.s32.totalorder %v7803_v8, 0 }
  0x19   :  { %6796 = vmatprep.subr.bf16.mxu0 %v7846_v35  ;;  %v344_v41 = vand.u32 4294901760, %v343_v36  ;;  %v351_v42 = vand.u32 4294901760, %v350_v37  ;;  %194 = vrot.lane.b32.xlu1 %v167_v39, %s7694_s24  ;;  %v7859_v45 = vpack.c.bf16 %v350_v37, %v343_v36  ;;  %v358_v9 = vand.u32 4294901760, %v357_v63 }
  0x1a   :  { %6798 = vmatpush3.bf16.msra.mxu0 %v7846_v35 }
  0x1b   :  { %v345_v43 = vsub.f32 %v343_v36, %v344_v41  ;;  %v352_v44 = vsub.f32 %v350_v37, %v351_v42  ;;  %5911 = vmatprep.subr.mxu0 %v7852_v40  ;;  %v7862_v49 = vpack.c.bf16 %v351_v42, %v344_v41  ;;  %v359_v24 = vsub.f32 %v357_v63, %v358_v9  ;;  %v834_v42 = vld [vmem:[%s10014_s5] sm:$0xff] }
  0x1d   :  { %v346_v46 = vand.u32 4294901760, %v345_v43  ;;  %v353_v47 = vand.u32 4294901760, %v352_v44  ;;  %v360_v34 = vand.u32 4294901760, %v359_v24  ;;  %v901_v43 = vand.u32 4294901760, %v834_v42 }
  0x1e   :  { %5912 = vmatpush3.msra.mxu0 %v7852_v40 }
  0x1f   :  { %v6799_v48 = vpack.c.bf16 %v353_v47, %v346_v46  ;;  %v10037_v46 = vmov 0.0|0.0   ;;  %v837_v47 = vld [vmem:[%s10014_s5 + $0x18] sm:$0xff] }
  0x20   :  { %6819 = vmatprep.subr.bf16.mxu1 %v10037_v46 }
  0x21   :  { %6800 = vmatprep.subr.bf16.mxu0 %v6799_v48 }
  0x7e   :  { %v179_v53 = vpop.permute.xlu1 %178  ;;  %v173_v54 = vpop.permute.xlu0 %172 }
  0x7f   :  { %v201_v57 = vsel %vm200_vm5, %v143_v55, %v173_v54  ;;  %v204_v12 = vsel %vm200_vm5, %v131_v30, %v179_v53  ;;  %v910_v54 = vand.u32 4294901760, %v837_v47  ;;  %v838_v55 = vld [vmem:[%s10014_s5 + $0x20] sm:$0xff] }
  0x82   :  { %v175_v58 = vpop.permute.xlu0 %174  ;;  %v189_v59 = vpop.permute.xlu1 %188 }
  0x83   :  { %v206_v60 = vsel %vm205_vm6, %v201_v57, %v189_v59  ;;  %v202_v1 = vsel %vm200_vm5, %v133_v33, %v175_v58  ;;  %v839_v57 = vld [vmem:[%s10014_s5 + $0x28] sm:$0xff]  ;;  %v840_v58 = vld [vmem:[%s10014_s5 + $0x30] sm:$0xff]  ;;  %v913_v59 = vand.u32 4294901760, %v838_v55 }
  0x84   :  { %v222_v61 = vsel %vm220_vm7, %v206_v60, 0  ;;  %v916_v60 = vand.u32 4294901760, %v839_v57 }
  0x85   :  { %v7887_v0 = vand.u32 4294901760, %v222_v61 }
  0x86   :  { %v177_v2 = vpop.permute.xlu0 %176 }
  0x87   :  { %v191_v3 = vpop.permute.xlu1 %190  ;;  %v302_v4 = vsub.f32 %v222_v61, %v7887_v0  ;;  %v203_v13 = vsel %vm200_vm5, %v145_v5, %v177_v2  ;;  %v841_v61 = vld [vmem:[%s10014_s5 + $0x38] sm:$0xff]  ;;  %v7960_v2 = vsub.f32 %v837_v47, %v910_v54  ;;  %v7964_v5 = vsub.f32 %v839_v57, %v916_v60 }
  0x88   :  { %v207_v6 = vsel %vm205_vm6, %v202_v1, %v191_v3  ;;  %v922_v3 = vand.u32 4294901760, %v841_v61 }
  0x89   :  { %v225_v7 = vsel %vm220_vm7, %v207_v6, 0  ;;  %v303_v11 = vand.u32 4294901760, %v302_v4 }
  0x8a   :  { %v7895_v10 = vand.u32 4294901760, %v225_v7  ;;  %v193_v14 = vpop.permute.xlu0 %192 }
  0x8b   :  { %v195_v15 = vpop.permute.xlu1 %194  ;;  %v208_v17 = vsel %vm205_vm6, %v203_v13, %v193_v14  ;;  %v304_v19 = vsub.f32 %v302_v4, %v303_v11 }
  0x8c   :  { %v312_v16 = vsub.f32 %v225_v7, %v7895_v10  ;;  %v209_v18 = vsel %vm205_vm6, %v204_v12, %v195_v15  ;;  %v228_v20 = vsel %vm220_vm7, %v208_v17, 0  ;;  %v7969_v7 = vpack.c.bf16 %v916_v60, %v913_v59 }
  0x8d   :  { %v231_v22 = vsel %vm220_vm7, %v209_v18, 0  ;;  %v321_v25 = vand.u32 4294901760, %v228_v20  ;;  %v305_v27 = vand.u32 4294901760, %v304_v19  ;;  %v1007_v19 = vand.u32 4294901760, %v7960_v2 }
  0x8e   :  { %v331_v26 = vand.u32 4294901760, %v231_v22  ;;  %v313_v28 = vand.u32 4294901760, %v312_v16 }
  0x8f   :  { %v322_v29 = vsub.f32 %v228_v20, %v321_v25  ;;  %5913 = vmatprep.mubr.f32.mxu0 %v305_v27  ;;  %v1008_v24 = vsub.f32 %v7960_v2, %v1007_v19 }
  0x90   :  { %v332_v30 = vsub.f32 %v231_v22, %v331_v26  ;;  %v314_v31 = vsub.f32 %v312_v16, %v313_v28 }
  0x91   :  { %v323_v33 = vand.u32 4294901760, %v322_v29 }
  0x92   :  { %v315_v32 = vand.u32 4294901760, %v314_v31  ;;  %v333_v36 = vand.u32 4294901760, %v332_v30 }
  0x93   :  { %v324_v37 = vsub.f32 %v322_v29, %v323_v33 }
  0x94   :  { %5914 = vmatmul.mubr.f32.vlgmr.msra.gmra.mrb[0].mxu0 %v315_v32  ;;  %v334_v38 = vsub.f32 %v332_v30, %v333_v36 }
  0x95   :  { %6802 = vmatpush3.bf16.msra.mxu0 %v6799_v48  ;;  %v325_v39 = vand.u32 4294901760, %v324_v37  ;;  %v7939_v48 = vsub.f32 %v834_v42, %v901_v43 }
  0x96   :  { %5923 = vmatprep.subr.mxu0 %v360_v34  ;;  %v335_v41 = vand.u32 4294901760, %v334_v38 }
  0x97   :  { %5916 = vmatprep.mubr.f32.mxu0 %v325_v39  ;;  %v986_v12 = vand.u32 4294901760, %v7939_v48 }
  0x98   :  { %5917 = vmatmul.mubr.f32.gmra.mrb[2].mxu0 %v335_v41 }
  0x99   :  { %5924 = vmatpush3.msra.mxu0 %v360_v34  ;;  %5925 = vmatprep.mubr.f32.mxu0 %v7887_v0  ;;  %v987_v14 = vsub.f32 %v7939_v48, %v986_v12 }
  0x9a   :  { %6804 = vmatprep.subr.bf16.mxu0 %v7859_v45 }
  0x9c   :  { %5926 = vmatmul.mubr.f32.vlgmr.msra.gmra.mrb[0].mxu0 %v7895_v10 }
  0x9d   :  { %6806 = vmatpush3.bf16.msra.mxu0 %v7859_v45  ;;  %5928 = vmatprep.mubr.f32.mxu0 %v321_v25 }
  0x9e   :  { %5935 = vmatprep.subr.mxu0 %v357_v63 }
  0xa0   :  { %5929 = vmatmul.mubr.f32.gmra.mrb[2].mxu0 %v331_v26 }
  0xa1   :  { %5936 = vmatpush3.msra.mxu0 %v357_v63  ;;  %5937 = vmatprep.mubr.f32.mxu0 %v302_v4  ;;  %v919_v63 = vand.u32 4294901760, %v840_v58  ;;  %v7962_v4 = vsub.f32 %v838_v55, %v913_v59 }
  0xa2   :  { %6808 = vmatprep.subr.bf16.mxu0 %v7846_v35 }
  0xa3   :  { %v7966_v6 = vsub.f32 %v840_v58, %v919_v63  ;;  %v1014_v27 = vand.u32 4294901760, %v7962_v4  ;;  %v5452_v58 = vld [vmem:[%s10011_s2] ss:$0 sm:$0xff] }
  0xa4   :  { %5938 = vmatmul.mubr.f32.vlgmr.msra.gmra.mrb[0].mxu0 %v312_v16  ;;  %v988_v16 = vand.u32 4294901760, %v987_v14 }
  0xa5   :  { %6810 = vmatpush3.bf16.msra.mxu0 %v7846_v35  ;;  %5940 = vmatprep.mubr.f32.mxu0 %v322_v29  ;;  %v1028_v34 = vand.u32 4294901760, %v7966_v6 }
  0xa6   :  { %5947 = vmatprep.subr.mxu0 %v7852_v40 }
  0xa7   :  { %v1029_v38 = vsub.f32 %v7966_v6, %v1028_v34 }
  0xa8   :  { %5941 = vmatmul.mubr.f32.gmra.mrb[2].mxu0 %v332_v30  ;;  %v1015_v30 = vsub.f32 %v7962_v4, %v1014_v27 }
  0xa9   :  { %5948 = vmatpush3.msra.mxu0 %v7852_v40  ;;  %5949 = vmatprep.mubr.f32.mxu0 %v303_v11  ;;  %v7977_v11 = vpack.c.bf16 %v922_v3, %v919_v63  ;;  %v1030_v41 = vand.u32 4294901760, %v1029_v38 }
  0xaa   :  { %6812 = vmatprep.subr.bf16.mxu0 %v7862_v49  ;;  %v1016_v32 = vand.u32 4294901760, %v1015_v30 }
  0xac   :  { %5950 = vmatmul.mubr.f32.vlgmr.msra.gmra.mrb[0].mxu0 %v313_v28  ;;  %v1021_v28 = vand.u32 4294901760, %v7964_v5 }
  0xad   :  { %6814 = vmatpush3.bf16.msra.mxu0 %v7862_v49  ;;  %5952 = vmatprep.mubr.f32.mxu0 %v323_v33 }
  0xae   :  { %5959 = vmatprep.subr.mxu0 %v358_v9  ;;  %v1022_v31 = vsub.f32 %v7964_v5, %v1021_v28  ;;  %v8018_v55 = vpack.c.bf16 %v1021_v28, %v1014_v27 }
  0xb0   :  { %5953 = vmatmul.mubr.f32.gmra.mrb[2].mxu0 %v333_v36  ;;  %v1023_v33 = vand.u32 4294901760, %v1022_v31 }
  0xb1   :  { %5960 = vmatpush3.msra.mxu0 %v358_v9  ;;  %5961 = vmatprep.mubr.f32.mxu0 %v7887_v0  ;;  %v7971_v9 = vsub.f32 %v841_v61, %v922_v3 }
  0xb2   :  { %6816 = vmatprep.subr.bf16.mxu0 %v7846_v35  ;;  %v8000_v37 = vpack.c.bf16 %v1023_v33, %v1016_v32 }
  0xb3   :  { %v1035_v36 = vand.u32 4294901760, %v7971_v9  ;;  %v6853_v47 = vpack.c.bf16 %v7971_v9, %v7966_v6  ;;  %v1577_v6 = vld [vmem:[%s10015_s6 + $0x28] sm:$0xff] }
  0xb4   :  { %5962 = vmatmul.mubr.f32.vlgmr.msra.gmra.mrb[0].mxu0 %v7895_v10 }
  0xb5   :  { %6818 = vmatpush3.bf16.msra.mxu0 %v7846_v35  ;;  %5964 = vmatprep.mubr.f32.mxu0 %v321_v25  ;;  %v835_v35 = vld [vmem:[%s10014_s5 + $0x8] sm:$0xff]  ;;  %v1036_v39 = vsub.f32 %v7971_v9, %v1035_v36  ;;  %v8020_v57 = vpack.c.bf16 %v1035_v36, %v1028_v34 }
  0xb6   :  { %5971 = vmatprep.subr.mxu0 %v7852_v40  ;;  %v904_v44 = vand.u32 4294901760, %v835_v35 }
  0xb7   :  { %v1037_v42 = vand.u32 4294901760, %v1036_v39 }
  0xb8   :  { %5965 = vmatmul.mubr.f32.gmra.mrb[2].mxu0 %v331_v26  ;;  %v7928_v45 = vpack.c.bf16 %v904_v44, %v901_v43  ;;  %v7941_v49 = vsub.f32 %v835_v35, %v904_v44 }
  0xb9   :  { %5972 = vmatpush3.msra.mxu0 %v7852_v40  ;;  %5973 = vmatprep.mubr.f32.mxu0 %v7887_v0  ;;  %v836_v40 = vld [vmem:[%s10014_s5 + $0x10] sm:$0xff]  ;;  %v8004_v35 = vpack.c.bf16 %v1037_v42, %v1030_v41 }
  0xba   :  { %6999 = vmatprep.subr.bf16.mxu0 %v10037_v46  ;;  %6821 = vmatpush3.bf16.msra.mxu1 %v7928_v45  ;;  %v907_v53 = vand.u32 4294901760, %v836_v40  ;;  %v993_v13 = vand.u32 4294901760, %v7941_v49  ;;  %v6844_v43 = vpack.c.bf16 %v7941_v49, %v7939_v48  ;;  %v1573_v48 = vld [vmem:[%s10015_s6 + $0x8] sm:$0xff] }
  0xbb   :  { %6822 = vmatprep.subr.bf16.mxu1 %v10037_v46 }
  0xbc   :  { %5974 = vmatmul.mubr.f32.vlgmr.msra.gmra.mrb[0].mxu0 %v7895_v10  ;;  %v7956_v0 = vpack.c.bf16 %v910_v54, %v907_v53  ;;  %v7958_v1 = vsub.f32 %v836_v40, %v907_v53  ;;  %v10032_v10 = vmov 0.0   ;;  %v994_v15 = vsub.f32 %v7941_v49, %v993_v13  ;;  %v1574_v49 = vld [vmem:[%s10015_s6 + $0x10] sm:$0xff] }
  0xbd   :  { %5976 = vmatprep.mubr.f32.mxu0 %v321_v25  ;;  %5995 = vmatprep.mubr.msk.f32.mxu1 %vm7696_vm9, %v10032_v10  ;;  %v6850_v40 = vpack.c.bf16 %v7964_v5, %v7962_v4  ;;  %v8014_v53 = vpack.c.bf16 %v993_v13, %v986_v12  ;;  %v1622_v4 = vand.u32 4294901760, %v1574_v49  ;;  %v1576_v5 = vld [vmem:[%s10015_s6 + $0x20] sm:$0xff] }
  0xbe   :  { %6824 = vmatpush3.bf16.msra.mxu1 %v7956_v0  ;;  %v995_v17 = vand.u32 4294901760, %v994_v15  ;;  %v1000_v18 = vand.u32 4294901760, %v7958_v1  ;;  %v6847_v44 = vpack.c.bf16 %v7960_v2, %v7958_v1  ;;  %v1575_v2 = vld [vmem:[%s10015_s6 + $0x18] sm:$0xff]  ;;  %v1628_v9 = vand.u32 4294901760, %v1576_v5 }
  0xbf   :  { %6825 = vmatprep.subr.bf16.mxu1 %v10037_v46 }
  0xc0   :  { %5977 = vmatmul.mubr.f32.gmra.mrb[2].mxu0 %v331_v26  ;;  %v7988_v20 = vpack.c.bf16 %v995_v17, %v988_v16  ;;  %v1001_v22 = vsub.f32 %v7958_v1, %v1000_v18  ;;  %v1009_v26 = vand.u32 4294901760, %v1008_v24  ;;  %v8016_v54 = vpack.c.bf16 %v1007_v19, %v1000_v18 }
  0xc1   :  { %v1619_v1 = vand.u32 4294901760, %v1573_v48 }
  0xc2   :  { %6827 = vmatpush3.bf16.msra.mxu1 %v7969_v7  ;;  %v1002_v25 = vand.u32 4294901760, %v1001_v22 }
  0xc3   :  { %6828 = vmatprep.subr.bf16.mxu1 %v10037_v46 }
  0xc4   :  { %v7994_v29 = vpack.c.bf16 %v1009_v26, %v1002_v25 }
  0xc6   :  { %6830 = vmatpush3.bf16.msra.mxu1 %v7977_v11 }
  0xc7   :  { %6831 = vmatprep.subr.bf16.mxu1 %v10037_v46 }
 0x18f   :  { %v5975_v59 = vpop.f32.mrb[0].mxu0 }
 0x190   :  { %v8025_v60 = vadd.f32 %v5975_v59, %v5452_v58  ;;  %v812_v61 = vpop.f32.mrb[1].mxu0 }
 0x191   :  { %v8027_v63 = vadd.f32 %v5452_v58, %v812_v61 }
 0x192   :  { %v846_v3 = vsel %vm844_vm10, %v8025_v60, 0.0  ;;  %v855_v12 = vmul.f32 %v8025_v60, %v8025_v60 }
 0x193   :  { %v845_v13 = vsel %vm844_vm10, %v8027_v63, 0.0  ;;  %v854_v14 = vmul.f32 %v8027_v63, %v8027_v63  ;;  %v5978_v15 = vpop.f32.mrb[2].mxu0 }
 0x194   :  { %v857_v16 = vsel %vm844_vm10, %v855_v12, 0.0  ;;  %v847_v17 = vadd.f32 %v846_v3, %v845_v13  ;;  %v8038_v18 = vadd.f32 %v5978_v15, %v5452_v58  ;;  %v824_v19 = vpop.f32.mrb[3].mxu0 }
 0x195   :  { %v856_v22 = vsel %vm844_vm10, %v854_v14, 0.0  ;;  %v8041_v24 = vadd.f32 %v5452_v58, %v824_v19 }
 0x196   :  { %v848_v25 = vrot.slane %v847_v17, 4  ;;  %v858_v26 = vadd.f32 %v857_v16, %v856_v22  ;;  %v866_v27 = vsel %vm844_vm10, %v8038_v18, 0.0  ;;  %v875_v28 = vmul.f32 %v8038_v18, %v8038_v18 }
 0x197   :  { %v865_v30 = vsel %vm844_vm10, %v8041_v24, 0.0  ;;  %v874_v31 = vmul.f32 %v8041_v24, %v8041_v24 }
 0x198   :  { %v849_v32 = vadd.f32 %v848_v25, %v847_v17  ;;  %v859_v33 = vrot.slane %v858_v26, 4  ;;  %v877_v34 = vsel %vm844_vm10, %v875_v28, 0.0  ;;  %v867_v36 = vadd.f32 %v866_v27, %v865_v30 }
 0x199   :  { %v876_v38 = vsel %vm844_vm10, %v874_v31, 0.0 }
 0x19a   :  { %v860_v39 = vadd.f32 %v859_v33, %v858_v26  ;;  %v868_v41 = vrot.slane %v867_v36, 4  ;;  %v878_v42 = vadd.f32 %v877_v34, %v876_v38  ;;  %v850_v58 = vrot.slane %v849_v32, 2 }
 0x19c   :  { %v861_v59 = vrot.slane %v860_v39, 2  ;;  %v869_v61 = vadd.f32 %v868_v41, %v867_v36  ;;  %v879_v3 = vrot.slane %v878_v42, 4  ;;  %v851_v15 = vadd.f32 %v850_v58, %v849_v32 }
 0x19e   :  { %v870_v12 = vrot.slane %v869_v61, 2  ;;  %v880_v13 = vadd.f32 %v879_v3, %v878_v42  ;;  %v862_v14 = vadd.f32 %v861_v59, %v860_v39  ;;  %v852_v28 = vrot.slane %v851_v15, 1  ;;  %v8182_v3 = vld [vmem:[%s10015_s6 + $0x60] sm:$0xff] }
 0x1a0   :  { %v871_v16 = vadd.f32 %v870_v12, %v869_v61  ;;  %v881_v19 = vrot.slane %v880_v13, 2  ;;  %v863_v25 = vrot.slane %v862_v14, 1  ;;  %v853_v33 = vadd.f32 %v852_v28, %v851_v15 }
 0x1a1   :  { %v8177_v61 = vsub.f32 %v1576_v5, %v1628_v9 }
 0x1a2   :  { %v872_v17 = vrot.slane %v871_v16, 1  ;;  %v882_v22 = vadd.f32 %v881_v19, %v880_v13  ;;  %v864_v31 = vadd.f32 %v863_v25, %v862_v14  ;;  %v1586_v25 = vld [vmem:[%s10015_s6 + $0x70] sm:$0xff] }
 0x1a4   :  { %v883_v27 = vrot.slane %v882_v22, 1  ;;  %v873_v26 = vadd.f32 %v872_v17, %v871_v16 }
 0x1a6   :  { %v884_v30 = vadd.f32 %v883_v27, %v882_v22  ;;  %v1585_v22 = vld [vmem:[%s10015_s6 + $0x68] sm:$0xff] }
 0x1a8   :  { %v888_v32 = vsel %vm885_vm11, %v873_v26, %v884_v30  ;;  %v1652_v30 = vand.u32 4294901760, %v8182_v3 }
 0x1a9   :  { %v892_v34 = vsel %vm889_vm12, %v864_v31, %v888_v32  ;;  %v1587_v31 = vld [vmem:[%s10015_s6 + $0x78] sm:$0xff] }
 0x1aa   :  { %v896_v36 = vsel %vm893_vm13, %v853_v33, %v892_v34  ;;  %v1588_v33 = vld [vmem:[%s10015_s6 + $0x80] sm:$0xff] }
 0x1ab   :  { %v898_v38 = vsel %vm844_vm10, %v896_v36, 0 }
 0x1ac   :  { %v973_v39 = vand.u32 4294901760, %v898_v38 }
 0x1ae   :  { %v974_v41 = vsub.f32 %v898_v38, %v973_v39  ;;  %v1589_v38 = vld [vmem:[%s10015_s6 + $0x88] sm:$0xff] }
 0x1b0   :  { %v975_v42 = vand.u32 4294901760, %v974_v41 }
 0x1b2   :  { %v976_v58 = vsub.f32 %v974_v41, %v975_v42 }
 0x1b4   :  { %v977_v59 = vand.u32 4294901760, %v976_v58  ;;  %v8234_v58 = vsub.f32 %v8182_v3, %v1652_v30 }
 0x1b6   :  { %5996 = vmatmul.mubr.f32.vlgmr.msra.gmra.mrb[0].mxu1 %v977_v59  ;;  %v1658_v59 = vand.u32 4294901760, %v1586_v25 }
 0x1b7   :  { %6833 = vmatpush3.bf16.msra.mxu1 %v7988_v20  ;;  %6014 = vmatprep.mubr.msk.f32.mxu1 %vm7696_vm9, %v10032_v10  ;;  %v1578_v20 = vld [vmem:[%s10015_s6 + $0x30] sm:$0xff] }
 0x1b8   :  { %6834 = vmatprep.subr.bf16.mxu1 %v10037_v46  ;;  %v1634_v13 = vand.u32 4294901760, %v1578_v20 }
 0x1ba   :  { %v8200_v28 = vsub.f32 %v1578_v20, %v1634_v13 }
 0x1bb   :  { %6836 = vmatpush3.bf16.msra.mxu1 %v7994_v29  ;;  %v1579_v29 = vld [vmem:[%s10015_s6 + $0x38] sm:$0xff] }
 0x1bc   :  { %6837 = vmatprep.subr.bf16.mxu1 %v10037_v46  ;;  %v1637_v14 = vand.u32 4294901760, %v1579_v29 }
 0x1be   :  { %v8202_v27 = vsub.f32 %v1579_v29, %v1637_v14  ;;  %v8257_v20 = vpack.c.bf16 %v1637_v14, %v1634_v13 }
 0x1bf   :  { %6839 = vmatpush3.bf16.msra.mxu1 %v8000_v37  ;;  %v8148_v37 = vld [vmem:[%s10015_s6 + $0x40] sm:$0xff] }
 0x1c0   :  { %6840 = vmatprep.subr.bf16.mxu1 %v10037_v46  ;;  %v1640_v15 = vand.u32 4294901760, %v8148_v37 }
 0x1c2   :  { %v8205_v26 = vsub.f32 %v8148_v37, %v1640_v15 }
 0x1c3   :  { %6842 = vmatpush3.bf16.msra.mxu1 %v8004_v35 }
 0x1c4   :  { %6843 = vmatprep.subr.bf16.mxu1 %v10037_v46 }
 0x1c6   :  { %6015 = vmatmul.mubr.f32.vlgmr.msra.gmra.mrb[0].mxu1 %v973_v39 }
 0x1c7   :  { %6845 = vmatpush3.bf16.msra.mxu1 %v6844_v43  ;;  %6033 = vmatprep.mubr.msk.f32.mxu1 %vm7696_vm9, %v10032_v10 }
 0x1c8   :  { %6846 = vmatprep.subr.bf16.mxu1 %v10037_v46 }
 0x1cb   :  { %6848 = vmatpush3.bf16.msra.mxu1 %v6847_v44  ;;  %v8154_v44 = vsub.f32 %v1573_v48, %v1619_v1  ;;  %v1661_v48 = vand.u32 4294901760, %v1587_v31 }
 0x1cc   :  { %6849 = vmatprep.subr.bf16.mxu1 %v10037_v46 }
 0x1cf   :  { %6851 = vmatpush3.bf16.msra.mxu1 %v6850_v40  ;;  %v8156_v40 = vsub.f32 %v1574_v49, %v1622_v4  ;;  %v1664_v49 = vand.u32 4294901760, %v1588_v33 }
 0x1d0   :  { %6852 = vmatprep.subr.bf16.mxu1 %v10037_v46 }
 0x1d3   :  { %6854 = vmatpush3.bf16.msra.mxu1 %v6853_v47  ;;  %v8161_v47 = vld [vmem:[%s10015_s6 + $0x48] sm:$0xff] }
 0x1d4   :  { %6855 = vmatprep.subr.bf16.mxu1 %v10037_v46  ;;  %v1643_v16 = vand.u32 4294901760, %v8161_v47 }
 0x1d6   :  { %6034 = vmatmul.mubr.f32.vlgmr.msra.gmra.mrb[0].mxu1 %v974_v41  ;;  %v8217_v34 = vsub.f32 %v8161_v47, %v1643_v16  ;;  %v8273_v13 = vpack.c.bf16 %v1643_v16, %v1640_v15  ;;  %v8291_v16 = vpack.c.bf16 %v1661_v48, %v1658_v59 }
 0x1d7   :  { %6857 = vmatpush3.bf16.msra.mxu1 %v7928_v45  ;;  %6052 = vmatprep.mubr.msk.f32.mxu1 %vm7696_vm9, %v10032_v10 }
 0x1d8   :  { %6858 = vmatprep.subr.bf16.mxu1 %v10037_v46 }
 0x1db   :  { %6860 = vmatpush3.bf16.msra.mxu1 %v7956_v0 }
 0x1dc   :  { %6861 = vmatprep.subr.bf16.mxu1 %v10037_v46 }
 0x1df   :  { %6863 = vmatpush3.bf16.msra.mxu1 %v7969_v7 }
 0x1e0   :  { %6864 = vmatprep.subr.bf16.mxu1 %v10037_v46 }
 0x1e3   :  { %6866 = vmatpush3.bf16.msra.mxu1 %v7977_v11 }
 0x1e4   :  { %6867 = vmatprep.subr.bf16.mxu1 %v10037_v46 }
 0x1e6   :  { %6053 = vmatmul.mubr.f32.vlgmr.msra.gmra.mrb[0].mxu1 %v975_v42  ;;  %v1655_v42 = vand.u32 4294901760, %v1585_v22 }
 0x1e7   :  { %6869 = vmatpush3.bf16.msra.mxu1 %v8014_v53  ;;  %6071 = vmatprep.mubr.msk.f32.mxu1 %vm7696_vm9, %v10032_v10  ;;  %v8166_v53 = vld [vmem:[%s10015_s6 + $0x50] sm:$0xff] }
 0x1e8   :  { %6870 = vmatprep.subr.bf16.mxu1 %v10037_v46  ;;  %v1646_v19 = vand.u32 4294901760, %v8166_v53  ;;  %v8285_v15 = vpack.c.bf16 %v1655_v42, %v1652_v30 }
 0x1ea   :  { %v8220_v36 = vsub.f32 %v8166_v53, %v1646_v19 }
 0x1eb   :  { %6872 = vmatpush3.bf16.msra.mxu1 %v8016_v54  ;;  %v8171_v54 = vld [vmem:[%s10015_s6 + $0x58] sm:$0xff] }
 0x1ec   :  { %6873 = vmatprep.subr.bf16.mxu1 %v10037_v46  ;;  %v1649_v17 = vand.u32 4294901760, %v8171_v54 }
 0x1ee   :  { %v8231_v41 = vsub.f32 %v8171_v54, %v1649_v17  ;;  %v8279_v14 = vpack.c.bf16 %v1649_v17, %v1646_v19 }
 0x1ef   :  { %6875 = vmatpush3.bf16.msra.mxu1 %v8018_v55 }
 0x1f0   :  { %6876 = vmatprep.subr.bf16.mxu1 %v10037_v46 }
 0x1f3   :  { %6878 = vmatpush3.bf16.msra.mxu1 %v8020_v57 }
 0x1f4   :  { %6879 = vmatprep.subr.bf16.mxu1 %v10037_v46 }
 0x1f6   :  { %6072 = vmatmul.mubr.f32.vlgmr.msra.gmra.mrb[0].mxu1 %v973_v39 }
 0x1f7   :  { %6881 = vmatpush3.bf16.msra.mxu1 %v7928_v45  ;;  %6090 = vmatprep.mubr.msk.f32.mxu1 %vm7696_vm9, %v10032_v10  ;;  %v1572_v45 = vld [vmem:[%s10015_s6] sm:$0xff] }
 0x1f8   :  { %6882 = vmatprep.subr.bf16.mxu1 %v10037_v46 }
 0x1fb   :  { %6884 = vmatpush3.bf16.msra.mxu1 %v7956_v0  ;;  %v1616_v0 = vand.u32 4294901760, %v1572_v45 }
 0x1fc   :  { %6885 = vmatprep.subr.bf16.mxu1 %v10037_v46 }
 0x1fd   :  { %v8150_v35 = vpack.c.bf16 %v1619_v1, %v1616_v0  ;;  %v8152_v43 = vsub.f32 %v1572_v45, %v1616_v0  ;;  %v1591_v45 = vld [vmem:[%s10015_s6 + $0x98] sm:$0xff]  ;;  %v1592_v0 = vld [vmem:[%s10015_s6 + $0xa0] sm:$0xff]  ;;  %v8244_v1 = vsub.f32 %v1585_v22, %v1655_v42 }
 0x1fe   :  { %v1676_v47 = vand.u32 4294901760, %v1592_v0 }
 0x1ff   :  { %6887 = vmatpush3.bf16.msra.mxu1 %v7969_v7  ;;  %v1625_v7 = vand.u32 4294901760, %v1575_v2  ;;  %7001 = vmatpush1.bf16.msra.mxu0 %v8150_v35 }
 0x200   :  { %6888 = vmatprep.subr.bf16.mxu1 %v10037_v46  ;;  %7002 = vmatprep.subr.bf16.mxu0 %v10037_v46  ;;  %v8267_v3 = vsub.f32 %v1592_v0, %v1676_v47  ;;  %v5453_v0 = vld [vmem:[%s10012_s3] ss:$0 sm:$0xff] }
 0x201   :  { %v8173_v55 = vpack.c.bf16 %v1625_v7, %v1622_v4  ;;  %v8175_v57 = vsub.f32 %v1575_v2, %v1625_v7  ;;  %v8246_v2 = vsub.f32 %v1586_v25, %v1658_v59  ;;  %v1667_v4 = vand.u32 4294901760, %v1589_v38 }
 0x202   :  { %v8251_v7 = vsub.f32 %v1587_v31, %v1661_v48  ;;  %10139 = vst [vmem:[#allocation9_spill] sm:$0xff] %v8267_v3  ;;  %v7698_v48 = vmov 1966171168  }
 0x203   :  { %6890 = vmatpush3.bf16.msra.mxu1 %v7977_v11  ;;  %v1631_v11 = vand.u32 4294901760, %v1577_v6  ;;  %7004 = vmatpush1.bf16.msra.mxu0 %v8173_v55  ;;  %v8259_v29 = vsub.f32 %v1589_v38, %v1667_v4  ;;  %v8297_v19 = vpack.c.bf16 %v1667_v4, %v1664_v49 }
 0x204   :  { %6891 = vmatprep.subr.bf16.mxu1 %v10037_v46  ;;  %7005 = vmatprep.subr.bf16.mxu0 %v10037_v46 }
 0x205   :  { %v8186_v12 = vsub.f32 %v1577_v6, %v1631_v11  ;;  %v8214_v32 = vpack.c.bf16 %v1631_v11, %v1628_v9  ;;  %v1593_v6 = vld [vmem:[%s10015_s6 + $0xa8] sm:$0xff]  ;;  %v8253_v9 = vsub.f32 %v1588_v33, %v1664_v49  ;;  %v1673_v11 = vand.u32 4294901760, %v1591_v45  ;;  %10141 = vst [vmem:[#allocation11_spill] sm:$0xff] %v8297_v19 }
 0x206   :  { %6091 = vmatmul.mubr.f32.vlgmr.msra.gmra.mrb[0].mxu1 %v973_v39  ;;  %v1590_v39 = vld [vmem:[%s10015_s6 + $0x90] sm:$0xff]  ;;  %v1679_v54 = vand.u32 4294901760, %v1593_v6  ;;  %v1460_v49 = vunpack.c.l.s4 %v7698_v48 }
 0x207   :  { %6893 = vmatpush1.bf16.msra.mxu1 %v8150_v35  ;;  %v1670_v5 = vand.u32 4294901760, %v1590_v39  ;;  %7007 = vmatpush1.bf16.msra.mxu0 %v8214_v32  ;;  %v8265_v53 = vsub.f32 %v1591_v45, %v1673_v11 }
 0x208   :  { %6894 = vmatprep.subr.bf16.mxu1 %v10037_v46  ;;  %7008 = vmatprep.subr.bf16.mxu0 %v10037_v46  ;;  %v8269_v22 = vsub.f32 %v1593_v6, %v1679_v54  ;;  %v8309_v25 = vpack.c.bf16 %v1679_v54, %v1676_v47  ;;  %v1461_v4 = vunpack.c.0.s8 %v1460_v49  ;;  %v10031_v6 = vsub.s32 1, %v7803_v8  ;;  %v1594_v47 = vld [vmem:[%s10015_s6 + $0xb0] sm:$0xff]  ;;  %v1595_v54 = vld [vmem:[%s10015_s6 + $0xb8] sm:$0xff] }
 0x209   :  { %v8261_v37 = vsub.f32 %v1590_v39, %v1670_v5  ;;  %v8303_v17 = vpack.c.bf16 %v1673_v11, %v1670_v5 }
 0x20a   :  { %10140 = vst [vmem:[#allocation10_spill] sm:$0xff] %v8269_v22  ;;  %10143 = vst [vmem:[#allocation13_spill] sm:$0xff] %v8309_v25 }
 0x20b   :  { %6896 = vmatpush1.bf16.msra.mxu1 %v8173_v55  ;;  %7010 = vmatpush1.bf16.msra.mxu0 %v8257_v20  ;;  %10142 = vst [vmem:[#allocation12_spill] sm:$0xff] %v8303_v17 }
 0x20c   :  { %6897 = vmatprep.subr.bf16.mxu1 %v10037_v46  ;;  %7011 = vmatprep.subr.bf16.mxu0 %v10037_v46 }
 0x20f   :  { %6899 = vmatpush1.bf16.msra.mxu1 %v8214_v32  ;;  %7013 = vmatpush1.bf16.msra.mxu0 %v8273_v13 }
 0x210   :  { %6900 = vmatprep.subr.bf16.mxu1 %v10037_v46  ;;  %7014 = vmatprep.subr.bf16.mxu0 %v10037_v46 }
 0x213   :  { %6902 = vmatpush1.bf16.msra.mxu1 %v8257_v20  ;;  %7016 = vmatpush1.bf16.msra.mxu0 %v8279_v14 }
 0x214   :  { %6903 = vmatprep.subr.bf16.mxu1 %v10037_v46  ;;  %7017 = vmatprep.subr.bf16.mxu0 %v10037_v46 }
 0x217   :  { %6905 = vmatpush1.bf16.msra.mxu1 %v8273_v13  ;;  %7019 = vmatpush1.bf16.msra.mxu0 %v8285_v15 }
 0x218   :  { %6906 = vmatprep.subr.bf16.mxu1 %v10037_v46  ;;  %7020 = vmatprep.subr.bf16.mxu0 %v10037_v46 }
 0x21b   :  { %6908 = vmatpush1.bf16.msra.mxu1 %v8279_v14  ;;  %7022 = vmatpush1.bf16.msra.mxu0 %v8291_v16 }
 0x21c   :  { %6909 = vmatprep.subr.bf16.mxu1 %v10037_v46  ;;  %7023 = vmatprep.subr.bf16.mxu0 %v10037_v46 }
 0x21f   :  { %6911 = vmatpush1.bf16.msra.mxu1 %v8285_v15  ;;  %7025 = vmatpush1.bf16.msra.mxu0 %v8297_v19 }
 0x220   :  { %6912 = vmatprep.subr.bf16.mxu1 %v10037_v46  ;;  %7026 = vmatprep.subr.bf16.mxu0 %v10037_v46 }
 0x223   :  { %6914 = vmatpush1.bf16.msra.mxu1 %v8291_v16  ;;  %7028 = vmatpush1.bf16.msra.mxu0 %v8303_v17 }
 0x224   :  { %6915 = vmatprep.subr.bf16.mxu1 %v10037_v46  ;;  %7029 = vmatprep.subr.bf16.mxu0 %v10037_v46 }
 0x227   :  { %6917 = vmatpush1.bf16.msra.mxu1 %v8297_v19  ;;  %7031 = vmatpush1.bf16.msra.mxu0 %v8309_v25 }
 0x228   :  { %6918 = vmatprep.subr.bf16.mxu1 %v10037_v46  ;;  %7032 = vmatprep.subr.bf16.mxu0 %v10037_v46 }
 0x22b   :  { %6920 = vmatpush1.bf16.msra.mxu1 %v8303_v17 }
 0x22c   :  { %6921 = vmatprep.subr.bf16.mxu1 %v10037_v46 }
 0x22f   :  { %6923 = vmatpush1.bf16.msra.mxu1 %v8309_v25 }
 0x230   :  { %6924 = vmatprep.subr.bf16.mxu1 %v10037_v46 }
 0x2d9   :  { %v1433_v30 = vpop.f32.mrb[0].mxu1 }
 0x2da   :  { %v1437_v31 = vmul.f32 0.0078125, %v1433_v30  ;;  %v6092_v33 = vpop.f32.mrb[1].mxu1  ;;  %v1682_v30 = vand.u32 4294901760, %v1594_v47 }
 0x2db   :  { %v1685_v33 = vand.u32 4294901760, %v1595_v54 }
 0x2dc   :  { %v1438_v38 = vmul.f32 %v1437_v31, %v1437_v31 }
 0x2dd   :  { %v8336_v48 = vpack.c.bf16 %v1685_v33, %v1682_v30 }
 0x2de   :  { %v1440_v39 = vrot.slane %v1438_v38, 7 }
 0x2df   :  { %10145 = vst [vmem:[#allocation15_spill] sm:$0xff] %v8336_v48  ;;  %7034 = vmatpush1.bf16.msra.mxu0 %v8336_v48  ;;  %6926 = vmatpush1.bf16.msra.mxu1 %v8336_v48  ;;  %v8362_v48 = vsub.f32 %v1595_v54, %v1685_v33 }
 0x2e0   :  { %v1442_v42 = vsub.f32 %v1437_v31, %v1440_v39  ;;  %v8328_v39 = vsub.s32 %v1461_v4, %v7803_v8  ;;  %v10040_v4 = vand.u32 4294901760, %v8152_v43  ;;  %7071 = vmatprep.subr.bf16.mxu0 %v10037_v46  ;;  %6927 = vmatprep.subr.bf16.mxu1 %v10037_v46 }
 0x2e1   :  { %10148 = vst [vmem:[#allocation18_spill] sm:$0xff] %v8362_v48 }
 0x2e2   :  { %v1443_v59 = vmax.f32 %v1442_v42, 0.0  ;;  %10144 = vst [vmem:[#allocation14_spill] sm:$0xff] %v8328_v39  ;;  %v10035_v42 = vsub.s32 3, %v7803_v8  ;;  %v1768_v10 = vsub.f32 %v8152_v43, %v10040_v4 }
 0x2e4   :  { %v1444_v45 = vadd.f32 1e-05, %v1443_v59  ;;  %v843_v59 = vld [vmem:[%s10013_s4] sm:$0x1]  ;;  %v1769_v46 = vand.u32 4294901760, %v1768_v10  ;;  %s7699_s4 = smov 64  }
 0x2e6   :  { %7661 = vrsqrt.f32 %v1444_v45 }
 0x2f0   :  { %v7662_v5 = vpop.eup %7661 }
 0x2f1   :  { %v1452_v11 = vmul.f32 %v7662_v5, %v5453_v0  ;;  %v8339_v0 = vsub.s32 0, %v7803_v8  ;;  %v10046_v5 = vand.u32 4294901760, %v8154_v44 }
 0x2f3   :  { %v1454_v38 = vrot.slane %v1452_v11, 1  ;;  %v1491_v45 = vrot.slane %v1452_v11, %v10031_v6  ;;  %10146 = vst [vmem:[#allocation16_spill] sm:$0xff] %v8339_v0  ;;  %v1495_v6 = vrot.slane %v1452_v11, %v10035_v42  ;;  %v1775_v52 = vsub.f32 %v8154_v44, %v10046_v5 }
 0x2f4   :  { %v8360_v42 = vsub.f32 %v1594_v47, %v1682_v30 }
 0x2f5   :  { %v1456_v49 = vmul.f32 %v1454_v38, %v1437_v31  ;;  %v1517_v31 = vmul.f32 %v8025_v60, %v1491_v45  ;;  %v1516_v38 = vmul.f32 %v8027_v63, %v1491_v45  ;;  %v1776_v60 = vand.u32 4294901760, %v1775_v52 }
 0x2f6   :  { %10147 = vst [vmem:[#allocation17_spill] sm:$0xff] %v8360_v42  ;;  %v10043_v63 = vand.u32 4294901760, %v8156_v40  ;;  %v10044_v45 = vand.u32 4294901760, %v8175_v57  ;;  %v1519_v54 = vmul.f32 %v8038_v18, %v1495_v6  ;;  %v1518_v30 = vmul.f32 %v8041_v24, %v1495_v6 }
 0x2f7   :  { %v1457_v56 = vsub.f32 %v843_v59, %v1456_v49  ;;  %v1465_v50 = vrot.slane %v1456_v49, %v8328_v39  ;;  %v8366_v19 = vpack.c.bf16 %v1776_v60, %v1769_v46 }
 0x2f9   :  { %v1472_v49 = vrot.slane %v1465_v50, %v8328_v39  ;;  %v1504_v11 = vrot.slane %v1457_v56, %v8339_v0  ;;  %v1782_v50 = vsub.f32 %v8156_v40, %v10043_v63  ;;  %v1789_v56 = vsub.f32 %v8175_v57, %v10044_v45 }
 0x2fb   :  { %v1473_v25 = vcombine.high %v1472_v49, %v1472_v49  ;;  %v1521_v4 = vadd.f32 %v1517_v31, %v1504_v11  ;;  %v1520_v17 = vadd.f32 %v1516_v38, %v1504_v11  ;;  %v1783_v33 = vand.u32 4294901760, %v1782_v50 }
 0x2fc   :  { %v1790_v31 = vand.u32 4294901760, %v1789_v56 }
 0x2fd   :  { %v1525_v47 = vmax.f32 %v1521_v4, 0.0  ;;  %v1524_v10 = vmax.f32 %v1520_v17, 0.0  ;;  %v1475_v52 = vsub.f32 %v843_v59, %v1473_v25  ;;  %v10045_v17 = vand.u32 4294901760, %v8177_v61 }
 0x2fe   :  { %v8377_v63 = vpack.c.bf16 %v1790_v31, %v1783_v33  ;;  %v10047_v25 = vand.u32 4294901760, %v8186_v12  ;;  %v10049_v33 = vand.u32 4294901760, %v8200_v28  ;;  %v10048_v31 = vand.u32 4294901760, %v8202_v27 }
 0x2ff   :  { %1558 = vrot.lane.b32.xlu1 %v1525_v47, %s7699_s4  ;;  %v1541_v46 = vrot.slane %v1525_v47, 1  ;;  %1556 = vrot.lane.b32.xlu0 %v1524_v10, %s7699_s4  ;;  %v1540_v38 = vrot.slane %v1524_v10, 1  ;;  %v1510_v49 = vrot.slane %v1475_v52, %v8339_v0  ;;  %v1528_v11 = vrot.slane %v1524_v10, 7 }
 0x300   :  { %v1529_v60 = vrot.slane %v1525_v47, 7  ;;  %v1796_v50 = vsub.f32 %v8177_v61, %v10045_v17  ;;  %v1803_v56 = vsub.f32 %v8186_v12, %v10047_v25  ;;  %v10053_v0 = vand.u32 4294901760, %v8217_v34 }
 0x301   :  { %v1523_v18 = vadd.f32 %v1519_v54, %v1510_v49  ;;  %v1522_v59 = vadd.f32 %v1518_v30, %v1510_v49  ;;  %v1546_v24 = vsel %vm151_vm0, %v1540_v38, %v1541_v46 }
 0x302   :  { %v1604_v6 = vsel %vm844_vm10, %v1546_v24, 0  ;;  %v8386_v4 = vsel %vm130_vm1, %v1528_v11, %v1529_v60  ;;  %v1797_v54 = vand.u32 4294901760, %v1796_v50  ;;  %v1804_v30 = vand.u32 4294901760, %v1803_v56 }
 0x303   :  { %v1527_v47 = vmax.f32 %v1523_v18, 0.0  ;;  %v1526_v10 = vmax.f32 %v1522_v59, 0.0  ;;  %v8394_v52 = vand.u32 4294901760, %v1604_v6  ;;  %v1810_v18 = vsub.f32 %v8200_v28, %v10049_v33 }
 0x304   :  { %v8401_v25 = vpack.c.bf16 %v1804_v30, %v1797_v54  ;;  %v1817_v59 = vsub.f32 %v8202_v27, %v10048_v31 }
 0x305   :  { %v1531_v49 = vrot.slane %v1527_v47, 7  ;;  %v1543_v24 = vrot.slane %v1527_v47, 1  ;;  %1562 = vrot.lane.b32.xlu1 %v1527_v47, %s7699_s4  ;;  %v1542_v45 = vrot.slane %v1526_v10, 1  ;;  %1560 = vrot.lane.b32.xlu0 %v1526_v10, %s7699_s4  ;;  %v8399_v17 = vsub.f32 %v1604_v6, %v8394_v52  ;;  %s5444_s4 = sshll.u32 %s7700_s28, 4  ;;  %s5445_s4 = int_to_ptr.vmem [resolvable:$true] %s5444_s4 }
 0x306   :  { %v1530_v5 = vrot.slane %v1526_v10, 7  ;;  %v1818_v33 = vand.u32 4294901760, %v1817_v59  ;;  %s7669_s6 = scalar_lea.vmem %s5445_s4, 32  ;;  %p7674_p1 = scmp.lt.s32.totalorder %s5445_s4, %s5445_s4 }
 0x307   :  { %10149 = vst [vmem:[#allocation19_spill] sm:$0xff] %v8399_v17  ;;  %v1705_v50 = vand.u32 4294901760, %v8399_v17  ;;  %v8412_v56 = vsel %vm130_vm1, %v1531_v49, %v1528_v11  ;;  %v8416_v6 = vsel %vm151_vm0, %v1541_v46, %v1542_v45  ;;  %v8420_v47 = vsel %vm151_vm0, %v1542_v45, %v1543_v24  ;;  %p7670_p0 = scmp.ne.s32.totalorder %s5445_s4, %s7669_s6  ;;  %p7675_p2 = scmp.lt.s32.totalorder %s7669_s6, %s7669_s6 }
 0x308   :  { %v8424_v10 = vsel %vm130_vm1, %v1530_v5, %v1531_v49  ;;  %v8428_v54 = vsel %vm130_vm1, %v1529_v60, %v1530_v5  ;;  %v8433_v30 = vsel %vm151_vm0, %v1543_v24, %v1540_v38  ;;  %v1811_v46 = vand.u32 4294901760, %v1810_v18 }
 0x309   :  { %2217 = vmatprep.mubr.f32.mxu0 %v1705_v50  ;;  %v1706_v11 = vsub.f32 %v8399_v17, %v1705_v50  ;;  %v10052_v45 = vand.u32 4294901760, %v8205_v26  ;;  %v10054_v60 = vand.u32 4294901760, %v8220_v36  ;;  %v1831_v38 = vsub.f32 %v8217_v34, %v10053_v0  ;;  %p7676_p3 = por %p7675_p2, %p7674_p1 }
 0x30a   :  { %v8437_v49 = vpack.c.bf16 %v1818_v33, %v1811_v46  ;;  %v10055_v24 = vand.u32 4294901760, %v8231_v41  ;;  %v10061_v46 = vand.u32 4294901760, %v8244_v1 }
 0x30b   :  { %v1707_v31 = vand.u32 4294901760, %v1706_v11  ;;  %v1824_v5 = vsub.f32 %v8205_v26, %v10052_v45  ;;  %v1838_v59 = vsub.f32 %v8220_v36, %v10054_v60  ;;  %v10060_v11 = vand.u32 4294901760, %v8234_v58  ;;  %p7677_p4 = pnand %p7676_p3, %p7670_p0 }
 0x30c   :  { %v1845_v33 = vsub.f32 %v8231_v41, %v10055_v24  ;;  %v10063_v24 = vand.u32 4294901760, %v8246_v2 }
 0x30d   :  { %1708 = vmatprep.mubr.f32.mxu1 %v1707_v31  ;;  %v1825_v18 = vand.u32 4294901760, %v1824_v5  ;;  %v1832_v31 = vand.u32 4294901760, %v1831_v38  ;;  %v1839_v50 = vand.u32 4294901760, %v1838_v59  ;;  %v1852_v5 = vsub.f32 %v8234_v58, %v10060_v11 }
 0x30e   :  { %v1846_v0 = vand.u32 4294901760, %v1845_v33  ;;  %v1859_v38 = vsub.f32 %v8244_v1, %v10061_v46  ;;  %v10064_v59 = vand.u32 4294901760, %v8251_v7 }
 0x30f   :  { %v8455_v45 = vpack.c.bf16 %v1832_v31, %v1825_v18  ;;  %v1853_v39 = vand.u32 4294901760, %v1852_v5  ;;  %v1866_v18 = vsub.f32 %v8246_v2, %v10063_v24 }
 0x310   :  { %v8463_v60 = vpack.c.bf16 %v1846_v0, %v1839_v50  ;;  %v1860_v8 = vand.u32 4294901760, %v1859_v38  ;;  %v1873_v31 = vsub.f32 %v8251_v7, %v10064_v59  ;;  %v10065_v0 = vand.u32 4294901760, %v8253_v9 }
 0x311   :  { %v1867_v11 = vand.u32 4294901760, %v1866_v18  ;;  %v10066_v50 = vand.u32 4294901760, %v8259_v29 }
 0x312   :  { %v8473_v33 = vpack.c.bf16 %v1860_v8, %v1853_v39  ;;  %v1874_v46 = vand.u32 4294901760, %v1873_v31  ;;  %v1880_v5 = vsub.f32 %v8253_v9, %v10065_v0  ;;  %v10067_v8 = vand.u32 4294901760, %v8261_v37 }
 0x313   :  { %v1887_v38 = vsub.f32 %v8259_v29, %v10066_v50  ;;  %v10068_v39 = vand.u32 4294901760, %v8265_v53  ;;  %v10069_v50 = vand.u32 4294901760, %v8267_v3 }
 0x314   :  { %v8477_v17 = vpack.c.bf16 %v1874_v46, %v1867_v11  ;;  %v1881_v24 = vand.u32 4294901760, %v1880_v5  ;;  %v1894_v11 = vsub.f32 %v8261_v37, %v10067_v8  ;;  %v10072_v5 = vand.u32 4294901760, %v8269_v22 }
 0x315   :  { %v1888_v59 = vand.u32 4294901760, %v1887_v38  ;;  %v1901_v46 = vsub.f32 %v8265_v53, %v10068_v39  ;;  %v10070_v39 = vand.u32 4294901760, %v8360_v42 }
 0x316   :  { %10150 = vst [vmem:[#allocation20_spill] sm:$0xff] %v8477_v17  ;;  %v1895_v31 = vand.u32 4294901760, %v1894_v11  ;;  %v10071_v11 = vand.u32 4294901760, %v8362_v48 }
 0x317   :  { %v8487_v18 = vpack.c.bf16 %v1888_v59, %v1881_v24  ;;  %v1902_v0 = vand.u32 4294901760, %v1901_v46  ;;  %v1908_v24 = vsub.f32 %v8267_v3, %v10069_v50  ;;  %v1915_v59 = vsub.f32 %v8269_v22, %v10072_v5 }
 0x319   :  { %10151 = vst [vmem:[#allocation21_spill] sm:$0xff] %v8487_v18  ;;  %v8497_v38 = vpack.c.bf16 %v1902_v0, %v1895_v31  ;;  %v1909_v8 = vand.u32 4294901760, %v1908_v24  ;;  %v1916_v18 = vand.u32 4294901760, %v1915_v59  ;;  %v1922_v0 = vsub.f32 %v8360_v42, %v10070_v39 }
 0x31a   :  { %v1929_v31 = vsub.f32 %v8362_v48, %v10071_v11  ;;  %v1551_v11 = vsel %vm121_vm3, 0.0, %v8433_v30  ;;  %v1536_v39 = vsel %vm7867_vm4, 0.0, %v8412_v56 }
 0x31b   :  { %10152 = vst [vmem:[#allocation22_spill] sm:$0xff] %v8497_v38  ;;  %v8507_v46 = vpack.c.bf16 %v1916_v18, %v1909_v8  ;;  %v1923_v50 = vand.u32 4294901760, %v1922_v0  ;;  %v1549_v0 = vsel %vm119_vm2, 0.0, %v8416_v6 }
 0x31c   :  { %v1930_v38 = vand.u32 4294901760, %v1929_v31  ;;  %v1610_v31 = vsel %vm844_vm10, %v8420_v47, 0 }
 0x31e   :  { %v8515_v17 = vpack.c.bf16 %v1930_v38, %v1923_v50  ;;  %v1607_v50 = vsel %vm844_vm10, %v1549_v0, 0  ;;  %v8552_v38 = vand.u32 4294901760, %v1610_v31  ;;  %v1613_v0 = vsel %vm844_vm10, %v1551_v11, 0 }
 0x31f   :  { %v8545_v18 = vand.u32 4294901760, %v1607_v50  ;;  %v8571_v21 = vand.u32 4294901760, %v1613_v0 }
 0x320   :  { %v8569_v23 = vsub.f32 %v1610_v31, %v8552_v38 }
 0x321   :  { %v8558_v6 = vsub.f32 %v1607_v50, %v8545_v18  ;;  %v8590_v42 = vsub.f32 %v1613_v0, %v8571_v21  ;;  %v10154_v0 = vmov 0.0|0.0  }
 0x323   :  { %10153 = vst [vmem:[#allocation23_spill] sm:$0xff] %v8558_v6  ;;  %v1720_v11 = vand.u32 4294901760, %v8558_v6 }
 0x325   :  { %v1721_v62 = vsub.f32 %v8558_v6, %v1720_v11 }
 0x371   :  { %v1559_v5 = vpop.permute.xlu1 %1558  ;;  %v1557_v8 = vpop.permute.xlu0 %1556 }
 0x372   :  { %v1569_v47 = vsel %vm844_vm10, %v8386_v4, %v1559_v5  ;;  %v1568_v59 = vsel %vm844_vm10, %v1536_v39, %v1557_v8  ;;  %v1538_v5 = vsel %vm7882_vm8, 0.0, %v8428_v54  ;;  %vm5436_vm8 = vcmask 254976  }
 0x373   :  { %v8564_v24 = vand.u32 4294901760, %v1569_v47  ;;  %v8566_v30 = vand.u32 4294901760, %v1568_v59 }
 0x375   :  { %v8574_v51 = vsub.f32 %v1569_v47, %v8564_v24  ;;  %v8577_v56 = vsub.f32 %v1568_v59, %v8566_v30  ;;  %v1735_v59 = vand.u32 4294901760, %v8569_v23 }
 0x377   :  { %v1711_v4 = vand.u32 4294901760, %v8577_v56  ;;  %v1563_v39 = vpop.permute.xlu1 %1562  ;;  %v1561_v8 = vpop.permute.xlu0 %1560  ;;  %v1726_v50 = vand.u32 4294901760, %v8574_v51  ;;  %v1736_v6 = vsub.f32 %v8569_v23, %v1735_v59 }
 0x378   :  { %v1571_v31 = vsel %vm844_vm10, %v8424_v10, %v1563_v39  ;;  %v1570_v47 = vsel %vm844_vm10, %v1538_v5, %v1561_v8  ;;  %v1722_v8 = vand.u32 4294901760, %v1721_v62  ;;  %v10169_v62 = vpack.c.bf16 %v8231_v41, %v8220_v36 }
 0x379   :  { %v1712_v48 = vsub.f32 %v8577_v56, %v1711_v4  ;;  %v8593_v3 = vand.u32 4294901760, %v1571_v31  ;;  %v8595_v22 = vand.u32 4294901760, %v1570_v47  ;;  %2221 = vmatmul.mubr.f32.vlgmr.msra.gmra.mrb[4].mxu0 %v1711_v4  ;;  %v1727_v5 = vsub.f32 %v8574_v51, %v1726_v50 }
 0x37a   :  { %7073 = vmatpush1.bf16.msra.mxu0 %v8150_v35  ;;  %2228 = vmatprep.mubr.f32.mxu0 %v1720_v11  ;;  %v1750_v35 = vand.u32 4294901760, %v8590_v42 }
 0x37b   :  { %v8600_v10 = vsub.f32 %v1571_v31, %v8593_v3  ;;  %v8603_v54 = vsub.f32 %v1570_v47, %v8595_v22  ;;  %7074 = vmatprep.subr.bf16.mxu0 %v10154_v0  ;;  %v1713_v39 = vand.u32 4294901760, %v1712_v48  ;;  %v1728_v11 = vand.u32 4294901760, %v1727_v5 }
 0x37c   :  { %v1751_v47 = vsub.f32 %v8590_v42, %v1750_v35  ;;  %v10171_v5 = vpack.c.bf16 %v8251_v7, %v8246_v2 }
 0x37d   :  { %1714 = vmatmul.mubr.f32.vlgmr.msra.gmra.mrb[2].mxu1 %v1713_v39  ;;  %2232 = vmatmul.mubr.f32.gmra.mrb[6].mxu0 %v1726_v50  ;;  %v1741_v4 = vand.u32 4294901760, %v8603_v54  ;;  %v1756_v31 = vand.u32 4294901760, %v8600_v10  ;;  %v1737_v50 = vand.u32 4294901760, %v1736_v6  ;;  %v10168_v6 = vpack.c.bf16 %v8217_v34, %v8205_v26 }
 0x37e   :  { %6929 = vmatpush1.bf16.msra.mxu1 %v8366_v19  ;;  %7076 = vmatpush1.bf16.msra.mxu0 %v8173_v55  ;;  %v10170_v39 = vpack.c.bf16 %v8244_v1, %v8234_v58 }
 0x37f   :  { %1723 = vmatprep.mubr.f32.mxu1 %v1722_v8  ;;  %2239 = vmatprep.mubr.f32.mxu0 %v1735_v59  ;;  %v1742_v48 = vsub.f32 %v8603_v54, %v1741_v4  ;;  %v1757_v19 = vsub.f32 %v8600_v10, %v1756_v31  ;;  %v1752_v59 = vand.u32 4294901760, %v1751_v47  ;;  %v10172_v8 = vpack.c.bf16 %v8259_v29, %v8253_v9 }
 0x380   :  { %6930 = vmatprep.subr.bf16.mxu1 %v10154_v0  ;;  %7077 = vmatprep.subr.bf16.mxu0 %v10154_v0 }
 0x381   :  { %1729 = vmatmul.mubr.f32.gmra.mrb[4].mxu1 %v1728_v11  ;;  %2243 = vmatmul.mubr.f32.gmra.mrb[8].mxu0 %v1741_v4  ;;  %v1743_v55 = vand.u32 4294901760, %v1742_v48  ;;  %v10173_v4 = vpack.c.bf16 %v8265_v53, %v8261_v37  ;;  %v10175_v11 = vld [vmem:[#allocation9_spill] sm:$0xff] }
 0x382   :  { %6932 = vmatpush1.bf16.msra.mxu1 %v8377_v63  ;;  %7079 = vmatpush1.bf16.msra.mxu0 %v8214_v32  ;;  %v1758_v32 = vand.u32 4294901760, %v1757_v19  ;;  %v10160_v63 = vld [vmem:[#allocation13_spill] sm:$0xff]  ;;  %v10181_v19 = vand.u32 4294901760, %v8154_v44 }
 0x383   :  { %1738 = vmatprep.mubr.f32.mxu1 %v1737_v50  ;;  %2250 = vmatprep.mubr.f32.mxu0 %v1750_v35  ;;  %v10174_v35 = vld [vmem:[#allocation10_spill] sm:$0xff]  ;;  %v10178_v50 = vld [vmem:[#allocation17_spill] sm:$0xff] }
 0x384   :  { %6933 = vmatprep.subr.bf16.mxu1 %v10154_v0  ;;  %7080 = vmatprep.subr.bf16.mxu0 %v10154_v0  ;;  %v10176_v48 = vpack.c.bf16 %v10174_v35, %v10175_v11 }
 0x385   :  { %1744 = vmatmul.mubr.f32.gmra.mrb[6].mxu1 %v1743_v55  ;;  %2254 = vmatmul.mubr.f32.gmra.mrb[10].mxu0 %v1756_v31  ;;  %v10177_v31 = vld [vmem:[#allocation18_spill] sm:$0xff]  ;;  %v10180_v55 = vand.u32 4294901760, %v8152_v43 }
 0x386   :  { %6935 = vmatpush1.bf16.msra.mxu1 %v8401_v25  ;;  %7082 = vmatpush1.bf16.msra.mxu0 %v8257_v20  ;;  %v10155_v20 = vld [vmem:[#allocation20_spill] sm:$0xff]  ;;  %v10161_v25 = vld [vmem:[#allocation15_spill] sm:$0xff]  ;;  %v10179_v47 = vpack.c.bf16 %v10177_v31, %v10178_v50 }
 0x387   :  { %1753 = vmatprep.mubr.f32.mxu1 %v1752_v59  ;;  %2513 = vmatprep.mubr.f32.mxu0 %v8394_v52  ;;  %v7036_v59 = vpack.c.bf16 %v10181_v19, %v10180_v55 }
 0x388   :  { %6936 = vmatprep.subr.bf16.mxu1 %v10154_v0  ;;  %7083 = vmatprep.subr.bf16.mxu0 %v10154_v0 }
 0x389   :  { %1759 = vmatmul.mubr.f32.gmra.mrb[8].mxu1 %v1758_v32  ;;  %v10182_v32 = vld [vmem:[#allocation23_spill] sm:$0xff] }
 0x38a   :  { %6938 = vmatpush1.bf16.msra.mxu1 %v8437_v49  ;;  %7085 = vmatpush1.bf16.msra.mxu0 %v8273_v13  ;;  %v10156_v13 = vld [vmem:[#allocation11_spill] sm:$0xff]  ;;  %v10164_v49 = vpack.c.bf16 %v8186_v12, %v8177_v61 }
 0x38b   :  { %1949 = vmatprep.mubr.f32.mxu1 %v8394_v52  ;;  %6939 = vmatprep.subr.bf16.mxu1 %v10154_v0 }
 0x38c   :  { %7086 = vmatprep.subr.bf16.mxu0 %v10154_v0 }
 0x38e   :  { %6941 = vmatpush1.bf16.msra.mxu1 %v8455_v45  ;;  %7088 = vmatpush1.bf16.msra.mxu0 %v8279_v14  ;;  %v10157_v14 = vld [vmem:[#allocation21_spill] sm:$0xff]  ;;  %v10162_v45 = vpack.c.bf16 %v8154_v44, %v8152_v43  ;;  %v10185_v43 = vand.u32 4294901760, %v8177_v61  ;;  %v10186_v44 = vand.u32 4294901760, %v8186_v12  ;;  %v10190_v61 = vand.u32 4294901760, %v8217_v34 }
 0x38f   :  { %6942 = vmatprep.subr.bf16.mxu1 %v10154_v0  ;;  %7089 = vmatprep.subr.bf16.mxu0 %v10154_v0  ;;  %v10196_v34 = vand.u32 4294901760, %v8251_v7  ;;  %v10202_v7 = vand.u32 4294901760, %v10174_v35 }
 0x392   :  { %6944 = vmatpush1.bf16.msra.mxu1 %v8463_v60  ;;  %7091 = vmatpush1.bf16.msra.mxu0 %v8285_v15  ;;  %v10158_v15 = vld [vmem:[#allocation12_spill] sm:$0xff]  ;;  %v10165_v60 = vmov 0.0  }
 0x393   :  { %6945 = vmatprep.subr.bf16.mxu1 %v10154_v0  ;;  %7092 = vmatprep.subr.bf16.mxu0 %v10154_v0 }
 0x396   :  { %6947 = vmatpush1.bf16.msra.mxu1 %v8473_v33  ;;  %7094 = vmatpush1.bf16.msra.mxu0 %v8291_v16  ;;  %v10159_v16 = vld [vmem:[#allocation22_spill] sm:$0xff]  ;;  %v10166_v33 = vpack.c.bf16 %v8202_v27, %v8200_v28 }
 0x397   :  { %6948 = vmatprep.subr.bf16.mxu1 %v10154_v0  ;;  %7095 = vmatprep.subr.bf16.mxu0 %v10154_v0 }
 0x39a   :  { %6950 = vmatpush1.bf16.msra.mxu1 %v10155_v20  ;;  %7097 = vmatpush1.bf16.msra.mxu0 %v10156_v13  ;;  %v10183_v20 = vand.u32 4294901760, %v8156_v40  ;;  %v10184_v13 = vand.u32 4294901760, %v8175_v57 }
 0x39b   :  { %6951 = vmatprep.subr.bf16.mxu1 %v10154_v0  ;;  %7098 = vmatprep.subr.bf16.mxu0 %v10154_v0 }
 0x39e   :  { %6953 = vmatpush1.bf16.msra.mxu1 %v10157_v14  ;;  %7100 = vmatpush1.bf16.msra.mxu0 %v10158_v15  ;;  %v7039_v14 = vpack.c.bf16 %v10184_v13, %v10183_v20 }
 0x39f   :  { %6954 = vmatprep.subr.bf16.mxu1 %v10154_v0  ;;  %7101 = vmatprep.subr.bf16.mxu0 %v10154_v0 }
 0x3a2   :  { %6956 = vmatpush1.bf16.msra.mxu1 %v10159_v16  ;;  %7103 = vmatpush1.bf16.msra.mxu0 %v10160_v63 }
 0x3a3   :  { %6957 = vmatprep.subr.bf16.mxu1 %v10154_v0  ;;  %7104 = vmatprep.subr.bf16.mxu0 %v10154_v0 }
 0x3a6   :  { %6959 = vmatpush1.bf16.msra.mxu1 %v8507_v46  ;;  %7106 = vmatpush1.bf16.msra.mxu0 %v10161_v25  ;;  %v10167_v46 = vld [vmem:[#allocation19_spill] sm:$0xff] }
 0x3a7   :  { %6960 = vmatprep.subr.bf16.mxu1 %v10154_v0  ;;  %7131 = vmatprep.subr.bf16.mxu0 %v10154_v0 }
 0x3a9   :  { %2515 = vmatmul.mubr.f32.vlgmr.msra.gmra.mrb[12].mxu0 %v8566_v30 }
 0x3aa   :  { %6962 = vmatpush1.bf16.msra.mxu1 %v8515_v17  ;;  %2520 = vmatprep.mubr.f32.mxu0 %v8545_v18  ;;  %v10163_v17 = vpack.c.bf16 %v8175_v57, %v8156_v40  ;;  %v10187_v40 = vand.u32 4294901760, %v8200_v28  ;;  %v10188_v57 = vand.u32 4294901760, %v8202_v27  ;;  %v10191_v28 = vand.u32 4294901760, %v8220_v36 }
 0x3ab   :  { %6963 = vmatprep.subr.bf16.mxu1 %v10154_v0  ;;  %v10192_v27 = vand.u32 4294901760, %v8231_v41  ;;  %v10197_v36 = vand.u32 4294901760, %v8253_v9  ;;  %v10198_v41 = vand.u32 4294901760, %v8259_v29  ;;  %v10203_v9 = vand.u32 4294901760, %v10178_v50 }
 0x3ac   :  { %v10204_v29 = vand.u32 4294901760, %v10177_v31 }
 0x3ad   :  { %1951 = vmatmul.mubr.f32.vlgmr.msra.gmra.mrb[10].mxu1 %v8566_v30  ;;  %2522 = vmatmul.mubr.f32.gmra.mrb[14].mxu0 %v8564_v24  ;;  %v7060_v16 = vpack.c.bf16 %v10198_v41, %v10197_v36 }
 0x3ae   :  { %1956 = vmatprep.mubr.f32.mxu1 %v8545_v18  ;;  %6965 = vmatpush1.bf16.msra.mxu1 %v10162_v45  ;;  %v7069_v45 = vpack.c.bf16 %v10204_v29, %v10203_v9 }
 0x3af   :  { %2527 = vmatprep.mubr.f32.mxu0 %v8552_v38  ;;  %6966 = vmatprep.subr.bf16.mxu1 %v10154_v0 }
 0x3b1   :  { %1958 = vmatmul.mubr.f32.gmra.mrb[12].mxu1 %v8564_v24  ;;  %2529 = vmatmul.mubr.f32.gmra.mrb[16].mxu0 %v8595_v22 }
 0x3b2   :  { %1963 = vmatprep.mubr.f32.mxu1 %v8552_v38  ;;  %6968 = vmatpush1.bf16.msra.mxu1 %v10163_v17 }
 0x3b3   :  { %2534 = vmatprep.mubr.f32.mxu0 %v8571_v21  ;;  %6969 = vmatprep.subr.bf16.mxu1 %v10154_v0 }
 0x3b5   :  { %1965 = vmatmul.mubr.f32.gmra.mrb[14].mxu1 %v8595_v22  ;;  %2536 = vmatmul.mubr.f32.gmra.mrb[18].mxu0 %v8593_v3 }
 0x3b6   :  { %1970 = vmatprep.mubr.f32.mxu1 %v8571_v21  ;;  %6971 = vmatpush1.bf16.msra.mxu1 %v10164_v49 }
 0x3b7   :  { %6972 = vmatprep.subr.bf16.mxu1 %v10154_v0  ;;  %6197 = vmatprep.mubr.msk.f32.mxu0 %vm7696_vm9, %v10165_v60 }
 0x3b9   :  { %1972 = vmatmul.mubr.f32.gmra.mrb[16].mxu1 %v8593_v3 }
 0x3ba   :  { %6974 = vmatpush1.bf16.msra.mxu1 %v10166_v33  ;;  %2091 = vmatprep.mubr.f32.mxu1 %v10167_v46 }
 0x3bb   :  { %6975 = vmatprep.subr.bf16.mxu1 %v10154_v0 }
 0x3be   :  { %6977 = vmatpush1.bf16.msra.mxu1 %v10168_v6 }
 0x3bf   :  { %6978 = vmatprep.subr.bf16.mxu1 %v10154_v0 }
 0x3c2   :  { %6980 = vmatpush1.bf16.msra.mxu1 %v10169_v62 }
 0x3c3   :  { %6981 = vmatprep.subr.bf16.mxu1 %v10154_v0 }
 0x3c6   :  { %6983 = vmatpush1.bf16.msra.mxu1 %v10170_v39 }
 0x3c7   :  { %6984 = vmatprep.subr.bf16.mxu1 %v10154_v0 }
 0x3ca   :  { %6986 = vmatpush1.bf16.msra.mxu1 %v10171_v5 }
 0x3cb   :  { %6987 = vmatprep.subr.bf16.mxu1 %v10154_v0 }
 0x3ce   :  { %6989 = vmatpush1.bf16.msra.mxu1 %v10172_v8 }
 0x3cf   :  { %6990 = vmatprep.subr.bf16.mxu1 %v10154_v0 }
 0x3d2   :  { %6992 = vmatpush1.bf16.msra.mxu1 %v10173_v4 }
 0x3d3   :  { %6993 = vmatprep.subr.bf16.mxu1 %v10154_v0 }
 0x3d6   :  { %6995 = vmatpush1.bf16.msra.mxu1 %v10176_v48 }
 0x3d7   :  { %6996 = vmatprep.subr.bf16.mxu1 %v10154_v0 }
 0x3da   :  { %6998 = vmatpush1.bf16.msra.mxu1 %v10179_v47 }
 0x3db   :  { %7035 = vmatprep.subr.bf16.mxu1 %v10154_v0 }
 0x3dd   :  { %2094 = vmatmul.mubr.f32.vlgmr.msra.gmra.mrb[18].mxu1 %v8577_v56  ;;  %v7042_v56 = vpack.c.bf16 %v10186_v44, %v10185_v43 }
 0x3de   :  { %2100 = vmatprep.mubr.f32.mxu1 %v10182_v32  ;;  %7037 = vmatpush1.bf16.msra.mxu1 %v7036_v59 }
 0x3df   :  { %7038 = vmatprep.subr.bf16.mxu1 %v10154_v0 }
 0x3e1   :  { %2103 = vmatmul.mubr.f32.gmra.mrb[20].mxu1 %v8574_v51  ;;  %v7045_v51 = vpack.c.bf16 %v10188_v57, %v10187_v40 }
 0x3e2   :  { %2109 = vmatprep.mubr.f32.mxu1 %v8569_v23  ;;  %7040 = vmatpush1.bf16.msra.mxu1 %v7039_v14  ;;  %v10189_v23 = vand.u32 4294901760, %v8205_v26  ;;  %v10195_v26 = vand.u32 4294901760, %v8246_v2  ;;  %v10201_v2 = vand.u32 4294901760, %v10175_v11 }
 0x3e3   :  { %7041 = vmatprep.subr.bf16.mxu1 %v10154_v0 }
 0x3e4   :  { %v7048_v12 = vpack.c.bf16 %v10190_v61, %v10189_v23  ;;  %v7057_v15 = vpack.c.bf16 %v10196_v34, %v10195_v26  ;;  %v7066_v25 = vpack.c.bf16 %v10202_v7, %v10201_v2 }
 0x3e5   :  { %2112 = vmatmul.mubr.f32.gmra.mrb[22].mxu1 %v8603_v54 }
 0x3e6   :  { %2118 = vmatprep.mubr.f32.mxu1 %v8590_v42  ;;  %7043 = vmatpush1.bf16.msra.mxu1 %v7042_v56  ;;  %v7051_v42 = vpack.c.bf16 %v10192_v27, %v10191_v28 }
 0x3e7   :  { %7044 = vmatprep.subr.bf16.mxu1 %v10154_v0 }
 0x3e9   :  { %2121 = vmatmul.mubr.f32.gmra.mrb[24].mxu1 %v8600_v10  ;;  %v10193_v10 = vand.u32 4294901760, %v8234_v58  ;;  %v10199_v58 = vand.u32 4294901760, %v8261_v37 }
 0x3ea   :  { %7046 = vmatpush1.bf16.msra.mxu1 %v7045_v51  ;;  %2396 = vmatprep.mubr.f32.mxu1 %v8394_v52  ;;  %v10194_v52 = vand.u32 4294901760, %v8244_v1  ;;  %v10200_v1 = vand.u32 4294901760, %v8265_v53 }
 0x3eb   :  { %7047 = vmatprep.subr.bf16.mxu1 %v10154_v0 }
 0x3ec   :  { %v7054_v54 = vpack.c.bf16 %v10194_v52, %v10193_v10  ;;  %v7063_v63 = vpack.c.bf16 %v10200_v1, %v10199_v58 }
 0x3ee   :  { %7049 = vmatpush1.bf16.msra.mxu1 %v7048_v12 }
 0x3ef   :  { %7050 = vmatprep.subr.bf16.mxu1 %v10154_v0 }
 0x3f2   :  { %7052 = vmatpush1.bf16.msra.mxu1 %v7051_v42 }
 0x3f3   :  { %7053 = vmatprep.subr.bf16.mxu1 %v10154_v0 }
 0x3f6   :  { %7055 = vmatpush1.bf16.msra.mxu1 %v7054_v54 }
 0x3f7   :  { %7056 = vmatprep.subr.bf16.mxu1 %v10154_v0 }
 0x3fa   :  { %7058 = vmatpush1.bf16.msra.mxu1 %v7057_v15 }
 0x3fb   :  { %7059 = vmatprep.subr.bf16.mxu1 %v10154_v0 }
 0x3fe   :  { %7061 = vmatpush1.bf16.msra.mxu1 %v7060_v16 }
 0x3ff   :  { %7062 = vmatprep.subr.bf16.mxu1 %v10154_v0 }
 0x402   :  { %7064 = vmatpush1.bf16.msra.mxu1 %v7063_v63 }
 0x403   :  { %7065 = vmatprep.subr.bf16.mxu1 %v10154_v0 }
 0x406   :  { %7067 = vmatpush1.bf16.msra.mxu1 %v7066_v25 }
 0x407   :  { %7068 = vmatprep.subr.bf16.mxu1 %v10154_v0 }
 0x40a   :  { %7070 = vmatpush1.bf16.msra.mxu1 %v7069_v45 }
 0x40d   :  { %2398 = vmatmul.mubr.f32.vlgmr.msra.gmra.mrb[26].mxu1 %v8566_v30 }
 0x40e   :  { %2403 = vmatprep.mubr.f32.mxu1 %v8545_v18 }
 0x411   :  { %2405 = vmatmul.mubr.f32.gmra.mrb[28].mxu1 %v8564_v24 }
 0x412   :  { %2410 = vmatprep.mubr.f32.mxu1 %v8552_v38 }
 0x415   :  { %2412 = vmatmul.mubr.f32.gmra.mrb[30].mxu1 %v8595_v22 }
 0x416   :  { %2417 = vmatprep.mubr.f32.mxu1 %v8571_v21  ;;  %v5454_v21 = vld [vmem:[%s10016_s7] ss:$0 sm:$0xff] }
 0x419   :  { %2419 = vmatmul.mubr.f32.gmra.mrb[32].mxu1 %v8593_v3 }
 0x44c   :  { %v2222_v37 = vpop.f32.mrb[4].mxu0 }
 0x44d   :  { %v2224_v53 = vpop.f32.mrb[5].mxu0 }
 0x450   :  { %v1715_v17 = vpop.f32.mrb[2].mxu1  ;;  %v2233_v49 = vpop.f32.mrb[6].mxu0 }
 0x451   :  { %v1717_v33 = vpop.f32.mrb[3].mxu1  ;;  %v2235_v46 = vpop.f32.mrb[7].mxu0  ;;  %v1716_v35 = vadd.f32 %v5454_v21, %v1715_v17 }
 0x454   :  { %v1730_v6 = vpop.f32.mrb[4].mxu1  ;;  %v2244_v30 = vpop.f32.mrb[8].mxu0 }
 0x455   :  { %v1732_v62 = vpop.f32.mrb[5].mxu1  ;;  %v2246_v18 = vpop.f32.mrb[9].mxu0  ;;  %v1731_v55 = vadd.f32 %v5454_v21, %v1730_v6 }
 0x458   :  { %v1745_v39 = vpop.f32.mrb[6].mxu1  ;;  %v2255_v24 = vpop.f32.mrb[10].mxu0 }
 0x459   :  { %v1747_v5 = vpop.f32.mrb[7].mxu1  ;;  %v2257_v38 = vpop.f32.mrb[11].mxu0  ;;  %v1746_v14 = vadd.f32 %v5454_v21, %v1745_v39 }
 0x45c   :  { %v1760_v8 = vpop.f32.mrb[8].mxu1 }
 0x45d   :  { %v1762_v22 = vpop.f32.mrb[9].mxu1  ;;  %v1761_v51 = vadd.f32 %v5454_v21, %v1760_v8  ;;  %v7667_v21 = vld [vmem:[%s10129_s26 + $0x10] sm:$0xff] }
 0x47c   :  { %v2516_v3 = vpop.f32.mrb[12].mxu0 }
 0x47d   :  { %v2518_v4 = vpop.f32.mrb[13].mxu0 }
 0x480   :  { %v1952_v11 = vpop.f32.mrb[10].mxu1  ;;  %v2523_v48 = vpop.f32.mrb[14].mxu0 }
 0x481   :  { %v1953_v31 = vadd.f32 %v1952_v11, %v1716_v35  ;;  %v1954_v50 = vpop.f32.mrb[11].mxu1  ;;  %v2525_v47 = vpop.f32.mrb[15].mxu0  ;;  %v10205_v11 = vld [vmem:[#allocation5_spill] sm:$0xff] }
 0x482   :  { %vm2565_vm14 = vcmp.lt.s32.totalorder %v10205_v11, 6  ;;  %vm2574_vm15 = vcmp.lt.s32.totalorder %v10205_v11, 4 }
 0x484   :  { %v1959_v19 = vpop.f32.mrb[12].mxu1  ;;  %v2530_v59 = vpop.f32.mrb[16].mxu0 }
 0x485   :  { %v1960_v32 = vadd.f32 %v1959_v19, %v1731_v55  ;;  %v1961_v20 = vpop.f32.mrb[13].mxu1  ;;  %v2532_v13 = vpop.f32.mrb[17].mxu0  ;;  %v7668_v19 = vld [vmem:[%s10129_s26 + $0x18] sm:$0xff] }
 0x488   :  { %v1966_v43 = vpop.f32.mrb[14].mxu1  ;;  %v2537_v44 = vpop.f32.mrb[18].mxu0 }
 0x489   :  { %v1967_v56 = vadd.f32 %v1966_v43, %v1746_v14  ;;  %v1968_v40 = vpop.f32.mrb[15].mxu1  ;;  %v2539_v57 = vpop.f32.mrb[19].mxu0  ;;  %v2619_v14 = vld [vmem:[%s10017_s8] sm:$0xff]  ;;  %v2620_v43 = vld [vmem:[%s10017_s8 + $0x8] sm:$0xff] }
 0x48a   :  { %v2645_v40 = vand.u32 4294901760, %v2620_v43 }
 0x48c   :  { %v1973_v23 = vpop.f32.mrb[16].mxu1 }
 0x48d   :  { %v1974_v61 = vadd.f32 %v1973_v23, %v1761_v51  ;;  %v1975_v12 = vpop.f32.mrb[17].mxu1 }
 0x4b0   :  { %v2095_v28 = vpop.f32.mrb[18].mxu1 }
 0x4b1   :  { %v2096_v27 = vadd.f32 %v2095_v28, %v1953_v31  ;;  %v2097_v42 = vpop.f32.mrb[19].mxu1 }
 0x4b3   :  { %v2223_v10 = vadd.f32 %v2222_v37, %v2096_v27  ;;  %v7665_v37 = vld [vmem:[%s10129_s26] sm:$0xff] }
 0x4b4   :  { %v2104_v52 = vpop.f32.mrb[20].mxu1 }
 0x4b5   :  { %v2105_v54 = vadd.f32 %v2104_v52, %v1960_v32  ;;  %v2106_v26 = vpop.f32.mrb[21].mxu1 }
 0x4b7   :  { %v2234_v34 = vadd.f32 %v2233_v49, %v2105_v54 }
 0x4b8   :  { %v2113_v15 = vpop.f32.mrb[22].mxu1 }
 0x4b9   :  { %v2114_v36 = vadd.f32 %v2113_v15, %v1967_v56  ;;  %v2115_v41 = vpop.f32.mrb[23].mxu1  ;;  %v2642_v56 = vand.u32 4294901760, %v2619_v14 }
 0x4ba   :  { %v2621_v41 = vld [vmem:[%s10017_s8 + $0x10] sm:$0xff] }
 0x4bb   :  { %v2245_v16 = vadd.f32 %v2244_v30, %v2114_v36  ;;  %v7666_v30 = vld [vmem:[%s10129_s26 + $0x8] sm:$0xff]  ;;  %v8837_v12 = vpack.c.bf16 %v2645_v40, %v2642_v56 }
 0x4bc   :  { %v2122_v58 = vpop.f32.mrb[24].mxu1 }
 0x4bd   :  { %v2123_v1 = vadd.f32 %v2122_v58, %v1974_v61  ;;  %v2124_v63 = vpop.f32.mrb[25].mxu1  ;;  %7108 = vmatprep.subr.bf16.mxu1 %v8837_v12  ;;  %v2751_v58 = vsub.f32 %v2619_v14, %v2642_v56 }
 0x4be   :  { %7110 = vmatpush3.bf16.msra.mxu1 %v8837_v12 }
 0x4bf   :  { %v2256_v2 = vadd.f32 %v2255_v24, %v2123_v1  ;;  %v2758_v1 = vsub.f32 %v2620_v43, %v2645_v40 }
 0x4e0   :  { %v2399_v7 = vpop.f32.mrb[26].mxu1 }
 0x4e1   :  { %v2400_v25 = vadd.f32 %v2399_v7, %v2223_v10  ;;  %v2401_v9 = vpop.f32.mrb[27].mxu1 }
 0x4e2   :  { %v2759_v9 = vand.u32 4294901760, %v2758_v1 }
 0x4e3   :  { %v2517_v29 = vadd.f32 %v2516_v3, %v2400_v25  ;;  %v2752_v25 = vand.u32 4294901760, %v2751_v58 }
 0x4e4   :  { %v2406_v45 = vpop.f32.mrb[28].mxu1 }
 0x4e5   :  { %v2541_v53 = vadd.f32 %v7665_v37, %v2517_v29  ;;  %v2407_v17 = vadd.f32 %v2406_v45, %v2234_v34  ;;  %v2408_v49 = vpop.f32.mrb[29].mxu1  ;;  %v2753_v29 = vsub.f32 %v2751_v58, %v2752_v25  ;;  %v2760_v45 = vsub.f32 %v2758_v1, %v2759_v9 }
 0x4e7   :  { %v2524_v33 = vadd.f32 %v2523_v48, %v2407_v17  ;;  %v2545_v6 = vmax.f32 %v2541_v53, 0.0  ;;  %v2754_v17 = vand.u32 4294901760, %v2753_v29  ;;  %v2761_v49 = vand.u32 4294901760, %v2760_v45 }
 0x4e8   :  { %v2413_v46 = vpop.f32.mrb[30].mxu1 }
 0x4e9   :  { %v2542_v62 = vadd.f32 %v7666_v30, %v2524_v33  ;;  %v2414_v18 = vadd.f32 %v2413_v46, %v2245_v16  ;;  %v2415_v39 = vpop.f32.mrb[31].mxu1  ;;  %v2549_v8 = vrot.slane %v2545_v6, 1  ;;  %v8859_v16 = vand.u32 4294901760, %v2621_v41 }
 0x4ea   :  { %v7111_v33 = vpack.c.bf16 %v2761_v49, %v2754_v17  ;;  %v8879_v30 = vpack.c.bf16 %v2759_v9, %v2752_v25  ;;  %v3312_v25 = vld [vmem:[%s10021_s12 + $0x10] sm:$0xff]  ;;  %v3313_v9 = vld [vmem:[%s10021_s12 + $0x18] sm:$0xff]  ;;  %v3315_v17 = vld [vmem:[%s10021_s12 + $0x28] sm:$0xff] }
 0x4eb   :  { %v2546_v24 = vmax.f32 %v2542_v62, 0.0  ;;  %v2531_v5 = vadd.f32 %v2530_v59, %v2414_v18  ;;  %6097 = vmatprep.subr.mxu1 %v8859_v16  ;;  %v3374_v29 = vand.u32 4294901760, %v3312_v25  ;;  %v3377_v45 = vand.u32 4294901760, %v3313_v9 }
 0x4ec   :  { %v2420_v38 = vpop.f32.mrb[32].mxu1  ;;  %6098 = vmatpush3.msra.mxu1 %v8859_v16 }
 0x4ed   :  { %v2550_v22 = vrot.slane %v2546_v24, 1  ;;  %v2543_v3 = vadd.f32 %v7667_v21, %v2531_v5  ;;  %v2421_v4 = vadd.f32 %v2420_v38, %v2256_v2  ;;  %v2422_v35 = vpop.f32.mrb[33].mxu1  ;;  %7112 = vmatprep.subr.bf16.mxu1 %v7111_v33 }
 0x4ef   :  { %v2555_v48 = vsel %vm151_vm0, %v2549_v8, %v2550_v22  ;;  %v2547_v31 = vmax.f32 %v2543_v3, 0.0  ;;  %v2538_v50 = vadd.f32 %v2537_v44, %v2421_v4 }
 0x4f0   :  { %v8815_v47 = vmax.f32 %v2545_v6, %v2555_v48  ;;  %v7115_v6 = vpack.c.bf16 %v2758_v1, %v2751_v58 }
 0x4f1   :  { %v2551_v55 = vrot.slane %v2547_v31, 1  ;;  %v2544_v59 = vadd.f32 %v7668_v19, %v2538_v50 }
 0x4f2   :  { %v2561_v57 = vrot.slane %v8815_v47, 2  ;;  %v2570_v54 = vrot.slane %v8815_v47, 4 }
 0x4f3   :  { %v2554_v32 = vsel %vm151_vm0, %v2550_v22, %v2551_v55  ;;  %v2548_v20 = vmax.f32 %v2544_v59, 0.0  ;;  %v2765_v22 = vsub.f32 %v2621_v41, %v8859_v16 }
 0x4f4   :  { %v8822_v13 = vmax.f32 %v2546_v24, %v2554_v32 }
 0x4f5   :  { %v2552_v44 = vrot.slane %v2548_v20, 1 }
 0x4f6   :  { %v2562_v51 = vrot.slane %v8822_v13, 2  ;;  %v2571_v10 = vrot.slane %v8822_v13, 4 }
 0x4f7   :  { %v2553_v23 = vsel %vm151_vm0, %v2551_v55, %v2552_v44  ;;  %v2556_v61 = vsel %vm151_vm0, %v2552_v44, %v2549_v8  ;;  %v2766_v55 = vand.u32 4294901760, %v2765_v22 }
 0x4f8   :  { %v8839_v28 = vmax.f32 %v2548_v20, %v2556_v61  ;;  %v2568_v27 = vsel %vm2565_vm14, %v2561_v57, %v2562_v51  ;;  %v2559_v42 = vmax.f32 %v2547_v31, %v2553_v23  ;;  %v2577_v34 = vsel %vm2574_vm15, %v2570_v54, %v2571_v10 }
 0x4f9   :  { %2583 = vrot.lane.b32.xlu0 %v2568_v27, %s7693_s19 }
 0x4fa   :  { %v2563_v52 = vrot.slane %v2559_v42, 2  ;;  %v2572_v15 = vrot.slane %v2559_v42, 4  ;;  %v2564_v36 = vrot.slane %v8839_v28, 2  ;;  %v2573_v63 = vrot.slane %v8839_v28, 4 }
 0x4fc   :  { %v2567_v26 = vsel %vm2565_vm14, %v2562_v51, %v2563_v52  ;;  %v2576_v2 = vsel %vm2574_vm15, %v2571_v10, %v2572_v15  ;;  %v2566_v7 = vsel %vm2565_vm14, %v2563_v52, %v2564_v36  ;;  %v2569_v37 = vsel %vm2565_vm14, %v2564_v36, %v2561_v57 }
 0x4fd   :  { %2585 = vrot.lane.b32.xlu1 %v2567_v26, %s7693_s19  ;;  %2599 = vrot.lane.b32.xlu0 %v2577_v34, %s7694_s24  ;;  %v2575_v53 = vsel %vm2574_vm15, %v2572_v15, %v2573_v63  ;;  %v2578_v46 = vsel %vm2574_vm15, %v2573_v63, %v2570_v54  ;;  %v2767_v57 = vsub.f32 %v2765_v22, %v2766_v55  ;;  %v3311_v63 = vld [vmem:[%s10021_s12 + $0x8] sm:$0xff] }
 0x4ff   :  { %v2768_v34 = vand.u32 4294901760, %v2767_v57 }
 0x501   :  { %2601 = vrot.lane.b32.xlu1 %v2576_v2, %s7694_s24  ;;  %2587 = vrot.lane.b32.xlu0 %v2566_v7, %s7693_s19  ;;  %v3371_v2 = vand.u32 4294901760, %v3311_v63 }
 0x505   :  { %2589 = vrot.lane.b32.xlu1 %v2569_v37, %s7693_s19  ;;  %2603 = vrot.lane.b32.xlu0 %v2575_v53, %s7694_s24  ;;  %v8938_v37 = vpack.c.bf16 %v3377_v45, %v3374_v29  ;;  %v3314_v53 = vld [vmem:[%s10021_s12 + $0x20] sm:$0xff] }
 0x506   :  { %v3380_v49 = vand.u32 4294901760, %v3314_v53 }
 0x509   :  { %2605 = vrot.lane.b32.xlu1 %v2578_v46, %s7694_s24 }
 0x56b   :  { %v2584_v62 = vpop.permute.xlu0 %2583 }
 0x56c   :  { %v2611_v18 = vsel %vm200_vm5, %v8815_v47, %v2584_v62 }
 0x56f   :  { %v2586_v39 = vpop.permute.xlu1 %2585  ;;  %v2600_v24 = vpop.permute.xlu0 %2599 }
 0x570   :  { %v2615_v5 = vsel %vm205_vm6, %v2611_v18, %v2600_v24  ;;  %v2612_v21 = vsel %vm200_vm5, %v8822_v13, %v2586_v39  ;;  %v3318_v24 = vld [vmem:[%s10021_s12 + $0x40] sm:$0xff] }
 0x571   :  { %v2630_v38 = vsel %vm220_vm7, %v2615_v5, 0  ;;  %v3319_v5 = vld [vmem:[%s10021_s12 + $0x48] sm:$0xff] }
 0x572   :  { %v8885_v8 = vand.u32 4294901760, %v2630_v38 }
 0x573   :  { %v2602_v3 = vpop.permute.xlu1 %2601  ;;  %v2588_v4 = vpop.permute.xlu0 %2587 }
 0x574   :  { %v2710_v35 = vsub.f32 %v2630_v38, %v8885_v8  ;;  %v2616_v48 = vsel %vm205_vm6, %v2612_v21, %v2602_v3  ;;  %v2613_v19 = vsel %vm200_vm5, %v2559_v42, %v2588_v4  ;;  %v3392_v38 = vand.u32 4294901760, %v3318_v24  ;;  %v3320_v21 = vld [vmem:[%s10021_s12 + $0x50] sm:$0xff]  ;;  %v3321_v3 = vld [vmem:[%s10021_s12 + $0x58] sm:$0xff] }
 0x575   :  { %v2633_v31 = vsel %vm220_vm7, %v2616_v48, 0  ;;  %v3398_v4 = vand.u32 4294901760, %v3320_v21 }
 0x576   :  { %v8893_v50 = vand.u32 4294901760, %v2633_v31  ;;  %v2711_v47 = vand.u32 4294901760, %v2710_v35 }
 0x577   :  { %v2590_v59 = vpop.permute.xlu1 %2589  ;;  %v2604_v32 = vpop.permute.xlu0 %2603  ;;  %v9012_v57 = vsub.f32 %v3320_v21, %v3398_v4 }
 0x578   :  { %v2720_v20 = vsub.f32 %v2633_v31, %v8893_v50  ;;  %v2617_v13 = vsel %vm205_vm6, %v2613_v19, %v2604_v32  ;;  %v2712_v14 = vsub.f32 %v2710_v35, %v2711_v47  ;;  %v2614_v51 = vsel %vm200_vm5, %v8839_v28, %v2590_v59  ;;  %v3323_v19 = vld [vmem:[%s10021_s12 + $0x68] sm:$0xff]  ;;  %v3324_v59 = vld [vmem:[%s10021_s12 + $0x70] sm:$0xff] }
 0x579   :  { %v2636_v43 = vsel %vm220_vm7, %v2617_v13, 0  ;;  %v8980_v31 = vsub.f32 %v3311_v63, %v3371_v2  ;;  %v8995_v32 = vsub.f32 %v3314_v53, %v3380_v49 }
 0x57a   :  { %v2721_v44 = vand.u32 4294901760, %v2720_v20  ;;  %v2729_v56 = vand.u32 4294901760, %v2636_v43  ;;  %v2713_v40 = vand.u32 4294901760, %v2712_v14 }
 0x57b   :  { %v2606_v23 = vpop.permute.xlu1 %2605  ;;  %v10097_v53 = vand.u32 4294901760, %v8995_v32 }
 0x57c   :  { %v2722_v61 = vsub.f32 %v2720_v20, %v2721_v44  ;;  %v2730_v27 = vsub.f32 %v2636_v43, %v2729_v56  ;;  %v2618_v42 = vsel %vm205_vm6, %v2614_v51, %v2606_v23  ;;  %6099 = vmatprep.mubr.f32.mxu1 %v2713_v40  ;;  %v3325_v43 = vld [vmem:[%s10021_s12 + $0x78] sm:$0xff] }
 0x57d   :  { %v2639_v10 = vsel %vm220_vm7, %v2618_v42, 0  ;;  %v3413_v42 = vand.u32 4294901760, %v3325_v43 }
 0x57e   :  { %v2723_v52 = vand.u32 4294901760, %v2722_v61  ;;  %v2739_v54 = vand.u32 4294901760, %v2639_v10  ;;  %v2731_v26 = vand.u32 4294901760, %v2730_v27  ;;  %v3407_v61 = vand.u32 4294901760, %v3323_v19 }
 0x580   :  { %v2740_v15 = vsub.f32 %v2639_v10, %v2739_v54  ;;  %6100 = vmatmul.mubr.f32.vlgmr.msra.gmra.mrb[34].mxu1 %v2723_v52  ;;  %v2732_v36 = vsub.f32 %v2730_v27, %v2731_v26 }
 0x581   :  { %7114 = vmatpush3.bf16.msra.mxu1 %v7111_v33  ;;  %v3383_v33 = vand.u32 4294901760, %v3315_v17 }
 0x582   :  { %v2733_v41 = vand.u32 4294901760, %v2732_v36  ;;  %6109 = vmatprep.subr.mxu1 %v2768_v34  ;;  %v2741_v58 = vand.u32 4294901760, %v2740_v15  ;;  %v10100_v36 = vand.u32 4294901760, %v8980_v31 }
 0x583   :  { %v8948_v46 = vpack.c.bf16 %v3383_v33, %v3380_v49 }
 0x584   :  { %6102 = vmatprep.mubr.f32.mxu1 %v2733_v41  ;;  %v2742_v28 = vsub.f32 %v2740_v15, %v2741_v58 }
 0x585   :  { %6110 = vmatpush3.msra.mxu1 %v2768_v34  ;;  %v9026_v34 = vsub.f32 %v3325_v43, %v3413_v42 }
 0x586   :  { %v2743_v1 = vand.u32 4294901760, %v2742_v28  ;;  %7116 = vmatprep.subr.bf16.mxu1 %v7115_v6  ;;  %v3469_v28 = vsub.f32 %v8980_v31, %v10100_v36 }
 0x588   :  { %6103 = vmatmul.mubr.f32.gmra.mrb[36].mxu1 %v2743_v1 }
 0x589   :  { %6111 = vmatprep.mubr.f32.mxu1 %v8885_v8 }
 0x58c   :  { %6112 = vmatmul.mubr.f32.vlgmr.msra.gmra.mrb[34].mxu1 %v8893_v50 }
 0x58d   :  { %7118 = vmatpush3.bf16.msra.mxu1 %v7115_v6  ;;  %6114 = vmatprep.mubr.f32.mxu1 %v2729_v56  ;;  %v3316_v6 = vld [vmem:[%s10021_s12 + $0x30] sm:$0xff] }
 0x58e   :  { %6121 = vmatprep.subr.mxu1 %v2765_v22  ;;  %v3386_v62 = vand.u32 4294901760, %v3316_v6 }
 0x590   :  { %6115 = vmatmul.mubr.f32.gmra.mrb[36].mxu1 %v2739_v54  ;;  %v8999_v13 = vsub.f32 %v3316_v6, %v3386_v62 }
 0x591   :  { %6122 = vmatpush3.msra.mxu1 %v2765_v22  ;;  %6123 = vmatprep.mubr.f32.mxu1 %v2710_v35  ;;  %v3401_v35 = vand.u32 4294901760, %v3321_v3 }
 0x592   :  { %7120 = vmatprep.subr.bf16.mxu1 %v8837_v12 }
 0x593   :  { %v9010_v40 = vpack.c.bf16 %v3401_v35, %v3398_v4  ;;  %v9014_v51 = vsub.f32 %v3321_v3, %v3401_v35 }
 0x594   :  { %6124 = vmatmul.mubr.f32.vlgmr.msra.gmra.mrb[34].mxu1 %v2720_v20  ;;  %v8997_v20 = vsub.f32 %v3315_v17, %v3383_v33  ;;  %v3490_v33 = vsub.f32 %v8995_v32, %v10097_v53 }
 0x595   :  { %7122 = vmatpush3.bf16.msra.mxu1 %v8837_v12  ;;  %6126 = vmatprep.mubr.f32.mxu1 %v2730_v27  ;;  %v3410_v27 = vand.u32 4294901760, %v3324_v59 }
 0x596   :  { %6133 = vmatprep.subr.mxu1 %v8859_v16  ;;  %v10096_v17 = vand.u32 4294901760, %v8997_v20 }
 0x597   :  { %v9031_v41 = vpack.c.bf16 %v3413_v42, %v3410_v27 }
 0x598   :  { %6127 = vmatmul.mubr.f32.gmra.mrb[36].mxu1 %v2740_v15  ;;  %v3497_v6 = vsub.f32 %v8997_v20, %v10096_v17 }
 0x599   :  { %6134 = vmatpush3.msra.mxu1 %v8859_v16  ;;  %6135 = vmatprep.mubr.f32.mxu1 %v2711_v47  ;;  %v8984_v47 = vsub.f32 %v3313_v9, %v3377_v45 }
 0x59a   :  { %7124 = vmatprep.subr.bf16.mxu1 %v8879_v30 }
 0x59c   :  { %6136 = vmatmul.mubr.f32.vlgmr.msra.gmra.mrb[34].mxu1 %v2721_v44  ;;  %v9006_v44 = vsub.f32 %v3318_v24, %v3392_v38 }
 0x59d   :  { %7126 = vmatpush3.bf16.msra.mxu1 %v8879_v30  ;;  %6138 = vmatprep.mubr.f32.mxu1 %v2731_v26  ;;  %v3317_v30 = vld [vmem:[%s10021_s12 + $0x38] sm:$0xff]  ;;  %v9024_v26 = vsub.f32 %v3324_v59, %v3410_v27  ;;  %v10090_v27 = vand.u32 4294901760, %v9014_v51 }
 0x59e   :  { %6145 = vmatprep.subr.mxu1 %v2766_v55  ;;  %v3389_v18 = vand.u32 4294901760, %v3317_v30  ;;  %v10093_v4 = vand.u32 4294901760, %v9006_v44 }
 0x5a0   :  { %6139 = vmatmul.mubr.f32.gmra.mrb[36].mxu1 %v2741_v58  ;;  %v8958_v39 = vpack.c.bf16 %v3389_v18, %v3386_v62  ;;  %v9001_v14 = vsub.f32 %v3317_v30, %v3389_v18  ;;  %v3491_v30 = vand.u32 4294901760, %v3490_v33  ;;  %v3498_v62 = vand.u32 4294901760, %v3497_v6 }
 0x5a1   :  { %6146 = vmatpush3.msra.mxu1 %v2766_v55  ;;  %6147 = vmatprep.mubr.f32.mxu1 %v8885_v8  ;;  %v3322_v55 = vld [vmem:[%s10021_s12 + $0x60] sm:$0xff]  ;;  %v10095_v18 = vand.u32 4294901760, %v8999_v13 }
 0x5a2   :  { %7128 = vmatprep.subr.bf16.mxu1 %v8837_v12  ;;  %v3404_v23 = vand.u32 4294901760, %v3322_v55  ;;  %v10094_v24 = vand.u32 4294901760, %v9001_v14 }
 0x5a4   :  { %6148 = vmatmul.mubr.f32.vlgmr.msra.gmra.mrb[34].mxu1 %v8893_v50  ;;  %v9018_v10 = vpack.c.bf16 %v3407_v61, %v3404_v23  ;;  %v9020_v52 = vsub.f32 %v3322_v55, %v3404_v23 }
 0x5a5   :  { %7130 = vmatpush3.bf16.msra.mxu1 %v8837_v12  ;;  %6150 = vmatprep.mubr.f32.mxu1 %v2729_v56  ;;  %v3310_v12 = vld [vmem:[%s10021_s12] sm:$0xff] }
 0x5a6   :  { %6157 = vmatprep.subr.mxu1 %v8859_v16 }
 0x5a8   :  { %6151 = vmatmul.mubr.f32.gmra.mrb[36].mxu1 %v2739_v54 }
 0x5a9   :  { %6158 = vmatpush3.msra.mxu1 %v8859_v16  ;;  %6159 = vmatprep.mubr.f32.mxu1 %v8885_v8  ;;  %v3368_v16 = vand.u32 4294901760, %v3310_v12  ;;  %v3395_v8 = vand.u32 4294901760, %v3319_v5 }
 0x5aa   :  { %7275 = vmatprep.subr.bf16.mxu1 %v10154_v0 }
 0x5ab   :  { %v8928_v7 = vpack.c.bf16 %v3371_v2, %v3368_v16  ;;  %v8968_v22 = vpack.c.bf16 %v3395_v8, %v3392_v38  ;;  %v8978_v48 = vsub.f32 %v3310_v12, %v3368_v16  ;;  %v3470_v12 = vand.u32 4294901760, %v3469_v28 }
 0x5ac   :  { %6160 = vmatmul.mubr.f32.vlgmr.msra.gmra.mrb[34].mxu1 %v8893_v50  ;;  %v8982_v50 = vsub.f32 %v3312_v25, %v3374_v29  ;;  %v10098_v16 = vand.u32 4294901760, %v8984_v47  ;;  %v3504_v38 = vsub.f32 %v8999_v13, %v10095_v18  ;;  %v3539_v28 = vsub.f32 %v9014_v51, %v10090_v27 }
 0x5ad   :  { %6162 = vmatprep.mubr.f32.mxu1 %v2729_v56  ;;  %7133 = vmatpush3.bf16.msra.mxu0 %v8928_v7  ;;  %v9008_v56 = vsub.f32 %v3319_v5, %v3395_v8  ;;  %v10101_v15 = vand.u32 4294901760, %v8978_v48  ;;  %v9064_v5 = vpack.c.bf16 %v3498_v62, %v3491_v30  ;;  %v3511_v8 = vsub.f32 %v9001_v14, %v10094_v24 }
 0x5ae   :  { %7134 = vmatprep.subr.bf16.mxu0 %v10154_v0  ;;  %v10099_v63 = vand.u32 4294901760, %v8982_v50  ;;  %v3483_v9 = vsub.f32 %v8984_v47, %v10098_v16  ;;  %v3505_v21 = vand.u32 4294901760, %v3504_v38  ;;  %v10087_v62 = vand.u32 4294901760, %v9024_v26 }
 0x5af   :  { %v3462_v58 = vsub.f32 %v8978_v48, %v10101_v15  ;;  %v3512_v3 = vand.u32 4294901760, %v3511_v8  ;;  %v10092_v35 = vand.u32 4294901760, %v9008_v56  ;;  %v10086_v38 = vand.u32 4294901760, %v9026_v34 }
 0x5b0   :  { %6163 = vmatmul.mubr.f32.gmra.mrb[36].mxu1 %v2739_v54  ;;  %v9022_v54 = vsub.f32 %v3323_v19, %v3407_v61  ;;  %v3476_v25 = vsub.f32 %v8982_v50, %v10099_v63  ;;  %v3484_v45 = vand.u32 4294901760, %v3483_v9  ;;  %v3518_v19 = vsub.f32 %v9006_v44, %v10093_v4 }
 0x5b1   :  { %6407 = vmatprep.mubr.msk.f32.mxu1 %vm7696_vm9, %v10165_v60  ;;  %7136 = vmatpush3.bf16.msra.mxu0 %v8938_v37  ;;  %v3463_v1 = vand.u32 4294901760, %v3462_v58  ;;  %v9074_v55 = vpack.c.bf16 %v3512_v3, %v3505_v21  ;;  %v3525_v59 = vsub.f32 %v9008_v56, %v10092_v35  ;;  %v10091_v61 = vand.u32 4294901760, %v9012_v57 }
 0x5b2   :  { %7137 = vmatprep.subr.bf16.mxu0 %v10154_v0  ;;  %v3477_v29 = vand.u32 4294901760, %v3476_v25  ;;  %v3519_v43 = vand.u32 4294901760, %v3518_v19  ;;  %v10089_v25 = vand.u32 4294901760, %v9020_v52  ;;  %v10088_v9 = vand.u32 4294901760, %v9022_v54 }
 0x5b3   :  { %v9043_v2 = vpack.c.bf16 %v3470_v12, %v3463_v1  ;;  %v3526_v23 = vand.u32 4294901760, %v3525_v59  ;;  %v3532_v58 = vsub.f32 %v9012_v57, %v10091_v61  ;;  %v3540_v12 = vand.u32 4294901760, %v3539_v28 }
 0x5b4   :  { %v9054_v49 = vpack.c.bf16 %v3484_v45, %v3477_v29  ;;  %v3546_v45 = vsub.f32 %v9020_v52, %v10089_v25  ;;  %v3553_v33 = vsub.f32 %v9022_v54, %v10088_v9  ;;  %v3560_v21 = vsub.f32 %v9024_v26, %v10087_v62  ;;  %v5455_v62 = vld [vmem:[%s10018_s9] ss:$0 sm:$0xff] }
 0x5b5   :  { %7139 = vmatpush3.bf16.msra.mxu0 %v8948_v46  ;;  %v9084_v42 = vpack.c.bf16 %v3526_v23, %v3519_v43  ;;  %v3533_v1 = vand.u32 4294901760, %v3532_v58  ;;  %v3567_v3 = vsub.f32 %v9026_v34, %v10086_v38  ;;  %v10209_v9 = vld [vmem:[#allocation8_spill] sm:$0xff] }
 0x5b6   :  { %7140 = vmatprep.subr.bf16.mxu0 %v10154_v0  ;;  %v3547_v6 = vand.u32 4294901760, %v3546_v45  ;;  %v3554_v30 = vand.u32 4294901760, %v3553_v33  ;;  %v3561_v19 = vand.u32 4294901760, %v3560_v21  ;;  %v10210_v25 = vand.u32 15, %v10209_v9 }
 0x5b7   :  { %v9094_v29 = vpack.c.bf16 %v3540_v12, %v3533_v1  ;;  %v3568_v59 = vand.u32 4294901760, %v3567_v3  ;;  %v10207_v3 = vand.u32 15, %v10205_v11 }
 0x5b8   :  { %v9104_v8 = vpack.c.bf16 %v3554_v30, %v3547_v6  ;;  %v10206_v30 = vld [vmem:[#allocation6_spill] sm:$0xff]  ;;  %v3260_v27 = vand.u32 1, %v10210_v25 }
 0x5b9   :  { %7142 = vmatpush3.bf16.msra.mxu0 %v8958_v39  ;;  %v9112_v43 = vpack.c.bf16 %v3568_v59, %v3561_v19  ;;  %v3253_v21 = vand.u32 1, %v10206_v30  ;;  %vm3295_vm1 = vcmp.lt.s32.totalorder %v10206_v30, 12  ;;  %v3246_v19 = vand.u32 1, %v10207_v3  ;;  %v10208_v59 = vld [vmem:[#allocation7_spill] sm:$0xff] }
 0x5ba   :  { %7143 = vmatprep.subr.bf16.mxu0 %v10154_v0  ;;  %v3267_v38 = vand.u32 1, %v10208_v59  ;;  %vm3297_vm5 = vcmp.lt.s32.totalorder %v10208_v59, 12  ;;  %vm3292_vm7 = vcmp.eq.s32.totalorder %v3260_v27, 0 }
 0x5bb   :  { %vm3291_vm0 = vcmp.eq.s32.totalorder %v3253_v21, 0  ;;  %vm3290_vm3 = vcmp.eq.s32.totalorder %v3246_v19, 0  ;;  %v9162_v18 = vsel %vm3292_vm7, 1.0, %v10165_v60 }
 0x5bc   :  { %vm3299_vm2 = vmand %vm3291_vm0, %vm3295_vm1  ;;  %vm3293_vm4 = vcmp.eq.s32.totalorder %v3267_v38, 0  ;;  %v9147_v35 = vsel %vm3290_vm3, 1.0, %v10165_v60  ;;  %10215 = vst [vmem:[#allocation22_spill] sm:$0xff] %v9162_v18 }
 0x5bd   :  { %7145 = vmatpush3.bf16.msra.mxu0 %v8968_v22  ;;  %v9142_v30 = vsel %vm3299_vm2, 1.0, %v10165_v60  ;;  %10212 = vst [vmem:[#allocation11_spill] sm:$0xff] %v9147_v35  ;;  %vm3301_vm6 = vmand %vm3293_vm4, %vm3297_vm5 }
 0x5be   :  { %7146 = vmatprep.subr.bf16.mxu0 %v10154_v0  ;;  %10211 = vst [vmem:[#allocation20_spill] sm:$0xff] %v9142_v30  ;;  %v9156_v19 = vsel %vm3301_vm6, 1.0, %v10165_v60 }
 0x5bf   :  { %10213 = vst [vmem:[#allocation21_spill] sm:$0xff] %v9156_v19 }
 0x5c1   :  { %7148 = vmatpush3.bf16.msra.mxu0 %v9010_v40 }
 0x5c2   :  { %7149 = vmatprep.subr.bf16.mxu0 %v10154_v0 }
 0x5c5   :  { %7151 = vmatpush3.bf16.msra.mxu0 %v9018_v10 }
 0x5c6   :  { %7152 = vmatprep.subr.bf16.mxu0 %v10154_v0 }
 0x5c9   :  { %7154 = vmatpush3.bf16.msra.mxu0 %v9031_v41 }
 0x5ca   :  { %7155 = vmatprep.subr.bf16.mxu0 %v10154_v0 }
 0x67f   :  { %v6161_v21 = vpop.f32.mrb[34].mxu1 }
 0x680   :  { %v9144_v61 = vadd.f32 %v6161_v21, %v5455_v62  ;;  %v3220_v3 = vpop.f32.mrb[35].mxu1 }
 0x681   :  { %v9149_v4 = vadd.f32 %v5455_v62, %v3220_v3 }
 0x682   :  { %v3329_v38 = vmul.f32 %v9144_v61, %v9142_v30 }
 0x683   :  { %v3328_v25 = vmul.f32 %v9149_v4, %v9147_v35  ;;  %v6164_v9 = vpop.f32.mrb[36].mxu1 }
 0x684   :  { %v3340_v59 = vmul.f32 %v9144_v61, %v3329_v38  ;;  %v9159_v21 = vadd.f32 %v6164_v9, %v5455_v62  ;;  %v3232_v24 = vpop.f32.mrb[37].mxu1 }
 0x685   :  { %v3332_v3 = vadd.f32 %v3329_v38, %v3328_v25  ;;  %v3339_v27 = vmul.f32 %v9149_v4, %v3328_v25  ;;  %v9165_v17 = vadd.f32 %v5455_v62, %v3232_v24 }
 0x686   :  { %10214 = vst [vmem:[#allocation12_spill] sm:$0xff] %v9159_v21  ;;  %v3331_v53 = vmul.f32 %v9159_v21, %v9156_v19 }
 0x687   :  { %v3333_v16 = vrot.slane %v3332_v3, 4  ;;  %v3341_v63 = vadd.f32 %v3340_v59, %v3339_v27  ;;  %v3330_v36 = vmul.f32 %v9165_v17, %v9162_v18 }
 0x688   :  { %v3356_v9 = vmul.f32 %v9159_v21, %v3331_v53 }
 0x689   :  { %v3334_v15 = vadd.f32 %v3333_v16, %v3332_v3  ;;  %v3342_v6 = vrot.slane %v3341_v63, 4  ;;  %v3348_v33 = vadd.f32 %v3331_v53, %v3330_v36  ;;  %v3355_v45 = vmul.f32 %v9165_v17, %v3330_v36 }
 0x68b   :  { %v3343_v38 = vadd.f32 %v3342_v6, %v3341_v63  ;;  %v3349_v12 = vrot.slane %v3348_v33, 4  ;;  %v3357_v25 = vadd.f32 %v3356_v9, %v3355_v45  ;;  %v3335_v24 = vrot.slane %v3334_v15, 2 }
 0x68d   :  { %v3344_v62 = vrot.slane %v3343_v38, 2  ;;  %v3350_v1 = vadd.f32 %v3349_v12, %v3348_v33  ;;  %v3358_v28 = vrot.slane %v3357_v25, 4  ;;  %v3336_v27 = vadd.f32 %v3335_v24, %v3334_v15 }
 0x68e   :  { %v10225_v33 = vand.u32 4294901760, %v8980_v31  ;;  %v10232_v24 = vand.u32 4294901760, %v9006_v44 }
 0x68f   :  { %v3351_v58 = vrot.slane %v3350_v1, 2  ;;  %v3359_v23 = vadd.f32 %v3358_v28, %v3357_v25  ;;  %v3345_v59 = vadd.f32 %v3344_v62, %v3343_v38  ;;  %v3337_v3 = vrot.slane %v3336_v27, 1 }
 0x690   :  { %v10230_v25 = vand.u32 4294901760, %v8999_v13  ;;  %v10233_v62 = vand.u32 4294901760, %v9008_v56 }
 0x691   :  { %v3352_v19 = vadd.f32 %v3351_v58, %v3350_v1  ;;  %v3360_v18 = vrot.slane %v3359_v23, 2  ;;  %v3346_v16 = vrot.slane %v3345_v59, 1  ;;  %v3338_v6 = vadd.f32 %v3337_v3, %v3336_v27 }
 0x693   :  { %v3353_v30 = vrot.slane %v3352_v19, 1  ;;  %v3361_v35 = vadd.f32 %v3360_v18, %v3359_v23  ;;  %v3347_v63 = vadd.f32 %v3346_v16, %v3345_v59  ;;  %v7240_v59 = vpack.c.bf16 %v10233_v62, %v10232_v24 }
 0x695   :  { %v3362_v53 = vrot.slane %v3361_v35, 1  ;;  %v3354_v21 = vadd.f32 %v3353_v30, %v3352_v19  ;;  %v10226_v19 = vand.u32 4294901760, %v8982_v50 }
 0x697   :  { %v3363_v36 = vadd.f32 %v3362_v53, %v3361_v35  ;;  %v10219_v35 = vpack.c.bf16 %v9001_v14, %v8999_v13  ;;  %v10236_v13 = vand.u32 4294901760, %v9020_v52 }
 0x699   :  { %v3364_v45 = vsel %vm885_vm11, %v3354_v21, %v3363_v36  ;;  %v10227_v21 = vand.u32 4294901760, %v8984_v47  ;;  %v4113_v36 = vld [vmem:[%s10022_s13 + $0x30] sm:$0xff] }
 0x69a   :  { %v3365_v12 = vsel %vm889_vm12, %v3347_v63, %v3364_v45  ;;  %v4114_v63 = vld [vmem:[%s10022_s13 + $0x38] sm:$0xff] }
 0x69b   :  { %v3366_v15 = vsel %vm893_vm13, %v3338_v6, %v3365_v12  ;;  %v7231_v9 = vpack.c.bf16 %v10227_v21, %v10226_v19  ;;  %v4149_v6 = vand.u32 4294901760, %v4113_v36  ;;  %v4152_v45 = vand.u32 4294901760, %v4114_v63  ;;  %v4122_v21 = vld [vmem:[%s10022_s13 + $0x78] sm:$0xff] }
 0x69c   :  { %v9179_v58 = vand.u32 4294901760, %v3366_v15 }
 0x69d   :  { %v9353_v12 = vpack.c.bf16 %v4152_v45, %v4149_v6  ;;  %v9395_v19 = vsub.f32 %v4114_v63, %v4152_v45 }
 0x69e   :  { %v3449_v18 = vsub.f32 %v3366_v15, %v9179_v58  ;;  %v4115_v15 = vld [vmem:[%s10022_s13 + $0x40] sm:$0xff] }
 0x6a0   :  { %v3450_v23 = vand.u32 4294901760, %v3449_v18 }
 0x6a2   :  { %v3451_v28 = vsub.f32 %v3449_v18, %v3450_v23 }
 0x6a4   :  { %v3452_v1 = vand.u32 4294901760, %v3451_v28 }
 0x6a6   :  { %6198 = vmatmul.mubr.f32.vlgmr.msra.gmra.mrb[20].mxu0 %v3452_v1  ;;  %v4117_v1 = vld [vmem:[%s10022_s13 + $0x50] sm:$0xff] }
 0x6a7   :  { %7157 = vmatpush3.bf16.msra.mxu0 %v9043_v2  ;;  %6232 = vmatprep.mubr.msk.f32.mxu0 %vm7696_vm9, %v10165_v60  ;;  %v10216_v2 = vpack.c.bf16 %v8980_v31, %v8978_v48  ;;  %v10229_v31 = vand.u32 4294901760, %v8997_v20 }
 0x6a8   :  { %7158 = vmatprep.subr.bf16.mxu0 %v10154_v0 }
 0x6ab   :  { %7160 = vmatpush3.bf16.msra.mxu0 %v9054_v49  ;;  %v10217_v49 = vpack.c.bf16 %v8984_v47, %v8982_v50  ;;  %v10231_v50 = vand.u32 4294901760, %v9001_v14  ;;  %v10237_v14 = vand.u32 4294901760, %v9022_v54 }
 0x6ac   :  { %7161 = vmatprep.subr.bf16.mxu0 %v10154_v0 }
 0x6ad   :  { %v7237_v47 = vpack.c.bf16 %v10231_v50, %v10230_v25  ;;  %v7246_v16 = vpack.c.bf16 %v10237_v14, %v10236_v13 }
 0x6af   :  { %7163 = vmatpush3.bf16.msra.mxu0 %v9064_v5  ;;  %v10218_v5 = vpack.c.bf16 %v8997_v20, %v8995_v32  ;;  %v10235_v20 = vand.u32 4294901760, %v9014_v51 }
 0x6b0   :  { %7164 = vmatprep.subr.bf16.mxu0 %v10154_v0 }
 0x6b3   :  { %7166 = vmatpush3.bf16.msra.mxu0 %v9074_v55  ;;  %v10220_v55 = vpack.c.bf16 %v9008_v56, %v9006_v44  ;;  %v10238_v44 = vand.u32 4294901760, %v9024_v26  ;;  %v10239_v56 = vand.u32 4294901760, %v9026_v34 }
 0x6b4   :  { %7167 = vmatprep.subr.bf16.mxu0 %v10154_v0 }
 0x6b5   :  { %v7249_v3 = vpack.c.bf16 %v10239_v56, %v10238_v44 }
 0x6b7   :  { %7169 = vmatpush3.bf16.msra.mxu0 %v9084_v42  ;;  %v10221_v42 = vpack.c.bf16 %v9014_v51, %v9012_v57 }
 0x6b8   :  { %7170 = vmatprep.subr.bf16.mxu0 %v10154_v0 }
 0x6bb   :  { %7172 = vmatpush3.bf16.msra.mxu0 %v9094_v29  ;;  %v10222_v29 = vpack.c.bf16 %v9022_v54, %v9020_v52  ;;  %v4111_v54 = vld [vmem:[%s10022_s13 + $0x20] sm:$0xff] }
 0x6bc   :  { %7173 = vmatprep.subr.bf16.mxu0 %v10154_v0 }
 0x6bf   :  { %7175 = vmatpush3.bf16.msra.mxu0 %v9104_v8  ;;  %v10223_v8 = vpack.c.bf16 %v9026_v34, %v9024_v26  ;;  %v4112_v26 = vld [vmem:[%s10022_s13 + $0x28] sm:$0xff]  ;;  %v4143_v34 = vand.u32 4294901760, %v4111_v54 }
 0x6c0   :  { %7176 = vmatprep.subr.bf16.mxu0 %v10154_v0 }
 0x6c3   :  { %7178 = vmatpush3.bf16.msra.mxu0 %v9112_v43  ;;  %v10224_v43 = vand.u32 4294901760, %v8978_v48  ;;  %v10228_v48 = vand.u32 4294901760, %v8995_v32  ;;  %v10234_v32 = vand.u32 4294901760, %v9012_v57  ;;  %v4110_v57 = vld [vmem:[%s10022_s13 + $0x18] sm:$0xff] }
 0x6c4   :  { %7179 = vmatprep.subr.bf16.mxu0 %v10154_v0 }
 0x6c5   :  { %v7228_v30 = vpack.c.bf16 %v10225_v33, %v10224_v43  ;;  %v7234_v38 = vpack.c.bf16 %v10229_v31, %v10228_v48  ;;  %v7243_v27 = vpack.c.bf16 %v10235_v20, %v10234_v32  ;;  %v9389_v43 = vsub.f32 %v4111_v54, %v4143_v34 }
 0x6c6   :  { %6233 = vmatmul.mubr.f32.vlgmr.msra.gmra.mrb[20].mxu0 %v9179_v58  ;;  %v4161_v31 = vand.u32 4294901760, %v4117_v1  ;;  %v4176_v32 = vand.u32 4294901760, %v4122_v21 }
 0x6c7   :  { %7181 = vmatpush3.bf16.msra.mxu0 %v10216_v2  ;;  %6267 = vmatprep.mubr.msk.f32.mxu0 %vm7696_vm9, %v10165_v60  ;;  %v4118_v2 = vld [vmem:[%s10022_s13 + $0x58] sm:$0xff] }
 0x6c8   :  { %7182 = vmatprep.subr.bf16.mxu0 %v10154_v0  ;;  %v9407_v62 = vsub.f32 %v4117_v1, %v4161_v31 }
 0x6cb   :  { %7184 = vmatpush3.bf16.msra.mxu0 %v10217_v49 }
 0x6cc   :  { %7185 = vmatprep.subr.bf16.mxu0 %v10154_v0 }
 0x6cf   :  { %7187 = vmatpush3.bf16.msra.mxu0 %v10218_v5 }
 0x6d0   :  { %7188 = vmatprep.subr.bf16.mxu0 %v10154_v0 }
 0x6d3   :  { %7190 = vmatpush3.bf16.msra.mxu0 %v10219_v35 }
 0x6d4   :  { %7191 = vmatprep.subr.bf16.mxu0 %v10154_v0 }
 0x6d7   :  { %7193 = vmatpush3.bf16.msra.mxu0 %v10220_v55 }
 0x6d8   :  { %7194 = vmatprep.subr.bf16.mxu0 %v10154_v0 }
 0x6db   :  { %7196 = vmatpush3.bf16.msra.mxu0 %v10221_v42  ;;  %v4119_v42 = vld [vmem:[%s10022_s13 + $0x60] sm:$0xff] }
 0x6dc   :  { %7197 = vmatprep.subr.bf16.mxu0 %v10154_v0  ;;  %v4167_v25 = vand.u32 4294901760, %v4119_v42 }
 0x6de   :  { %v9411_v20 = vsub.f32 %v4119_v42, %v4167_v25 }
 0x6df   :  { %7199 = vmatpush3.bf16.msra.mxu0 %v10222_v29  ;;  %v4120_v29 = vld [vmem:[%s10022_s13 + $0x68] sm:$0xff] }
 0x6e0   :  { %7200 = vmatprep.subr.bf16.mxu0 %v10154_v0  ;;  %v4170_v50 = vand.u32 4294901760, %v4120_v29 }
 0x6e2   :  { %v9416_v13 = vpack.c.bf16 %v4170_v50, %v4167_v25 }
 0x6e3   :  { %7202 = vmatpush3.bf16.msra.mxu0 %v10223_v8  ;;  %v4121_v8 = vld [vmem:[%s10022_s13 + $0x70] sm:$0xff] }
 0x6e4   :  { %7203 = vmatprep.subr.bf16.mxu0 %v10154_v0 }
 0x6e6   :  { %6268 = vmatmul.mubr.f32.vlgmr.msra.gmra.mrb[20].mxu0 %v3449_v18  ;;  %v4155_v18 = vand.u32 4294901760, %v4115_v15 }
 0x6e7   :  { %7205 = vmatpush3.bf16.msra.mxu0 %v8928_v7  ;;  %6302 = vmatprep.mubr.msk.f32.mxu0 %vm7696_vm9, %v10165_v60 }
 0x6e8   :  { %7206 = vmatprep.subr.bf16.mxu0 %v10154_v0 }
 0x6eb   :  { %7208 = vmatpush3.bf16.msra.mxu0 %v8938_v37 }
 0x6ec   :  { %7209 = vmatprep.subr.bf16.mxu0 %v10154_v0 }
 0x6ef   :  { %7211 = vmatpush3.bf16.msra.mxu0 %v8948_v46 }
 0x6f0   :  { %7212 = vmatprep.subr.bf16.mxu0 %v10154_v0 }
 0x6f3   :  { %7214 = vmatpush3.bf16.msra.mxu0 %v8958_v39 }
 0x6f4   :  { %7215 = vmatprep.subr.bf16.mxu0 %v10154_v0 }
 0x6f7   :  { %7217 = vmatpush3.bf16.msra.mxu0 %v8968_v22 }
 0x6f8   :  { %7218 = vmatprep.subr.bf16.mxu0 %v10154_v0 }
 0x6fb   :  { %7220 = vmatpush3.bf16.msra.mxu0 %v9010_v40 }
 0x6fc   :  { %7221 = vmatprep.subr.bf16.mxu0 %v10154_v0 }
 0x6ff   :  { %7223 = vmatpush3.bf16.msra.mxu0 %v9018_v10 }
 0x700   :  { %7224 = vmatprep.subr.bf16.mxu0 %v10154_v0 }
 0x703   :  { %7226 = vmatpush3.bf16.msra.mxu0 %v9031_v41 }
 0x704   :  { %7227 = vmatprep.subr.bf16.mxu0 %v10154_v0 }
 0x706   :  { %6303 = vmatmul.mubr.f32.vlgmr.msra.gmra.mrb[20].mxu0 %v3450_v23 }
 0x707   :  { %7229 = vmatpush3.bf16.msra.mxu0 %v7228_v30  ;;  %6337 = vmatprep.mubr.msk.f32.mxu0 %vm7696_vm9, %v10165_v60  ;;  %v9393_v30 = vsub.f32 %v4113_v36, %v4149_v6 }
 0x708   :  { %7230 = vmatprep.subr.bf16.mxu0 %v10154_v0 }
 0x70b   :  { %7232 = vmatpush3.bf16.msra.mxu0 %v7231_v9  ;;  %v9401_v9 = vsub.f32 %v4115_v15, %v4155_v18 }
 0x70c   :  { %7233 = vmatprep.subr.bf16.mxu0 %v10154_v0 }
 0x70f   :  { %7235 = vmatpush3.bf16.msra.mxu0 %v7234_v38  ;;  %v4164_v38 = vand.u32 4294901760, %v4118_v2 }
 0x710   :  { %7236 = vmatprep.subr.bf16.mxu0 %v10154_v0 }
 0x711   :  { %v9405_v24 = vpack.c.bf16 %v4164_v38, %v4161_v31 }
 0x713   :  { %7238 = vmatpush3.bf16.msra.mxu0 %v7237_v47  ;;  %v4173_v47 = vand.u32 4294901760, %v4121_v8 }
 0x714   :  { %7239 = vmatprep.subr.bf16.mxu0 %v10154_v0 }
 0x715   :  { %v9418_v14 = vsub.f32 %v4121_v8, %v4173_v47 }
 0x717   :  { %7241 = vmatpush3.bf16.msra.mxu0 %v7240_v59  ;;  %v9409_v59 = vsub.f32 %v4118_v2, %v4164_v38 }
 0x718   :  { %7242 = vmatprep.subr.bf16.mxu0 %v10154_v0 }
 0x71b   :  { %7244 = vmatpush3.bf16.msra.mxu0 %v7243_v27  ;;  %v9413_v27 = vsub.f32 %v4120_v29, %v4170_v50 }
 0x71c   :  { %7245 = vmatprep.subr.bf16.mxu0 %v10154_v0 }
 0x71f   :  { %7247 = vmatpush3.bf16.msra.mxu0 %v7246_v16  ;;  %v9420_v16 = vsub.f32 %v4122_v21, %v4176_v32  ;;  %v10114_v21 = vand.u32 4294901760, %v9401_v9 }
 0x720   :  { %7248 = vmatprep.subr.bf16.mxu0 %v10154_v0 }
 0x721   :  { %v4281_v25 = vsub.f32 %v9401_v9, %v10114_v21 }
 0x723   :  { %7250 = vmatpush3.bf16.msra.mxu0 %v7249_v3  ;;  %v9426_v3 = vpack.c.bf16 %v4176_v32, %v4173_v47  ;;  %v4282_v47 = vand.u32 4294901760, %v4281_v25 }
 0x724   :  { %7251 = vmatprep.subr.bf16.mxu0 %v10154_v0 }
 0x726   :  { %6338 = vmatmul.mubr.f32.vlgmr.msra.gmra.mrb[20].mxu0 %v9179_v58 }
 0x727   :  { %7253 = vmatpush3.bf16.msra.mxu0 %v8928_v7  ;;  %6372 = vmatprep.mubr.msk.f32.mxu0 %vm7696_vm9, %v10165_v60  ;;  %v4107_v7 = vld [vmem:[%s10022_s13] sm:$0xff] }
 0x728   :  { %7254 = vmatprep.subr.bf16.mxu0 %v10154_v0 }
 0x72b   :  { %7256 = vmatpush3.bf16.msra.mxu0 %v8938_v37  ;;  %v4108_v37 = vld [vmem:[%s10022_s13 + $0x8] sm:$0xff] }
 0x72c   :  { %7257 = vmatprep.subr.bf16.mxu0 %v10154_v0 }
 0x72f   :  { %7259 = vmatpush3.bf16.msra.mxu0 %v8948_v46  ;;  %v4131_v46 = vand.u32 4294901760, %v4107_v7 }
 0x730   :  { %7260 = vmatprep.subr.bf16.mxu0 %v10154_v0 }
 0x731   :  { %v9371_v49 = vsub.f32 %v4107_v7, %v4131_v46 }
 0x733   :  { %7262 = vmatpush3.bf16.msra.mxu0 %v8958_v39  ;;  %v4134_v39 = vand.u32 4294901760, %v4108_v37  ;;  %v10122_v44 = vand.u32 4294901760, %v9371_v49 }
 0x734   :  { %7263 = vmatprep.subr.bf16.mxu0 %v10154_v0 }
 0x735   :  { %v9373_v5 = vsub.f32 %v4108_v37, %v4134_v39  ;;  %v4225_v7 = vsub.f32 %v9371_v49, %v10122_v44 }
 0x737   :  { %7265 = vmatpush3.bf16.msra.mxu0 %v8968_v22  ;;  %v9323_v22 = vpack.c.bf16 %v4134_v39, %v4131_v46  ;;  %v10121_v56 = vand.u32 4294901760, %v9373_v5  ;;  %v4226_v46 = vand.u32 4294901760, %v4225_v7  ;;  %v10112_v7 = vand.u32 4294901760, %v9407_v62 }
 0x738   :  { %7266 = vmatprep.subr.bf16.mxu0 %v10154_v0 }
 0x739   :  { %7277 = vmatpush3.bf16.msra.mxu1 %v9323_v22  ;;  %v4232_v37 = vsub.f32 %v9373_v5, %v10121_v56 }
 0x73a   :  { %7278 = vmatprep.subr.bf16.mxu1 %v10154_v0 }
 0x73b   :  { %7268 = vmatpush3.bf16.msra.mxu0 %v9010_v40  ;;  %v4109_v40 = vld [vmem:[%s10022_s13 + $0x10] sm:$0xff]  ;;  %v4233_v39 = vand.u32 4294901760, %v4232_v37  ;;  %v10111_v37 = vand.u32 4294901760, %v9409_v59 }
 0x73c   :  { %7269 = vmatprep.subr.bf16.mxu0 %v10154_v0  ;;  %v4137_v51 = vand.u32 4294901760, %v4109_v40 }
 0x73e   :  { %v9375_v35 = vsub.f32 %v4109_v40, %v4137_v51 }
 0x73f   :  { %7271 = vmatpush3.bf16.msra.mxu0 %v9018_v10  ;;  %v4140_v10 = vand.u32 4294901760, %v4110_v57 }
 0x740   :  { %7272 = vmatprep.subr.bf16.mxu0 %v10154_v0  ;;  %v10120_v40 = vand.u32 4294901760, %v9375_v35 }
 0x741   :  { %v9333_v52 = vpack.c.bf16 %v4140_v10, %v4137_v51  ;;  %v9377_v55 = vsub.f32 %v4110_v57, %v4140_v10  ;;  %v9438_v51 = vpack.c.bf16 %v4233_v39, %v4226_v46  ;;  %v4295_v39 = vsub.f32 %v9407_v62, %v10112_v7 }
 0x742   :  { %v4239_v10 = vsub.f32 %v9375_v35, %v10120_v40 }
 0x743   :  { %7274 = vmatpush3.bf16.msra.mxu0 %v9031_v41  ;;  %7280 = vmatpush3.bf16.msra.mxu1 %v9333_v52  ;;  %v4146_v41 = vand.u32 4294901760, %v4112_v26  ;;  %v10119_v57 = vand.u32 4294901760, %v9377_v55 }
 0x744   :  { %7419 = vmatprep.subr.bf16.mxu0 %v10154_v0  ;;  %7281 = vmatprep.subr.bf16.mxu1 %v10154_v0 }
 0x745   :  { %v9343_v53 = vpack.c.bf16 %v4146_v41, %v4143_v34  ;;  %v9391_v33 = vsub.f32 %v4112_v26, %v4146_v41  ;;  %v4246_v54 = vsub.f32 %v9377_v55, %v10119_v57  ;;  %v4240_v26 = vand.u32 4294901760, %v4239_v10 }
 0x746   :  { %6373 = vmatmul.mubr.f32.vlgmr.msra.gmra.mrb[20].mxu0 %v9179_v58  ;;  %v4116_v58 = vld [vmem:[%s10022_s13 + $0x48] sm:$0xff]  ;;  %v10118_v41 = vand.u32 4294901760, %v9389_v43  ;;  %v4302_v10 = vsub.f32 %v9409_v59, %v10111_v37 }
 0x747   :  { %6617 = vmatprep.mubr.msk.f32.mxu0 %vm7696_vm9, %v10165_v60  ;;  %7283 = vmatpush3.bf16.msra.mxu1 %v9343_v53  ;;  %v4158_v23 = vand.u32 4294901760, %v4116_v58  ;;  %v4247_v34 = vand.u32 4294901760, %v4246_v54  ;;  %v10117_v36 = vand.u32 4294901760, %v9391_v33  ;;  %v4296_v54 = vand.u32 4294901760, %v4295_v39 }
 0x748   :  { %7284 = vmatprep.subr.bf16.mxu1 %v10154_v0  ;;  %v4253_v6 = vsub.f32 %v9389_v43, %v10118_v41 }
 0x749   :  { %v9363_v28 = vpack.c.bf16 %v4158_v23, %v4155_v18  ;;  %v9403_v48 = vsub.f32 %v4116_v58, %v4158_v23  ;;  %v9449_v63 = vpack.c.bf16 %v4247_v34, %v4240_v26  ;;  %v4260_v45 = vsub.f32 %v9391_v33, %v10117_v36 }
 0x74a   :  { %v4254_v15 = vand.u32 4294901760, %v4253_v6  ;;  %v10116_v18 = vand.u32 4294901760, %v9393_v30  ;;  %v10115_v23 = vand.u32 4294901760, %v9395_v19  ;;  %v4303_v26 = vand.u32 4294901760, %v4302_v10 }
 0x74b   :  { %7286 = vmatpush3.bf16.msra.mxu1 %v9353_v12  ;;  %v4261_v58 = vand.u32 4294901760, %v4260_v45  ;;  %v10113_v31 = vand.u32 4294901760, %v9403_v48  ;;  %v10110_v34 = vand.u32 4294901760, %v9411_v20  ;;  %v10109_v6 = vand.u32 4294901760, %v9413_v27 }
 0x74c   :  { %7287 = vmatprep.subr.bf16.mxu1 %v10154_v0  ;;  %v4267_v2 = vsub.f32 %v9393_v30, %v10116_v18  ;;  %v4274_v42 = vsub.f32 %v9395_v19, %v10115_v23  ;;  %v9489_v45 = vpack.c.bf16 %v4303_v26, %v4296_v54  ;;  %v7324_v54 = vpack.c.bf16 %v9373_v5, %v9371_v49 }
 0x74d   :  { %v9459_v1 = vpack.c.bf16 %v4261_v58, %v4254_v15  ;;  %v4288_v50 = vsub.f32 %v9403_v48, %v10113_v31  ;;  %v4309_v15 = vsub.f32 %v9411_v20, %v10110_v34  ;;  %v4316_v58 = vsub.f32 %v9413_v27, %v10109_v6  ;;  %v5460_v31 = vld [vmem:[%s10019_s10] ss:$0 sm:$0xff] }
 0x74e   :  { %v4268_v29 = vand.u32 4294901760, %v4267_v2  ;;  %v4275_v8 = vand.u32 4294901760, %v4274_v42  ;;  %v7327_v26 = vpack.c.bf16 %v9377_v55, %v9375_v35  ;;  %v10240_v36 = vsub.s32 1, %v10205_v11 }
 0x74f   :  { %7289 = vmatpush3.bf16.msra.mxu1 %v9363_v28  ;;  %v4289_v32 = vand.u32 4294901760, %v4288_v50  ;;  %v4310_v2 = vand.u32 4294901760, %v4309_v15  ;;  %v4317_v42 = vand.u32 4294901760, %v4316_v58 }
 0x750   :  { %7290 = vmatprep.subr.bf16.mxu1 %v10154_v0  ;;  %v9469_v38 = vpack.c.bf16 %v4275_v8, %v4268_v29  ;;  %v10108_v29 = vand.u32 4294901760, %v9418_v14  ;;  %v10107_v8 = vand.u32 4294901760, %v9420_v16 }
 0x751   :  { %v9479_v46 = vpack.c.bf16 %v4289_v32, %v4282_v47  ;;  %v9499_v25 = vpack.c.bf16 %v4317_v42, %v4310_v2 }
 0x752   :  { %v4323_v50 = vsub.f32 %v9418_v14, %v10108_v29  ;;  %v4330_v47 = vsub.f32 %v9420_v16, %v10107_v8 }
 0x753   :  { %7292 = vmatpush3.bf16.msra.mxu1 %v9405_v24 }
 0x754   :  { %7293 = vmatprep.subr.bf16.mxu1 %v10154_v0  ;;  %v4324_v32 = vand.u32 4294901760, %v4323_v50  ;;  %v4331_v39 = vand.u32 4294901760, %v4330_v47 }
 0x756   :  { %v9507_v10 = vpack.c.bf16 %v4331_v39, %v4324_v32 }
 0x757   :  { %7295 = vmatpush3.bf16.msra.mxu1 %v9416_v13 }
 0x758   :  { %7296 = vmatprep.subr.bf16.mxu1 %v10154_v0 }
 0x75b   :  { %7298 = vmatpush3.bf16.msra.mxu1 %v9426_v3 }
 0x75c   :  { %7299 = vmatprep.subr.bf16.mxu1 %v10154_v0 }
 0x819   :  { %v4004_v47 = vpop.f32.mrb[20].mxu0 }
 0x81a   :  { %v4008_v32 = vmul.f32 0.010416667, %v4004_v47  ;;  %v6374_v39 = vpop.f32.mrb[21].mxu0  ;;  %v3327_v47 = vld [vmem:[%s10020_s11] sm:$0x1] }
 0x81c   :  { %v4009_v8 = vmul.f32 %v4008_v32, %v4008_v32 }
 0x81e   :  { %v4011_v6 = vrot.slane %v4009_v8, 7 }
 0x820   :  { %v4013_v34 = vsub.f32 %v4008_v32, %v4011_v6  ;;  %v10241_v6 = vld [vmem:[#allocation14_spill] sm:$0xff] }
 0x822   :  { %v4014_v37 = vmax.f32 %v4013_v34, 0.0 }
 0x824   :  { %v4015_v7 = vadd.f32 1e-05, %v4014_v37  ;;  %v10242_v37 = vld [vmem:[#allocation16_spill] sm:$0xff] }
 0x826   :  { %7663 = vrsqrt.f32 %v4015_v7 }
 0x830   :  { %v7664_v21 = vpop.eup %7663 }
 0x831   :  { %v4023_v23 = vmul.f32 %v7664_v21, %v5460_v31  ;;  %v10243_v31 = vsub.s32 3, %v10205_v11  ;;  %v4772_v11 = vld [vmem:[%s10024_s15] sm:$0xff] }
 0x833   :  { %v4025_v18 = vrot.slane %v4023_v23, 1  ;;  %v4050_v41 = vrot.slane %v4023_v23, %v10240_v36  ;;  %v4054_v56 = vrot.slane %v4023_v23, %v10243_v31 }
 0x835   :  { %v4027_v39 = vmul.f32 %v4025_v18, %v4008_v32  ;;  %v4075_v40 = vmul.f32 %v9149_v4, %v4050_v41  ;;  %v4076_v21 = vmul.f32 %v9144_v61, %v4050_v41  ;;  %v4077_v42 = vmul.f32 %v9165_v17, %v4054_v56  ;;  %v10246_v4 = vld [vmem:[#allocation20_spill] sm:$0xff] }
 0x837   :  { %v4028_v8 = vsub.f32 %v3327_v47, %v4027_v39  ;;  %v4036_v34 = vrot.slane %v4027_v39, %v10241_v6 }
 0x839   :  { %v4043_v7 = vrot.slane %v4036_v34, %v10241_v6  ;;  %v4063_v57 = vrot.slane %v4028_v8, %v10242_v37  ;;  %v10244_v6 = vld [vmem:[#allocation12_spill] sm:$0xff]  ;;  %v10245_v8 = vld [vmem:[#allocation11_spill] sm:$0xff] }
 0x83a   :  { %v4078_v34 = vmul.f32 %v10244_v6, %v4054_v56 }
 0x83b   :  { %v4044_v44 = vcombine.high %v4043_v7, %v4043_v7  ;;  %v4079_v29 = vadd.f32 %v4075_v40, %v4063_v57  ;;  %v4080_v18 = vadd.f32 %v4076_v21, %v4063_v57  ;;  %v10247_v57 = vld [vmem:[#allocation22_spill] sm:$0xff] }
 0x83d   :  { %v4046_v32 = vsub.f32 %v3327_v47, %v4044_v44  ;;  %v4083_v50 = vmax.f32 %v4079_v29, 0.0  ;;  %v4084_v36 = vmax.f32 %v4080_v18, 0.0  ;;  %v10248_v29 = vld [vmem:[#allocation21_spill] sm:$0xff] }
 0x83f   :  { %v4069_v39 = vrot.slane %v4046_v32, %v10242_v37  ;;  %v4087_v2 = vmul.f32 %v10245_v8, %v4083_v50  ;;  %v4088_v58 = vmul.f32 %v10246_v4, %v4084_v36 }
 0x841   :  { %v4081_v61 = vadd.f32 %v4077_v42, %v4069_v39  ;;  %v4082_v41 = vadd.f32 %v4078_v34, %v4069_v39  ;;  %v4091_v15 = vadd.f32 %v4088_v58, %v4087_v2 }
 0x843   :  { %v4085_v23 = vmax.f32 %v4081_v61, 0.0  ;;  %v4086_v7 = vmax.f32 %v4082_v41, 0.0  ;;  %v4092_v40 = vrot.slane %v4091_v15, 4 }
 0x845   :  { %v4089_v44 = vmul.f32 %v10247_v57, %v4085_v23  ;;  %v4090_v47 = vmul.f32 %v10248_v29, %v4086_v7  ;;  %v4093_v21 = vadd.f32 %v4092_v40, %v4091_v15  ;;  %v4778_v7 = vld [vmem:[%s10024_s15 + $0x30] sm:$0xff]  ;;  %v4779_v40 = vld [vmem:[%s10024_s15 + $0x38] sm:$0xff]  ;;  %v4780_v57 = vld [vmem:[%s10024_s15 + $0x40] sm:$0xff] }
 0x847   :  { %v4094_v17 = vrot.slane %v4093_v21, 2  ;;  %v4098_v31 = vadd.f32 %v4090_v47, %v4089_v44 }
 0x849   :  { %v4099_v37 = vrot.slane %v4098_v31, 4  ;;  %v4095_v18 = vadd.f32 %v4094_v17, %v4093_v21  ;;  %v4781_v17 = vld [vmem:[%s10024_s15 + $0x48] sm:$0xff] }
 0x84b   :  { %v4100_v56 = vadd.f32 %v4099_v37, %v4098_v31  ;;  %v4096_v50 = vrot.slane %v4095_v18, 1 }
 0x84d   :  { %v4101_v32 = vrot.slane %v4100_v56, 2  ;;  %v4097_v42 = vadd.f32 %v4096_v50, %v4095_v18  ;;  %v4817_v50 = vand.u32 4294901760, %v4779_v40 }
 0x84f   :  { %v4102_v6 = vadd.f32 %v4101_v32, %v4100_v56  ;;  %v4814_v32 = vand.u32 4294901760, %v4778_v7 }
 0x851   :  { %v4103_v36 = vrot.slane %v4102_v6, 1 }
 0x853   :  { %v4104_v39 = vadd.f32 %v4103_v36, %v4102_v6  ;;  %v4820_v6 = vand.u32 4294901760, %v4780_v57  ;;  %v4823_v36 = vand.u32 4294901760, %v4781_v17 }
 0x855   :  { %v4105_v58 = vsel %vm893_vm13, %v4097_v42, %v4104_v39  ;;  %v9635_v42 = vsub.f32 %v4778_v7, %v4814_v32  ;;  %v9637_v39 = vsub.f32 %v4779_v40, %v4817_v50  ;;  %v10264_v40 = vand.u32 4294901760, %v9403_v48 }
 0x856   :  { %v4106_v2 = vmul.f32 0.16666667, %v4105_v58  ;;  %v9639_v58 = vsub.f32 %v4780_v57, %v4820_v6 }
 0x858   :  { %v9549_v34 = vand.u32 4294901760, %v4106_v2 }
 0x85a   :  { %v9552_v8 = vsub.f32 %v4106_v2, %v9549_v34  ;;  %v9641_v2 = vsub.f32 %v4781_v17, %v4823_v36 }
 0x85c   :  { %v4213_v15 = vand.u32 4294901760, %v9552_v8 }
 0x85e   :  { %v4214_v4 = vsub.f32 %v9552_v8, %v4213_v15 }
 0x860   :  { %v4215_v61 = vand.u32 4294901760, %v4214_v4 }
 0x862   :  { %6408 = vmatmul.mubr.f32.vlgmr.msra.gmra.mrb[38].mxu1 %v4215_v61  ;;  %v10250_v61 = vpack.c.bf16 %v9395_v19, %v9393_v30 }
 0x863   :  { %7301 = vmatpush3.bf16.msra.mxu1 %v9438_v51  ;;  %6442 = vmatprep.mubr.msk.f32.mxu1 %vm7696_vm9, %v10165_v60  ;;  %v4773_v51 = vld [vmem:[%s10024_s15 + $0x8] sm:$0xff] }
 0x864   :  { %7302 = vmatprep.subr.bf16.mxu1 %v10154_v0 }
 0x867   :  { %7304 = vmatpush3.bf16.msra.mxu1 %v9449_v63  ;;  %v4774_v63 = vld [vmem:[%s10024_s15 + $0x10] sm:$0xff] }
 0x868   :  { %7305 = vmatprep.subr.bf16.mxu1 %v10154_v0 }
 0x86b   :  { %7307 = vmatpush3.bf16.msra.mxu1 %v9459_v1  ;;  %v4796_v1 = vand.u32 4294901760, %v4772_v11 }
 0x86c   :  { %7308 = vmatprep.subr.bf16.mxu1 %v10154_v0 }
 0x86d   :  { %v9612_v29 = vsub.f32 %v4772_v11, %v4796_v1  ;;  %v9655_v11 = vpack.c.bf16 %v4817_v50, %v4814_v32 }
 0x86f   :  { %7310 = vmatpush3.bf16.msra.mxu1 %v9469_v38  ;;  %v4799_v38 = vand.u32 4294901760, %v4773_v51 }
 0x870   :  { %7311 = vmatprep.subr.bf16.mxu1 %v10154_v0 }
 0x871   :  { %v9610_v44 = vpack.c.bf16 %v4799_v38, %v4796_v1  ;;  %v9614_v47 = vsub.f32 %v4773_v51, %v4799_v38  ;;  %v10251_v51 = vpack.c.bf16 %v9403_v48, %v9401_v9  ;;  %v10252_v1 = vpack.c.bf16 %v9409_v59, %v9407_v62 }
 0x872   :  { %v10253_v38 = vpack.c.bf16 %v9413_v27, %v9411_v20  ;;  %v10270_v48 = vand.u32 4294901760, %v9420_v16 }
 0x873   :  { %7313 = vmatpush3.bf16.msra.mxu1 %v9479_v46  ;;  %v4775_v46 = vld [vmem:[%s10024_s15 + $0x18] sm:$0xff]  ;;  %7421 = vmatpush3.bf16.msra.mxu0 %v9610_v44 }
 0x874   :  { %7314 = vmatprep.subr.bf16.mxu1 %v10154_v0  ;;  %7422 = vmatprep.subr.bf16.mxu0 %v10154_v0 }
 0x877   :  { %7316 = vmatpush3.bf16.msra.mxu1 %v9489_v45  ;;  %v4802_v45 = vand.u32 4294901760, %v4774_v63 }
 0x878   :  { %7317 = vmatprep.subr.bf16.mxu1 %v10154_v0 }
 0x879   :  { %v9616_v21 = vsub.f32 %v4774_v63, %v4802_v45  ;;  %v9663_v63 = vpack.c.bf16 %v4823_v36, %v4820_v6  ;;  %v4896_v6 = vand.u32 4294901760, %v9614_v47 }
 0x87b   :  { %7319 = vmatpush3.bf16.msra.mxu1 %v9499_v25  ;;  %v4776_v25 = vld [vmem:[%s10024_s15 + $0x20] sm:$0xff] }
 0x87c   :  { %7320 = vmatprep.subr.bf16.mxu1 %v10154_v0  ;;  %v4808_v41 = vand.u32 4294901760, %v4776_v25 }
 0x87e   :  { %v9625_v18 = vsub.f32 %v4776_v25, %v4808_v41  ;;  %v10256_v25 = vand.u32 4294901760, %v9373_v5  ;;  %v10260_v5 = vand.u32 4294901760, %v9391_v33 }
 0x87f   :  { %7322 = vmatpush3.bf16.msra.mxu1 %v9507_v10  ;;  %v4777_v10 = vld [vmem:[%s10024_s15 + $0x28] sm:$0xff] }
 0x880   :  { %7323 = vmatprep.subr.bf16.mxu1 %v10154_v0  ;;  %v4811_v23 = vand.u32 4294901760, %v4777_v10 }
 0x882   :  { %6443 = vmatmul.mubr.f32.vlgmr.msra.gmra.mrb[38].mxu1 %v9549_v34  ;;  %v9631_v56 = vsub.f32 %v4777_v10, %v4811_v23  ;;  %v9647_v4 = vpack.c.bf16 %v4811_v23, %v4808_v41  ;;  %v10258_v41 = vand.u32 4294901760, %v9377_v55 }
 0x883   :  { %7325 = vmatpush3.bf16.msra.mxu1 %v7324_v54  ;;  %6477 = vmatprep.mubr.msk.f32.mxu1 %vm7696_vm9, %v10165_v60  ;;  %v4805_v54 = vand.u32 4294901760, %v4775_v46 }
 0x884   :  { %7326 = vmatprep.subr.bf16.mxu1 %v10154_v0 }
 0x885   :  { %v9621_v31 = vpack.c.bf16 %v4805_v54, %v4802_v45  ;;  %v9623_v37 = vsub.f32 %v4775_v46, %v4805_v54  ;;  %v10254_v46 = vpack.c.bf16 %v9420_v16, %v9418_v14  ;;  %v10255_v45 = vand.u32 4294901760, %v9371_v49 }
 0x886   :  { %v10257_v54 = vand.u32 4294901760, %v9375_v35  ;;  %v10259_v49 = vand.u32 4294901760, %v9389_v43  ;;  %v10262_v35 = vand.u32 4294901760, %v9395_v19  ;;  %v10268_v19 = vand.u32 4294901760, %v9413_v27 }
 0x887   :  { %7328 = vmatpush3.bf16.msra.mxu1 %v7327_v26  ;;  %v10249_v26 = vpack.c.bf16 %v9391_v33, %v9389_v43  ;;  %7424 = vmatpush3.bf16.msra.mxu0 %v9621_v31  ;;  %v7372_v10 = vpack.c.bf16 %v10256_v25, %v10255_v45  ;;  %v10265_v43 = vand.u32 4294901760, %v9407_v62  ;;  %v10266_v33 = vand.u32 4294901760, %v9409_v59  ;;  %v4785_v62 = vld [vmem:[%s10024_s15 + $0x68] sm:$0xff] }
 0x888   :  { %7329 = vmatprep.subr.bf16.mxu1 %v10154_v0  ;;  %7425 = vmatprep.subr.bf16.mxu0 %v10154_v0  ;;  %v7375_v23 = vpack.c.bf16 %v10258_v41, %v10257_v54  ;;  %v7378_v7 = vpack.c.bf16 %v10260_v5, %v10259_v49  ;;  %v4903_v41 = vand.u32 4294901760, %v9616_v21 }
 0x889   :  { %v7387_v17 = vpack.c.bf16 %v10266_v33, %v10265_v43 }
 0x88a   :  { %v4904_v5 = vsub.f32 %v9616_v21, %v4903_v41 }
 0x88b   :  { %7331 = vmatpush3.bf16.msra.mxu1 %v10249_v26  ;;  %7427 = vmatpush3.bf16.msra.mxu0 %v9647_v4 }
 0x88c   :  { %7332 = vmatprep.subr.bf16.mxu1 %v10154_v0  ;;  %7428 = vmatprep.subr.bf16.mxu0 %v10154_v0 }
 0x88f   :  { %7334 = vmatpush3.bf16.msra.mxu1 %v10250_v61  ;;  %7430 = vmatpush3.bf16.msra.mxu0 %v9655_v11  ;;  %v4897_v61 = vsub.f32 %v9614_v47, %v4896_v6 }
 0x890   :  { %7335 = vmatprep.subr.bf16.mxu1 %v10154_v0  ;;  %7431 = vmatprep.subr.bf16.mxu0 %v10154_v0 }
 0x891   :  { %v4898_v54 = vand.u32 4294901760, %v4897_v61 }
 0x893   :  { %7337 = vmatpush3.bf16.msra.mxu1 %v10251_v51  ;;  %7433 = vmatpush3.bf16.msra.mxu0 %v9663_v63 }
 0x894   :  { %7338 = vmatprep.subr.bf16.mxu1 %v10154_v0  ;;  %7434 = vmatprep.subr.bf16.mxu0 %v10154_v0 }
 0x897   :  { %7340 = vmatpush3.bf16.msra.mxu1 %v10252_v1 }
 0x898   :  { %7341 = vmatprep.subr.bf16.mxu1 %v10154_v0 }
 0x89b   :  { %7343 = vmatpush3.bf16.msra.mxu1 %v10253_v38 }
 0x89c   :  { %7344 = vmatprep.subr.bf16.mxu1 %v10154_v0 }
 0x89f   :  { %7346 = vmatpush3.bf16.msra.mxu1 %v10254_v46 }
 0x8a0   :  { %7347 = vmatprep.subr.bf16.mxu1 %v10154_v0 }
 0x8a2   :  { %6478 = vmatmul.mubr.f32.vlgmr.msra.gmra.mrb[38].mxu1 %v9552_v8  ;;  %v10261_v8 = vand.u32 4294901760, %v9393_v30  ;;  %v10267_v30 = vand.u32 4294901760, %v9411_v20  ;;  %v4835_v20 = vand.u32 4294901760, %v4785_v62 }
 0x8a3   :  { %7349 = vmatpush3.bf16.msra.mxu1 %v9323_v22  ;;  %6512 = vmatprep.mubr.msk.f32.mxu1 %vm7696_vm9, %v10165_v60 }
 0x8a4   :  { %7350 = vmatprep.subr.bf16.mxu1 %v10154_v0  ;;  %v7381_v55 = vpack.c.bf16 %v10262_v35, %v10261_v8  ;;  %v7390_v32 = vpack.c.bf16 %v10268_v19, %v10267_v30  ;;  %v9805_v46 = vsub.f32 %v4785_v62, %v4835_v20  ;;  %v4917_v8 = vand.u32 4294901760, %v9625_v18 }
 0x8a5   :  { %v4924_v35 = vand.u32 4294901760, %v9631_v56  ;;  %v4931_v30 = vand.u32 4294901760, %v9635_v42  ;;  %v4938_v19 = vand.u32 4294901760, %v9637_v39 }
 0x8a7   :  { %7352 = vmatpush3.bf16.msra.mxu1 %v9333_v52 }
 0x8a8   :  { %7353 = vmatprep.subr.bf16.mxu1 %v10154_v0 }
 0x8ab   :  { %7355 = vmatpush3.bf16.msra.mxu1 %v9343_v53 }
 0x8ac   :  { %7356 = vmatprep.subr.bf16.mxu1 %v10154_v0 }
 0x8af   :  { %7358 = vmatpush3.bf16.msra.mxu1 %v9353_v12 }
 0x8b0   :  { %7359 = vmatprep.subr.bf16.mxu1 %v10154_v0 }
 0x8b3   :  { %7361 = vmatpush3.bf16.msra.mxu1 %v9363_v28 }
 0x8b4   :  { %7362 = vmatprep.subr.bf16.mxu1 %v10154_v0 }
 0x8b7   :  { %7364 = vmatpush3.bf16.msra.mxu1 %v9405_v24 }
 0x8b8   :  { %7365 = vmatprep.subr.bf16.mxu1 %v10154_v0 }
 0x8bb   :  { %7367 = vmatpush3.bf16.msra.mxu1 %v9416_v13 }
 0x8bc   :  { %7368 = vmatprep.subr.bf16.mxu1 %v10154_v0 }
 0x8bf   :  { %7370 = vmatpush3.bf16.msra.mxu1 %v9426_v3 }
 0x8c0   :  { %7371 = vmatprep.subr.bf16.mxu1 %v10154_v0 }
 0x8c2   :  { %6513 = vmatmul.mubr.f32.vlgmr.msra.gmra.mrb[38].mxu1 %v4213_v15  ;;  %v10263_v15 = vand.u32 4294901760, %v9401_v9  ;;  %v10269_v9 = vand.u32 4294901760, %v9418_v14  ;;  %v4787_v14 = vld [vmem:[%s10024_s15 + $0x78] sm:$0xff] }
 0x8c3   :  { %7373 = vmatpush3.bf16.msra.mxu1 %v7372_v10  ;;  %6547 = vmatprep.mubr.msk.f32.mxu1 %vm7696_vm9, %v10165_v60 }
 0x8c4   :  { %7374 = vmatprep.subr.bf16.mxu1 %v10154_v0  ;;  %v7384_v57 = vpack.c.bf16 %v10264_v40, %v10263_v15  ;;  %v7393_v50 = vpack.c.bf16 %v10270_v48, %v10269_v9  ;;  %v4918_v40 = vsub.f32 %v9625_v18, %v4917_v8  ;;  %v4932_v9 = vsub.f32 %v9635_v42, %v4931_v30 }
 0x8c5   :  { %v4939_v48 = vsub.f32 %v9637_v39, %v4938_v19 }
 0x8c6   :  { %v4919_v33 = vand.u32 4294901760, %v4918_v40 }
 0x8c7   :  { %7376 = vmatpush3.bf16.msra.mxu1 %v7375_v23  ;;  %v4910_v23 = vand.u32 4294901760, %v9623_v37 }
 0x8c8   :  { %7377 = vmatprep.subr.bf16.mxu1 %v10154_v0 }
 0x8cb   :  { %7379 = vmatpush3.bf16.msra.mxu1 %v7378_v7  ;;  %v4911_v7 = vsub.f32 %v9623_v37, %v4910_v23 }
 0x8cc   :  { %7380 = vmatprep.subr.bf16.mxu1 %v10154_v0 }
 0x8cd   :  { %v4912_v15 = vand.u32 4294901760, %v4911_v7 }
 0x8cf   :  { %7382 = vmatpush3.bf16.msra.mxu1 %v7381_v55  ;;  %v4905_v55 = vand.u32 4294901760, %v4904_v5  ;;  %v10125_v5 = vand.u32 4294901760, %v9805_v46 }
 0x8d0   :  { %7383 = vmatprep.subr.bf16.mxu1 %v10154_v0 }
 0x8d1   :  { %v7447_v43 = vpack.c.bf16 %v4912_v15, %v4905_v55  ;;  %v4981_v15 = vsub.f32 %v9805_v46, %v10125_v5 }
 0x8d3   :  { %7385 = vmatpush3.bf16.msra.mxu1 %v7384_v57  ;;  %v4925_v57 = vsub.f32 %v9631_v56, %v4924_v35 }
 0x8d4   :  { %7386 = vmatprep.subr.bf16.mxu1 %v10154_v0 }
 0x8d7   :  { %7388 = vmatpush3.bf16.msra.mxu1 %v7387_v17  ;;  %v4926_v17 = vand.u32 4294901760, %v4925_v57  ;;  %v4982_v57 = vand.u32 4294901760, %v4981_v15 }
 0x8d8   :  { %7389 = vmatprep.subr.bf16.mxu1 %v10154_v0 }
 0x8db   :  { %7391 = vmatpush3.bf16.msra.mxu1 %v7390_v32  ;;  %v7450_v32 = vpack.c.bf16 %v4926_v17, %v4919_v33 }
 0x8dc   :  { %7392 = vmatprep.subr.bf16.mxu1 %v10154_v0 }
 0x8df   :  { %7394 = vmatpush3.bf16.msra.mxu1 %v7393_v50  ;;  %v4933_v50 = vand.u32 4294901760, %v4932_v9 }
 0x8e0   :  { %7395 = vmatprep.subr.bf16.mxu1 %v10154_v0 }
 0x8e2   :  { %6548 = vmatmul.mubr.f32.vlgmr.msra.gmra.mrb[38].mxu1 %v9549_v34 }
 0x8e3   :  { %7397 = vmatpush3.bf16.msra.mxu1 %v9323_v22  ;;  %6582 = vmatprep.mubr.msk.f32.mxu1 %vm7696_vm9, %v10165_v60  ;;  %v4782_v22 = vld [vmem:[%s10024_s15 + $0x50] sm:$0xff] }
 0x8e4   :  { %7398 = vmatprep.subr.bf16.mxu1 %v10154_v0 }
 0x8e7   :  { %7400 = vmatpush3.bf16.msra.mxu1 %v9333_v52  ;;  %v4783_v52 = vld [vmem:[%s10024_s15 + $0x58] sm:$0xff] }
 0x8e8   :  { %7401 = vmatprep.subr.bf16.mxu1 %v10154_v0 }
 0x8eb   :  { %7403 = vmatpush3.bf16.msra.mxu1 %v9343_v53  ;;  %v4826_v53 = vand.u32 4294901760, %v4782_v22 }
 0x8ec   :  { %7404 = vmatprep.subr.bf16.mxu1 %v10154_v0 }
 0x8ed   :  { %v9799_v51 = vsub.f32 %v4782_v22, %v4826_v53  ;;  %v4940_v22 = vand.u32 4294901760, %v4939_v48 }
 0x8ef   :  { %7406 = vmatpush3.bf16.msra.mxu1 %v9353_v12  ;;  %v4829_v12 = vand.u32 4294901760, %v4783_v52 }
 0x8f0   :  { %7407 = vmatprep.subr.bf16.mxu1 %v10154_v0 }
 0x8f1   :  { %v9801_v1 = vsub.f32 %v4783_v52, %v4829_v12  ;;  %v4945_v52 = vand.u32 4294901760, %v9639_v58 }
 0x8f3   :  { %7409 = vmatpush3.bf16.msra.mxu1 %v9363_v28  ;;  %v9769_v28 = vpack.c.bf16 %v4829_v12, %v4826_v53  ;;  %v4952_v53 = vand.u32 4294901760, %v9641_v2  ;;  %v7453_v12 = vpack.c.bf16 %v4940_v22, %v4933_v50 }
 0x8f4   :  { %7410 = vmatprep.subr.bf16.mxu1 %v10154_v0 }
 0x8f5   :  { %7436 = vmatpush3.bf16.msra.mxu0 %v9769_v28  ;;  %v4953_v62 = vsub.f32 %v9641_v2, %v4952_v53 }
 0x8f6   :  { %7437 = vmatprep.subr.bf16.mxu0 %v10154_v0 }
 0x8f7   :  { %7412 = vmatpush3.bf16.msra.mxu1 %v9405_v24  ;;  %v4784_v24 = vld [vmem:[%s10024_s15 + $0x60] sm:$0xff] }
 0x8f8   :  { %7413 = vmatprep.subr.bf16.mxu1 %v10154_v0  ;;  %v4832_v59 = vand.u32 4294901760, %v4784_v24 }
 0x8fa   :  { %v9779_v27 = vpack.c.bf16 %v4835_v20, %v4832_v59  ;;  %v9803_v38 = vsub.f32 %v4784_v24, %v4832_v59  ;;  %v4946_v24 = vsub.f32 %v9639_v58, %v4945_v52  ;;  %v4954_v20 = vand.u32 4294901760, %v4953_v62 }
 0x8fb   :  { %7415 = vmatpush3.bf16.msra.mxu1 %v9416_v13  ;;  %v4786_v13 = vld [vmem:[%s10024_s15 + $0x70] sm:$0xff] }
 0x8fc   :  { %7416 = vmatprep.subr.bf16.mxu1 %v10154_v0  ;;  %7439 = vmatpush3.bf16.msra.mxu0 %v9779_v27  ;;  %v4838_v16 = vand.u32 4294901760, %v4786_v13  ;;  %v4947_v59 = vand.u32 4294901760, %v4946_v24 }
 0x8fd   :  { %7440 = vmatprep.subr.bf16.mxu0 %v10154_v0 }
 0x8fe   :  { %v9808_v45 = vsub.f32 %v4786_v13, %v4838_v16  ;;  %v4959_v13 = vand.u32 4294901760, %v9799_v51 }
 0x8ff   :  { %7418 = vmatpush3.bf16.msra.mxu1 %v9426_v3  ;;  %v4841_v3 = vand.u32 4294901760, %v4787_v14 }
 0x900   :  { %v10124_v33 = vand.u32 4294901760, %v9808_v45 }
 0x901   :  { %v9791_v36 = vpack.c.bf16 %v4841_v3, %v4838_v16  ;;  %v9810_v25 = vsub.f32 %v4787_v14, %v4841_v3  ;;  %v4966_v14 = vand.u32 4294901760, %v9801_v1  ;;  %v7456_v16 = vpack.c.bf16 %v4954_v20, %v4947_v59 }
 0x902   :  { %6583 = vmatmul.mubr.f32.vlgmr.msra.gmra.mrb[38].mxu1 %v9549_v34  ;;  %v4889_v34 = vand.u32 4294901760, %v9612_v29  ;;  %v4960_v3 = vsub.f32 %v9799_v51, %v4959_v13  ;;  %v4988_v48 = vsub.f32 %v9808_v45, %v10124_v33  ;;  %v7468_v59 = vpack.c.bf16 %v9614_v47, %v9612_v29 }
 0x903   :  { %7442 = vmatpush3.bf16.msra.mxu0 %v9791_v36  ;;  %v10123_v17 = vand.u32 4294901760, %v9810_v25  ;;  %v7471_v20 = vpack.c.bf16 %v9623_v37, %v9616_v21  ;;  %v7489_v15 = vpack.c.bf16 %v9810_v25, %v9808_v45  ;;  %v7525_v47 = vpack.c.bf16 %v4938_v19, %v4931_v30 }
 0x904   :  { %v4890_v26 = vsub.f32 %v9612_v29, %v4889_v34  ;;  %7443 = vmatprep.subr.bf16.mxu0 %v10154_v0  ;;  %v4961_v61 = vand.u32 4294901760, %v4960_v3  ;;  %v4989_v22 = vand.u32 4294901760, %v4988_v48  ;;  %v7474_v3 = vpack.c.bf16 %v9631_v56, %v9625_v18 }
 0x905   :  { %v4995_v50 = vsub.f32 %v9810_v25, %v10123_v17  ;;  %v7522_v29 = vpack.c.bf16 %v4924_v35, %v4917_v8  ;;  %v7528_v21 = vpack.c.bf16 %v4952_v53, %v4945_v52  ;;  %v7531_v37 = vpack.c.bf16 %v4966_v14, %v4959_v13 }
 0x906   :  { %v4891_v10 = vand.u32 4294901760, %v4890_v26  ;;  %v4967_v26 = vsub.f32 %v9801_v1, %v4966_v14  ;;  %v10271_v18 = vand.u32 4294901760, %v9803_v38  ;;  %v10272_v56 = vand.u32 4294901760, %v9805_v46 }
 0x907   :  { %v4996_v24 = vand.u32 4294901760, %v4995_v50 }
 0x908   :  { %v9815_v49 = vpack.c.bf16 %v4898_v54, %v4891_v10  ;;  %v4968_v10 = vand.u32 4294901760, %v4967_v26  ;;  %v10126_v54 = vand.u32 4294901760, %v9803_v38  ;;  %v7477_v26 = vpack.c.bf16 %v9637_v39, %v9635_v42 }
 0x909   :  { %v7465_v62 = vpack.c.bf16 %v4996_v24, %v4989_v22  ;;  %v7534_v42 = vpack.c.bf16 %v10272_v56, %v10271_v18  ;;  %v10273_v39 = vand.u32 4294901760, %v9808_v45 }
 0x90a   :  { %v7459_v7 = vpack.c.bf16 %v4968_v10, %v4961_v61  ;;  %v4974_v55 = vsub.f32 %v9803_v38, %v10126_v54  ;;  %v7480_v61 = vpack.c.bf16 %v9641_v2, %v9639_v58  ;;  %v7483_v10 = vpack.c.bf16 %v9801_v1, %v9799_v51 }
 0x90b   :  { %v10274_v58 = vand.u32 4294901760, %v9810_v25 }
 0x90c   :  { %v4975_v40 = vand.u32 4294901760, %v4974_v55  ;;  %v7486_v55 = vpack.c.bf16 %v9805_v46, %v9803_v38 }
 0x90d   :  { %v7537_v2 = vpack.c.bf16 %v10274_v58, %v10273_v39 }
 0x90e   :  { %v7462_v9 = vpack.c.bf16 %v4982_v57, %v4975_v40  ;;  %v5461_v40 = vld [vmem:[%s10023_s14] ss:$0 sm:$0xff] }
 0x9d5   :  { %v4767_v57 = vpop.f32.mrb[38].mxu1 }
 0x9d6   :  { %v7571_v48 = vadd.f32 %v5461_v40, %v4767_v57  ;;  %v6584_v50 = vpop.f32.mrb[39].mxu1 }
 0x9d8   :  { %v4771_v22 = vmax.f32 %v7571_v48, 0.0 }
 0x9da   :  { %v9890_v24 = vand.u32 4294901760, %v4771_v22 }
 0x9dc   :  { %v4877_v17 = vsub.f32 %v4771_v22, %v9890_v24 }
 0x9de   :  { %v4878_v33 = vand.u32 4294901760, %v4877_v17 }
 0x9e0   :  { %v4879_v5 = vsub.f32 %v4877_v17, %v4878_v33 }
 0x9e2   :  { %v4880_v54 = vand.u32 4294901760, %v4879_v5 }
 0x9e4   :  { %6618 = vmatmul.mubr.f32.vlgmr.msra.gmra.mrb[22].mxu0 %v4880_v54 }
 0x9e5   :  { %7445 = vmatpush3.bf16.msra.mxu0 %v9815_v49  ;;  %6652 = vmatprep.mubr.msk.f32.mxu0 %vm7696_vm9, %v10165_v60  ;;  %v7516_v49 = vpack.c.bf16 %v4896_v6, %v4889_v34 }
 0x9e6   :  { %7446 = vmatprep.subr.bf16.mxu0 %v10154_v0 }
 0x9e9   :  { %7448 = vmatpush3.bf16.msra.mxu0 %v7447_v43  ;;  %v7519_v43 = vpack.c.bf16 %v4910_v23, %v4903_v41 }
 0x9ea   :  { %7449 = vmatprep.subr.bf16.mxu0 %v10154_v0 }
 0x9ed   :  { %7451 = vmatpush3.bf16.msra.mxu0 %v7450_v32 }
 0x9ee   :  { %7452 = vmatprep.subr.bf16.mxu0 %v10154_v0 }
 0x9f1   :  { %7454 = vmatpush3.bf16.msra.mxu0 %v7453_v12 }
 0x9f2   :  { %7455 = vmatprep.subr.bf16.mxu0 %v10154_v0 }
 0x9f5   :  { %7457 = vmatpush3.bf16.msra.mxu0 %v7456_v16 }
 0x9f6   :  { %7458 = vmatprep.subr.bf16.mxu0 %v10154_v0 }
 0x9f9   :  { %7460 = vmatpush3.bf16.msra.mxu0 %v7459_v7 }
 0x9fa   :  { %7461 = vmatprep.subr.bf16.mxu0 %v10154_v0 }
 0x9fd   :  { %7463 = vmatpush3.bf16.msra.mxu0 %v7462_v9 }
 0x9fe   :  { %7464 = vmatprep.subr.bf16.mxu0 %v10154_v0 }
 0xa01   :  { %7466 = vmatpush3.bf16.msra.mxu0 %v7465_v62 }
 0xa02   :  { %7467 = vmatprep.subr.bf16.mxu0 %v10154_v0 }
 0xa04   :  { %6653 = vmatmul.mubr.f32.vlgmr.msra.gmra.mrb[22].mxu0 %v9890_v24 }
 0xa05   :  { %7469 = vmatpush3.bf16.msra.mxu0 %v7468_v59  ;;  %6687 = vmatprep.mubr.msk.f32.mxu0 %vm7696_vm9, %v10165_v60 }
 0xa06   :  { %7470 = vmatprep.subr.bf16.mxu0 %v10154_v0 }
 0xa09   :  { %7472 = vmatpush3.bf16.msra.mxu0 %v7471_v20 }
 0xa0a   :  { %7473 = vmatprep.subr.bf16.mxu0 %v10154_v0 }
 0xa0d   :  { %7475 = vmatpush3.bf16.msra.mxu0 %v7474_v3 }
 0xa0e   :  { %7476 = vmatprep.subr.bf16.mxu0 %v10154_v0 }
 0xa11   :  { %7478 = vmatpush3.bf16.msra.mxu0 %v7477_v26 }
 0xa12   :  { %7479 = vmatprep.subr.bf16.mxu0 %v10154_v0 }
 0xa15   :  { %7481 = vmatpush3.bf16.msra.mxu0 %v7480_v61 }
 0xa16   :  { %7482 = vmatprep.subr.bf16.mxu0 %v10154_v0 }
 0xa19   :  { %7484 = vmatpush3.bf16.msra.mxu0 %v7483_v10 }
 0xa1a   :  { %7485 = vmatprep.subr.bf16.mxu0 %v10154_v0 }
 0xa1d   :  { %7487 = vmatpush3.bf16.msra.mxu0 %v7486_v55 }
 0xa1e   :  { %7488 = vmatprep.subr.bf16.mxu0 %v10154_v0 }
 0xa21   :  { %7490 = vmatpush3.bf16.msra.mxu0 %v7489_v15 }
 0xa22   :  { %7491 = vmatprep.subr.bf16.mxu0 %v10154_v0 }
 0xa24   :  { %6688 = vmatmul.mubr.f32.vlgmr.msra.gmra.mrb[22].mxu0 %v4877_v17 }
 0xa25   :  { %7493 = vmatpush3.bf16.msra.mxu0 %v9610_v44  ;;  %6722 = vmatprep.mubr.msk.f32.mxu0 %vm7696_vm9, %v10165_v60 }
 0xa26   :  { %7494 = vmatprep.subr.bf16.mxu0 %v10154_v0 }
 0xa29   :  { %7496 = vmatpush3.bf16.msra.mxu0 %v9621_v31 }
 0xa2a   :  { %7497 = vmatprep.subr.bf16.mxu0 %v10154_v0 }
 0xa2d   :  { %7499 = vmatpush3.bf16.msra.mxu0 %v9647_v4 }
 0xa2e   :  { %7500 = vmatprep.subr.bf16.mxu0 %v10154_v0 }
 0xa31   :  { %7502 = vmatpush3.bf16.msra.mxu0 %v9655_v11 }
 0xa32   :  { %7503 = vmatprep.subr.bf16.mxu0 %v10154_v0 }
 0xa35   :  { %7505 = vmatpush3.bf16.msra.mxu0 %v9663_v63 }
 0xa36   :  { %7506 = vmatprep.subr.bf16.mxu0 %v10154_v0 }
 0xa39   :  { %7508 = vmatpush3.bf16.msra.mxu0 %v9769_v28 }
 0xa3a   :  { %7509 = vmatprep.subr.bf16.mxu0 %v10154_v0 }
 0xa3d   :  { %7511 = vmatpush3.bf16.msra.mxu0 %v9779_v27 }
 0xa3e   :  { %7512 = vmatprep.subr.bf16.mxu0 %v10154_v0 }
 0xa41   :  { %7514 = vmatpush3.bf16.msra.mxu0 %v9791_v36 }
 0xa42   :  { %7515 = vmatprep.subr.bf16.mxu0 %v10154_v0 }
 0xa44   :  { %6723 = vmatmul.mubr.f32.vlgmr.msra.gmra.mrb[22].mxu0 %v4878_v33 }
 0xa45   :  { %7517 = vmatpush3.bf16.msra.mxu0 %v7516_v49  ;;  %6757 = vmatprep.mubr.msk.f32.mxu0 %vm7696_vm9, %v10165_v60 }
 0xa46   :  { %7518 = vmatprep.subr.bf16.mxu0 %v10154_v0 }
 0xa49   :  { %7520 = vmatpush3.bf16.msra.mxu0 %v7519_v43 }
 0xa4a   :  { %7521 = vmatprep.subr.bf16.mxu0 %v10154_v0 }
 0xa4d   :  { %7523 = vmatpush3.bf16.msra.mxu0 %v7522_v29 }
 0xa4e   :  { %7524 = vmatprep.subr.bf16.mxu0 %v10154_v0 }
 0xa51   :  { %7526 = vmatpush3.bf16.msra.mxu0 %v7525_v47 }
 0xa52   :  { %7527 = vmatprep.subr.bf16.mxu0 %v10154_v0 }
 0xa55   :  { %7529 = vmatpush3.bf16.msra.mxu0 %v7528_v21 }
 0xa56   :  { %7530 = vmatprep.subr.bf16.mxu0 %v10154_v0 }
 0xa59   :  { %7532 = vmatpush3.bf16.msra.mxu0 %v7531_v37 }
 0xa5a   :  { %7533 = vmatprep.subr.bf16.mxu0 %v10154_v0 }
 0xa5d   :  { %7535 = vmatpush3.bf16.msra.mxu0 %v7534_v42 }
 0xa5e   :  { %7536 = vmatprep.subr.bf16.mxu0 %v10154_v0 }
 0xa61   :  { %7538 = vmatpush3.bf16.msra.mxu0 %v7537_v2 }
 0xa62   :  { %7539 = vmatprep.subr.bf16.mxu0 %v10154_v0 }
 0xa64   :  { %6758 = vmatmul.mubr.f32.vlgmr.msra.gmra.mrb[22].mxu0 %v9890_v24 }
 0xa65   :  { %7541 = vmatpush3.bf16.msra.mxu0 %v9610_v44  ;;  %6792 = vmatprep.mubr.msk.f32.mxu0 %vm7696_vm9, %v10165_v60  ;;  %v5462_v60 = vld [vmem:[%s10025_s16] ss:$0 sm:$0xff] }
 0xa66   :  { %7542 = vmatprep.subr.bf16.mxu0 %v10154_v0 }
 0xa69   :  { %7544 = vmatpush3.bf16.msra.mxu0 %v9621_v31 }
 0xa6a   :  { %7545 = vmatprep.subr.bf16.mxu0 %v10154_v0 }
 0xa6d   :  { %7547 = vmatpush3.bf16.msra.mxu0 %v9647_v4 }
 0xa6e   :  { %7548 = vmatprep.subr.bf16.mxu0 %v10154_v0 }
 0xa71   :  { %7550 = vmatpush3.bf16.msra.mxu0 %v9655_v11 }
 0xa72   :  { %7551 = vmatprep.subr.bf16.mxu0 %v10154_v0 }
 0xa75   :  { %7553 = vmatpush3.bf16.msra.mxu0 %v9663_v63 }
 0xa76   :  { %7554 = vmatprep.subr.bf16.mxu0 %v10154_v0 }
 0xa79   :  { %7556 = vmatpush3.bf16.msra.mxu0 %v9769_v28 }
 0xa7a   :  { %7557 = vmatprep.subr.bf16.mxu0 %v10154_v0 }
 0xa7d   :  { %7559 = vmatpush3.bf16.msra.mxu0 %v9779_v27 }
 0xa7e   :  { %7560 = vmatprep.subr.bf16.mxu0 %v10154_v0 }
 0xa81   :  { %7562 = vmatpush3.bf16.msra.mxu0 %v9791_v36 }
 0xa84   :  { %6793 = vmatmul.mubr.f32.vlgmr.msra.gmra.mrb[22].mxu0 %v9890_v24 }
 0xb57   :  { %v5432_v44 = vpop.f32.mrb[22].mxu0 }
 0xb58   :  { %v7572_v31 = vadd.f32 %v5462_v60, %v5432_v44  ;;  %v6794_v4 = vpop.f32.mrb[23].mxu0 }
 0xb5a   :  { %5437 = vst.msk [vmem:[#allocation2] sm:$0x3] %vm5436_vm8, %v7572_v31 }
 0xb5b   :  { %7680 = shalt.err (!%p7677_p4)
}
 0xb5c   :  { %s7681_s0 = scalar_lea.hbm %s10026_s17, 32 }
 0xb5d   :  { %p7682_p5 = scmp.ne.s32.totalorder %s10026_s17, %s7681_s0  ;;  %p7685_p6 = scmp.lt.u32.totalorder %s7681_s0, %s10026_s17 }
 0xb5f   :  { %p7687_p7 = pnand %p7685_p6, %p7682_p5 }
 0xb61   :  { %7690 = shalt.err (!%p7687_p7)
}
 0xb62   :  { %5447 = dma.vmem_to_hbm [thread:$0]  %s5445_s4, 32, %s10026_s17, [#allocation3]  }
 0xb63   :  { %7691 = dma.done.wait [#allocation3], 32  }
 0xb64   :  { %7692 = vsyncadd [#allocation3], 4294967264 }
 0xb65   :  { %5451 = vsyncpa [#allocation3], 1 }

</bundles_post_ra>
